<compile_context>
chip_gen: v5e
topology: v5e:2x2
jax: 0.10.0
libtpu: 0.0.40
codegen_flags: <defaults>
</compile_context>

<pallas_src>
import functools

import jax
import jax.numpy as jnp
from jax.experimental import pallas as pl
from jax.experimental.pallas import tpu as pltpu


# ----------------------- per-generation tiling selection -------------------

def _tpu_vmem_bytes():
    try:
        info = pltpu.get_tpu_info()
        return int(getattr(info, "vmem_capacity_bytes", 64 * 1024 * 1024))
    except Exception:
        return 64 * 1024 * 1024


_VMEM_CAP = _tpu_vmem_bytes()
if _VMEM_CAP >= 100 * 1024 * 1024:
    # v5e / v6e: 128 MiB VMEM -> bigger tiles amortize per-grid-step overhead.
    ROW_TILE, Q_TILE, KV_TILE = 512, 256, 1024
    VMEM_LIMIT_BYTES = 96 * 1024 * 1024
else:
    # v7x (64 MiB VMEM) or unknown: stay conservative.
    ROW_TILE, Q_TILE, KV_TILE = 256, 128, 512
    VMEM_LIMIT_BYTES = 40 * 1024 * 1024


def _cparams(*sem):
    return pltpu.CompilerParams(dimension_semantics=sem,
                                vmem_limit_bytes=VMEM_LIMIT_BYTES)


def _pick_row_tile(M, cap):
    # v7x has two TensorCores fed by "parallel" grid axes: make sure a 1-D row grid
    # has >= 2 steps whenever an 8-aligned split exists.
    tm = min(cap, M)
    if tm >= M and M >= 16 and M % 8 == 0:
        tm = max(8, (M // 2) // 8 * 8)
    return tm


# ----------------------------- Pallas kernels ------------------------------

def _qkv_proj_kernel(x_ref, w_ref, b_ref, q_ref, k_ref, v_ref):
    # Single (tm, D) @ (D, 3D) bf16 matmul (f32 accumulate); three lane-dense bf16 outputs.
    y = jnp.dot(x_ref[...], w_ref[...], preferred_element_type=jnp.float32) + b_ref[...]
    D = q_ref.shape[-1]
    q_ref[...] = y[:, :D].astype(q_ref.dtype)
    k_ref[...] = y[:, D:2 * D].astype(k_ref.dtype)
    v_ref[...] = y[:, 2 * D:].astype(v_ref.dtype)


def _kv_proj_kernel(x_ref, w_ref, b_ref, k_ref, v_ref):
    # Single (tm, D) @ (D, 2D) matmul for cross-attention K/V.
    y = jnp.dot(x_ref[...], w_ref[...], preferred_element_type=jnp.float32) + b_ref[...]
    D = k_ref.shape[-1]
    k_ref[...] = y[:, :D].astype(k_ref.dtype)
    v_ref[...] = y[:, D:].astype(v_ref.dtype)


def _add_layernorm(z, g_ref, bt_ref, eps):
    # LayerNorm1DLayer: scalar learnable gamma/beta, normalize over last dim (f32 stats).
    mean = jnp.mean(z, axis=-1, keepdims=True)
    var = jnp.mean(jnp.square(z - mean), axis=-1, keepdims=True)
    zn = (z - mean) * jax.lax.rsqrt(var + eps)
    return g_ref[0] * zn + bt_ref[0]


def _fused_mha_ln_kernel(*refs, num_heads, scale, has_mask, fuse_q, eps):
    # One (batch, q-tile, kv-tile) grid step: online-softmax attention over all heads,
    # with output projection + residual + LayerNorm fused as the kv==last epilogue.
    i = 0
    if fuse_q:
        x_ref, wq_ref, bq_ref = refs[0], refs[1], refs[2]   # x is residual AND Q source
        i = 3
    else:
        q_ref, x_ref = refs[0], refs[1]                     # precomputed Q; x is residual
        i = 2
    k_ref, v_ref = refs[i], refs[i + 1]
    i += 2
    if has_mask:
        bias_ref = refs[i]                                  # bf16 additive bias (tq, tk)
        i += 1
    wo_ref, bo_ref, g_ref, bt_ref, o_ref = refs[i:i + 5]
    i += 5
    m_sc, l_sc, acc_sc = refs[i:i + 3]                      # (H,tq,1),(H,tq,1),(H,tq,dh)
    i += 3
    q_sc = refs[i] if fuse_q else None                      # (tq, D) bf16 scratch

    kv = pl.program_id(2)
    D = x_ref.shape[-1]
    dh = D // num_heads

    @pl.when(kv == 0)
    def _init():
        m_sc[...] = jnp.full_like(m_sc, -jnp.inf)
        l_sc[...] = jnp.zeros_like(l_sc)
        acc_sc[...] = jnp.zeros_like(acc_sc)
        if fuse_q:
            # Cross-attention Q projection, computed once per q-tile (kv==0).
            q_sc[...] = (jnp.dot(x_ref[...], wq_ref[...],
                                 preferred_element_type=jnp.float32)
                         + bq_ref[...]).astype(q_sc.dtype)

    q_all = q_sc[...] if fuse_q else q_ref[...]             # (tq, D) bf16
    k_all = k_ref[...]                                      # (tk, D) bf16
    v_all = v_ref[...]                                      # (tk, D) bf16
    bias = bias_ref[...].astype(jnp.float32) if has_mask else None

    for h in range(num_heads):
        lo = h * dh
        qh = jax.lax.slice_in_dim(q_all, lo, lo + dh, axis=1)   # (tq, dh)
        kh = jax.lax.slice_in_dim(k_all, lo, lo + dh, axis=1)   # (tk, dh)
        vh = jax.lax.slice_in_dim(v_all, lo, lo + dh, axis=1)   # (tk, dh)
        s = jax.lax.dot_general(qh, kh, (((1,), (1,)), ((), ())),
                                preferred_element_type=jnp.float32) * scale
        if has_mask:
            s = s + bias
        m_prev = m_sc[h]
        m_new = jnp.maximum(m_prev, jnp.max(s, axis=-1, keepdims=True))
        alpha = jnp.exp(m_prev - m_new)
        p = jnp.exp(s - m_new)
        l_sc[h] = alpha * l_sc[h] + jnp.sum(p, axis=-1, keepdims=True)
        acc_sc[h] = alpha * acc_sc[h] + jnp.dot(p.astype(vh.dtype), vh,
                                                preferred_element_type=jnp.float32)
        m_sc[h] = m_new

    @pl.when(kv == pl.num_programs(2) - 1)
    def _finalize():
        # out = LN(residual + concat_h(attn_h) @ wo + bo); the concat is folded into a
        # per-head accumulation attn_h @ wo[h*dh:(h+1)*dh, :] (no concat, no extra temp).
        wo_all = wo_ref[...]
        y = x_ref[...].astype(jnp.float32) + bo_ref[...]
        for h in range(num_heads):
            lo = h * dh
            ah = acc_sc[h] / l_sc[h]                             # exact normalization
            wh = jax.lax.slice_in_dim(wo_all, lo, lo + dh, axis=0)
            y = y + jnp.dot(ah.astype(wo_all.dtype), wh,
                            preferred_element_type=jnp.float32)
        o_ref[...] = _add_layernorm(y, g_ref, bt_ref, eps).astype(o_ref.dtype)


def _ffn_add_ln_kernel(x_ref, w1_ref, b1_ref, w2_ref, b2_ref, g_ref, bt_ref, o_ref, *, eps):
    # out = LN(x + relu(x @ W1 + b1) @ W2 + b2)   (dropout omitted: inference mode)
    # TODO(synk): stream the d_ff contraction / bound h's live range for production d_ff.
    x = x_ref[...]
    h = jnp.dot(x, w1_ref[...], preferred_element_type=jnp.float32) + b1_ref[...]
    h = jnp.maximum(h, 0.0).astype(w2_ref.dtype)
    y = jnp.dot(h, w2_ref[...], preferred_element_type=jnp.float32) + b2_ref[...]
    z = x.astype(jnp.float32) + y
    o_ref[...] = _add_layernorm(z, g_ref, bt_ref, eps).astype(o_ref.dtype)


# ----------------------------- wrappers -------------------------------------

def qkv_projection(x2d, w_qkv, b_qkv):
    M, D = x2d.shape
    N = w_qkv.shape[1]                       # 3*D
    tm = _pick_row_tile(M, ROW_TILE)
    out_sds = jax.ShapeDtypeStruct((M, D), jnp.bfloat16)
    out_spec = pl.BlockSpec((tm, D), lambda i: (i, 0))
    return pl.pallas_call(
        _qkv_proj_kernel,
        out_shape=(out_sds, out_sds, out_sds),
        grid=(pl.cdiv(M, tm),),
        in_specs=[
            pl.BlockSpec((tm, D), lambda i: (i, 0)),
            pl.BlockSpec((D, N), lambda i: (0, 0)),
            pl.BlockSpec((1, N), lambda i: (0, 0)),
        ],
        out_specs=(out_spec, out_spec, out_spec),
        compiler_params=_cparams("parallel"),
    )(x2d, w_qkv, b_qkv.reshape(1, N))


def kv_projection(x2d, w_kv, b_kv):
    M, D = x2d.shape
    N = w_kv.shape[1]                        # 2*D
    tm = _pick_row_tile(M, ROW_TILE)
    out_sds = jax.ShapeDtypeStruct((M, D), jnp.bfloat16)
    out_spec = pl.BlockSpec((tm, D), lambda i: (i, 0))
    return pl.pallas_call(
        _kv_proj_kernel,
        out_shape=(out_sds, out_sds),
        grid=(pl.cdiv(M, tm),),
        in_specs=[
            pl.BlockSpec((tm, D), lambda i: (i, 0)),
            pl.BlockSpec((D, N), lambda i: (0, 0)),
            pl.BlockSpec((1, N), lambda i: (0, 0)),
        ],
        out_specs=(out_spec, out_spec),
        compiler_params=_cparams("parallel"),
    )(x2d, w_kv, b_kv.reshape(1, N))


def fused_attention_ln(x_res, k, v, mask_bias, wo, bo, gamma, beta, num_heads,
                       *, q=None, wq=None, bq=None, eps=1e-6):
    """LN(x_res + MHA(q, k, v) @ wo + bo), all heads per grid step, bf16 output.

    If q is None, the query projection (x_res @ wq + bq) is fused into the kernel.
    mask_bias: additive bf16 bias with shape (1, Sq, Sk) or (B, Sq, Sk), or None.
    """
    B, Sq, D = x_res.shape
    Sk = k.shape[1]
    dh = D // num_heads
    scale = 1.0 / (dh ** 0.5)
    fuse_q = q is None
    has_mask = mask_bias is not None

    tq = min(Q_TILE, Sq)
    tk = min(KV_TILE, Sk)
    if Sk % tk != 0:
        tk = Sk   # TODO(synk): mask ragged KV blocks with an in-kernel iota compare.

    kernel = functools.partial(_fused_mha_ln_kernel, num_heads=num_heads, scale=scale,
                               has_mask=has_mask, fuse_q=fuse_q, eps=eps)

    row_spec = pl.BlockSpec((pl.Squeezed(), tq, D), lambda b, i, kv: (b, i, 0))
    kv_spec = pl.BlockSpec((pl.Squeezed(), tk, D), lambda b, i, kv: (b, kv, 0))
    w_dd_spec = pl.BlockSpec((D, D), lambda b, i, kv: (0, 0))
    b_1d_spec = pl.BlockSpec((1, D), lambda b, i, kv: (0, 0))
    smem_spec = pl.BlockSpec(memory_space=pltpu.MemorySpace.SMEM)

    in_specs, args = [], []
    if fuse_q:
        in_specs += [row_spec, w_dd_spec, b_1d_spec]
        args += [x_res, wq, bq.reshape(1, D)]
    else:
        in_specs += [row_spec, row_spec]
        args += [q, x_res]
    in_specs += [kv_spec, kv_spec]
    args += [k, v]
    if has_mask:
        if mask_bias.shape[0] == 1:
            mask_map = lambda b, i, kv: (0, i, kv)
        else:
            mask_map = lambda b, i, kv: (b, i, kv)
        in_specs.append(pl.BlockSpec((pl.Squeezed(), tq, tk), mask_map))
        args.append(mask_bias)
    in_specs += [w_dd_spec, b_1d_spec, smem_spec, smem_spec]
    args += [wo, bo.reshape(1, D), gamma, beta]

    scratch = [pltpu.VMEM((num_heads, tq, 1), jnp.float32),   # m (online-softmax max)
               pltpu.VMEM((num_heads, tq, 1), jnp.float32),   # l (online-softmax denom)
               pltpu.VMEM((num_heads, tq, dh), jnp.float32)]  # acc (PV accumulator)
    if fuse_q:
        scratch.append(pltpu.VMEM((tq, D), jnp.bfloat16))     # projected Q

    return pl.pallas_call(
        kernel,
        out_shape=jax.ShapeDtypeStruct((B, Sq, D), jnp.bfloat16),
        grid=(B, pl.cdiv(Sq, tq), pl.cdiv(Sk, tk)),
        in_specs=in_specs,
        out_specs=row_spec,
        scratch_shapes=scratch,
        compiler_params=_cparams("parallel", "parallel", "arbitrary"),
    )(*args)


def ffn_add_layer_norm(x2d, w1, b1, w2, b2, gamma, beta, *, eps=1e-6):
    M, D = x2d.shape
    F = w1.shape[1]
    tm = _pick_row_tile(M, ROW_TILE)
    kernel = functools.partial(_ffn_add_ln_kernel, eps=eps)
    # TODO(synk): add a streamed d_ff reduction grid axis for production sizes
    #             (W1/W2 are fully resident here).
    return pl.pallas_call(
        kernel,
        out_shape=jax.ShapeDtypeStruct((M, D), jnp.float32),
        grid=(pl.cdiv(M, tm),),
        in_specs=[
            pl.BlockSpec((tm, D), lambda i: (i, 0)),
            pl.BlockSpec((D, F), lambda i: (0, 0)),
            pl.BlockSpec((1, F), lambda i: (0, 0)),
            pl.BlockSpec((F, D), lambda i: (0, 0)),
            pl.BlockSpec((1, D), lambda i: (0, 0)),
            pl.BlockSpec(memory_space=pltpu.MemorySpace.SMEM),
            pl.BlockSpec(memory_space=pltpu.MemorySpace.SMEM),
        ],
        out_specs=pl.BlockSpec((tm, D), lambda i: (i, 0)),
        compiler_params=_cparams("parallel"),
    )(x2d, w1, b1.reshape(1, F), w2, b2.reshape(1, D), gamma, beta)


def _mask_to_bias(mask):
    # 0 == masked-out (per module spec). Pre-bake a bf16 additive bias (half the DMA of f32).
    if mask is None:
        return None
    return jnp.where(mask == 0, -1e9, 0.0).astype(jnp.bfloat16)


def transformer_decoder_block(x, encoder_output, encoder_mask, decoder_mask,
                              params, num_heads):
    B, Sd, D = x.shape
    Se = encoder_output.shape[1]
    M = B * Sd

    xb = x.astype(jnp.bfloat16)
    enc_b = encoder_output.astype(jnp.bfloat16)
    dec_bias = _mask_to_bias(decoder_mask)
    enc_bias = _mask_to_bias(encoder_mask)

    # 1) self-attention: fused QKV projection, then attention fused with
    #    output-projection + residual + LayerNorm.
    p = params["self_attn"]
    q, k, v = qkv_projection(xb.reshape(M, D), p["wqkv"], p["bqkv"])
    x1 = fused_attention_ln(xb, k.reshape(B, Sd, D), v.reshape(B, Sd, D),
                            dec_bias, p["wo"], p["bo"],
                            params["ln1_g"], params["ln1_b"], num_heads,
                            q=q.reshape(B, Sd, D))

    # 2) cross-attention: fused K/V projection on the encoder output; Q projection,
    #    output-projection, residual and LayerNorm all fused into the attention kernel.
    p = params["cross_attn"]
    k, v = kv_projection(enc_b.reshape(B * Se, D), p["wkv"], p["bkv"])
    x2 = fused_attention_ln(x1, k.reshape(B, Se, D), v.reshape(B, Se, D),
                            enc_bias, p["wo"], p["bo"],
                            params["ln2_g"], params["ln2_b"], num_heads,
                            wq=p["wq"], bq=p["bq"])

    # 3) feed-forward fused with residual + LayerNorm (f32 final output).
    out = ffn_add_layer_norm(x2.reshape(M, D), params["w1"], params["b1"],
                             params["w2"], params["b2"],
                             params["ln3_g"], params["ln3_b"])
    return out.reshape(B, Sd, D)


# ----------------------------- parameter init -------------------------------

def _lin_init(key, fan_in, fan_out):
    kw, kb = jax.random.split(key)
    w = jax.random.normal(kw, (fan_in, fan_out), jnp.float32) * 0.02
    b = jax.random.normal(kb, (fan_out,), jnp.float32) * 0.02
    # bf16 weights feed the MXU natively; biases stay f32 (added to the f32 accumulator).
    return w.astype(jnp.bfloat16), b


def init_params(key, d_model, d_ff):
    keys = jax.random.split(key, 10)

    def mha_params(ks, fuse_qkv):
        wq, bq = _lin_init(ks[0], d_model, d_model)
        wk, bk = _lin_init(ks[1], d_model, d_model)
        wv, bv = _lin_init(ks[2], d_model, d_model)
        wo, bo = _lin_init(ks[3], d_model, d_model)
        if fuse_qkv:
            return dict(wqkv=jnp.concatenate([wq, wk, wv], axis=1),
                        bqkv=jnp.concatenate([bq, bk, bv]),
                        wo=wo, bo=bo)
        return dict(wq=wq, bq=bq,
                    wkv=jnp.concatenate([wk, wv], axis=1),
                    bkv=jnp.concatenate([bk, bv]),
                    wo=wo, bo=bo)

    w1, b1 = _lin_init(keys[8], d_model, d_ff)
    w2, b2 = _lin_init(keys[9], d_ff, d_model)
    return dict(
        self_attn=mha_params(keys[0:4], fuse_qkv=True),
        cross_attn=mha_params(keys[4:8], fuse_qkv=False),
        w1=w1, b1=b1, w2=w2, b2=b2,
        # LayerNorm1DLayer(): scalar learnable scale/bias, eps=1e-6
        ln1_g=jnp.ones((1,), jnp.float32), ln1_b=jnp.zeros((1,), jnp.float32),
        ln2_g=jnp.ones((1,), jnp.float32), ln2_b=jnp.zeros((1,), jnp.float32),
        ln3_g=jnp.ones((1,), jnp.float32), ln3_b=jnp.zeros((1,), jnp.float32),
    )


# ----------------------------- main ------------------------------------------

if __name__ == "__main__":
    B, S_dec, S_enc = 2, 8, 8
    d_model, num_heads, d_ff = 32, 4, 64

    key = jax.random.PRNGKey(0)
    k_x, k_enc, k_p = jax.random.split(key, 3)

    x = jax.random.normal(k_x, (B, S_dec, d_model), jnp.float32)
    encoder_output = jax.random.normal(k_enc, (B, S_enc, d_model), jnp.float32)

    # Causal decoder mask (0 == masked); shared across the batch -> shape (1, S, S)
    # so no B-fold HBM duplication. Encoder mask left as None (no masking).
    decoder_mask = jnp.tril(jnp.ones((S_dec, S_dec), jnp.float32))[None, :, :]
    encoder_mask = None

    params = init_params(k_p, d_model, d_ff)

    fwd = jax.jit(functools.partial(transformer_decoder_block, num_heads=num_heads))
    out = fwd(x, encoder_output, encoder_mask, decoder_mask, params)
    out = jax.block_until_ready(out)
    assert out.shape == (B, S_dec, d_model)
    assert bool(jnp.all(jnp.isfinite(out)))
    print("KERNEL_OK")
</pallas_src>

<mosaic_0001>
module attributes {stable_mosaic.version = 11 : i64} {
  func.func @_qkv_proj_kernel(%arg0: i32, %arg1: memref<8x32xbf16, #tpu.memory_space<vmem>>, %arg2: memref<32x96xbf16, #tpu.memory_space<vmem>>, %arg3: memref<1x96xf32, #tpu.memory_space<vmem>>, %arg4: memref<8x32xbf16, #tpu.memory_space<vmem>>, %arg5: memref<8x32xbf16, #tpu.memory_space<vmem>>, %arg6: memref<8x32xbf16, #tpu.memory_space<vmem>>) attributes {dimension_semantics = [#tpu.dimension_semantics<parallel>], iteration_bounds = array<i64: 2>, scalar_prefetch = 0 : i64, scratch_operands = 0 : i64, tpu.core_type = #tpu.core_type<tc>, window_params = [{transform_indices = @transform_0, window_bounds = array<i64: 8, 32>}, {pipeline_mode = #tpu.pipeline_mode<synchronous>, transform_indices = @transform_1, window_bounds = array<i64: 32, 96>}, {pipeline_mode = #tpu.pipeline_mode<synchronous>, transform_indices = @transform_2, window_bounds = array<i64: 1, 96>}, {transform_indices = @transform_3, window_bounds = array<i64: 8, 32>}, {transform_indices = @transform_4, window_bounds = array<i64: 8, 32>}, {transform_indices = @transform_5, window_bounds = array<i64: 8, 32>}]} {
    %c0 = arith.constant 0 : index
    %c0_0 = arith.constant 0 : index
    %0 = vector.load %arg1[%c0, %c0_0] : memref<8x32xbf16, #tpu.memory_space<vmem>>, vector<8x32xbf16>
    %c0_1 = arith.constant 0 : index
    %c0_2 = arith.constant 0 : index
    %1 = vector.load %arg2[%c0_1, %c0_2] : memref<32x96xbf16, #tpu.memory_space<vmem>>, vector<32x96xbf16>
    %cst = arith.constant dense<0.000000e+00> : vector<8x96xf32>
    %2 = tpu.matmul %0, %1, %cst {dimension_numbers = #tpu.dot_dimension_numbers<[1], [0], [0], [1], [0, 0, 1, 1], [], []>} : vector<8x32xbf16>, vector<32x96xbf16>, vector<8x96xf32> -> vector<8x96xf32>
    %c0_3 = arith.constant 0 : index
    %c0_4 = arith.constant 0 : index
    %3 = vector.load %arg3[%c0_3, %c0_4] : memref<1x96xf32, #tpu.memory_space<vmem>>, vector<1x96xf32>
    %4 = vector.broadcast %3 : vector<1x96xf32> to vector<8x96xf32>
    %5 = arith.addf %2, %4 : vector<8x96xf32>
    %6 = vector.extract_strided_slice %5 {offsets = [0, 0], sizes = [8, 32], strides = [1, 1]} : vector<8x96xf32> to vector<8x32xf32>
    %7 = arith.truncf %6 : vector<8x32xf32> to vector<8x32xbf16>
    %c0_5 = arith.constant 0 : index
    %c0_6 = arith.constant 0 : index
    %8 = vector.load %arg4[%c0_5, %c0_6] : memref<8x32xbf16, #tpu.memory_space<vmem>>, vector<8x32xbf16>
    tpu.vector_store %arg4[%c0_5, %c0_6], %7 {strides = array<i32>} : memref<8x32xbf16, #tpu.memory_space<vmem>>, vector<8x32xbf16>,
    %9 = vector.extract_strided_slice %5 {offsets = [0, 32], sizes = [8, 32], strides = [1, 1]} : vector<8x96xf32> to vector<8x32xf32>
    %10 = arith.truncf %9 : vector<8x32xf32> to vector<8x32xbf16>
    %c0_7 = arith.constant 0 : index
    %c0_8 = arith.constant 0 : index
    %11 = vector.load %arg5[%c0_7, %c0_8] : memref<8x32xbf16, #tpu.memory_space<vmem>>, vector<8x32xbf16>
    tpu.vector_store %arg5[%c0_7, %c0_8], %10 {strides = array<i32>} : memref<8x32xbf16, #tpu.memory_space<vmem>>, vector<8x32xbf16>,
    %12 = vector.extract_strided_slice %5 {offsets = [0, 64], sizes = [8, 32], strides = [1, 1]} : vector<8x96xf32> to vector<8x32xf32>
    %13 = arith.truncf %12 : vector<8x32xf32> to vector<8x32xbf16>
    %c0_9 = arith.constant 0 : index
    %c0_10 = arith.constant 0 : index
    %14 = vector.load %arg6[%c0_9, %c0_10] : memref<8x32xbf16, #tpu.memory_space<vmem>>, vector<8x32xbf16>
    tpu.vector_store %arg6[%c0_9, %c0_10], %13 {strides = array<i32>} : memref<8x32xbf16, #tpu.memory_space<vmem>>, vector<8x32xbf16>,
    return
  }
  func.func @transform_0(%arg0: i32) -> (i32, i32) {
    %c0_i32 = arith.constant 0 : i32
    %c0_i32_0 = arith.constant 0 : i32
    return %arg0, %c0_i32 : i32, i32
  }
  func.func @transform_1(%arg0: i32) -> (i32, i32) {
    %c0_i32 = arith.constant 0 : i32
    %c0_i32_0 = arith.constant 0 : i32
    %c0_i32_1 = arith.constant 0 : i32
    return %c0_i32, %c0_i32_0 : i32, i32
  }
  func.func @transform_2(%arg0: i32) -> (i32, i32) {
    %c0_i32 = arith.constant 0 : i32
    %c0_i32_0 = arith.constant 0 : i32
    %c0_i32_1 = arith.constant 0 : i32
    return %c0_i32, %c0_i32_0 : i32, i32
  }
  func.func @transform_3(%arg0: i32) -> (i32, i32) {
    %c0_i32 = arith.constant 0 : i32
    %c0_i32_0 = arith.constant 0 : i32
    return %arg0, %c0_i32 : i32, i32
  }
  func.func @transform_4(%arg0: i32) -> (i32, i32) {
    %c0_i32 = arith.constant 0 : i32
    %c0_i32_0 = arith.constant 0 : i32
    return %arg0, %c0_i32 : i32, i32
  }
  func.func @transform_5(%arg0: i32) -> (i32, i32) {
    %c0_i32 = arith.constant 0 : i32
    %c0_i32_0 = arith.constant 0 : i32
    return %arg0, %c0_i32 : i32, i32
  }
}

module attributes {stable_mosaic.version = 11 : i64} {
  func.func @_kv_proj_kernel(%arg0: i32, %arg1: memref<8x32xbf16, #tpu.memory_space<vmem>>, %arg2: memref<32x64xbf16, #tpu.memory_space<vmem>>, %arg3: memref<1x64xf32, #tpu.memory_space<vmem>>, %arg4: memref<8x32xbf16, #tpu.memory_space<vmem>>, %arg5: memref<8x32xbf16, #tpu.memory_space<vmem>>) attributes {dimension_semantics = [#tpu.dimension_semantics<parallel>], iteration_bounds = array<i64: 2>, scalar_prefetch = 0 : i64, scratch_operands = 0 : i64, tpu.core_type = #tpu.core_type<tc>, window_params = [{transform_indices = @transform_0, window_bounds = array<i64: 8, 32>}, {pipeline_mode = #tpu.pipeline_mode<synchronous>, transform_indices = @transform_1, window_bounds = array<i64: 32, 64>}, {pipeline_mode = #tpu.pipeline_mode<synchronous>, transform_indices = @transform_2, window_bounds = array<i64: 1, 64>}, {transform_indices = @transform_3, window_bounds = array<i64: 8, 32>}, {transform_indices = @transform_4, window_bounds = array<i64: 8, 32>}]} {
    %c0 = arith.constant 0 : index
    %c0_0 = arith.constant 0 : index
    %0 = vector.load %arg1[%c0, %c0_0] : memref<8x32xbf16, #tpu.memory_space<vmem>>, vector<8x32xbf16>
    %c0_1 = arith.constant 0 : index
    %c0_2 = arith.constant 0 : index
    %1 = vector.load %arg2[%c0_1, %c0_2] : memref<32x64xbf16, #tpu.memory_space<vmem>>, vector<32x64xbf16>
    %cst = arith.constant dense<0.000000e+00> : vector<8x64xf32>
    %2 = tpu.matmul %0, %1, %cst {dimension_numbers = #tpu.dot_dimension_numbers<[1], [0], [0], [1], [0, 0, 1, 1], [], []>} : vector<8x32xbf16>, vector<32x64xbf16>, vector<8x64xf32> -> vector<8x64xf32>
    %c0_3 = arith.constant 0 : index
    %c0_4 = arith.constant 0 : index
    %3 = vector.load %arg3[%c0_3, %c0_4] : memref<1x64xf32, #tpu.memory_space<vmem>>, vector<1x64xf32>
    %4 = vector.broadcast %3 : vector<1x64xf32> to vector<8x64xf32>
    %5 = arith.addf %2, %4 : vector<8x64xf32>
    %6 = vector.extract_strided_slice %5 {offsets = [0, 0], sizes = [8, 32], strides = [1, 1]} : vector<8x64xf32> to vector<8x32xf32>
    %7 = arith.truncf %6 : vector<8x32xf32> to vector<8x32xbf16>
    %c0_5 = arith.constant 0 : index
    %c0_6 = arith.constant 0 : index
    %8 = vector.load %arg4[%c0_5, %c0_6] : memref<8x32xbf16, #tpu.memory_space<vmem>>, vector<8x32xbf16>
    tpu.vector_store %arg4[%c0_5, %c0_6], %7 {strides = array<i32>} : memref<8x32xbf16, #tpu.memory_space<vmem>>, vector<8x32xbf16>,
    %9 = vector.extract_strided_slice %5 {offsets = [0, 32], sizes = [8, 32], strides = [1, 1]} : vector<8x64xf32> to vector<8x32xf32>
    %10 = arith.truncf %9 : vector<8x32xf32> to vector<8x32xbf16>
    %c0_7 = arith.constant 0 : index
    %c0_8 = arith.constant 0 : index
    %11 = vector.load %arg5[%c0_7, %c0_8] : memref<8x32xbf16, #tpu.memory_space<vmem>>, vector<8x32xbf16>
    tpu.vector_store %arg5[%c0_7, %c0_8], %10 {strides = array<i32>} : memref<8x32xbf16, #tpu.memory_space<vmem>>, vector<8x32xbf16>,
    return
  }
  func.func @transform_0(%arg0: i32) -> (i32, i32) {
    %c0_i32 = arith.constant 0 : i32
    %c0_i32_0 = arith.constant 0 : i32
    return %arg0, %c0_i32 : i32, i32
  }
  func.func @transform_1(%arg0: i32) -> (i32, i32) {
    %c0_i32 = arith.constant 0 : i32
    %c0_i32_0 = arith.constant 0 : i32
    %c0_i32_1 = arith.constant 0 : i32
    return %c0_i32, %c0_i32_0 : i32, i32
  }
  func.func @transform_2(%arg0: i32) -> (i32, i32) {
    %c0_i32 = arith.constant 0 : i32
    %c0_i32_0 = arith.constant 0 : i32
    %c0_i32_1 = arith.constant 0 : i32
    return %c0_i32, %c0_i32_0 : i32, i32
  }
  func.func @transform_3(%arg0: i32) -> (i32, i32) {
    %c0_i32 = arith.constant 0 : i32
    %c0_i32_0 = arith.constant 0 : i32
    return %arg0, %c0_i32 : i32, i32
  }
  func.func @transform_4(%arg0: i32) -> (i32, i32) {
    %c0_i32 = arith.constant 0 : i32
    %c0_i32_0 = arith.constant 0 : i32
    return %arg0, %c0_i32 : i32, i32
  }
}

module attributes {stable_mosaic.version = 11 : i64} {
  func.func @_fused_mha_ln_kernel(%arg0: i32, %arg1: i32, %arg2: i32, %arg3: memref<1x8x32xbf16, #tpu.memory_space<vmem>>, %arg4: memref<32x32xbf16, #tpu.memory_space<vmem>>, %arg5: memref<1x32xf32, #tpu.memory_space<vmem>>, %arg6: memref<1x8x32xbf16, #tpu.memory_space<vmem>>, %arg7: memref<1x8x32xbf16, #tpu.memory_space<vmem>>, %arg8: memref<32x32xbf16, #tpu.memory_space<vmem>>, %arg9: memref<1x32xf32, #tpu.memory_space<vmem>>, %arg10: memref<1xf32, #tpu.memory_space<smem>>, %arg11: memref<1xf32, #tpu.memory_space<smem>>, %arg12: memref<1x8x32xbf16, #tpu.memory_space<vmem>>, %arg13: memref<4x8x1xf32, #tpu.memory_space<vmem>>, %arg14: memref<4x8x1xf32, #tpu.memory_space<vmem>>, %arg15: memref<4x8x8xf32, #tpu.memory_space<vmem>>, %arg16: memref<8x32xbf16, #tpu.memory_space<vmem>>) attributes {dimension_semantics = [#tpu.dimension_semantics<parallel>, #tpu.dimension_semantics<parallel>, #tpu.dimension_semantics<arbitrary>], iteration_bounds = array<i64: 2, 1, 1>, scalar_prefetch = 0 : i64, scratch_operands = 4 : i64, tpu.core_type = #tpu.core_type<tc>, window_params = [{transform_indices = @transform_0, window_bounds = array<i64: 1, 8, 32>}, {pipeline_mode = #tpu.pipeline_mode<synchronous>, transform_indices = @transform_1, window_bounds = array<i64: 32, 32>}, {pipeline_mode = #tpu.pipeline_mode<synchronous>, transform_indices = @transform_2, window_bounds = array<i64: 1, 32>}, {transform_indices = @transform_3, window_bounds = array<i64: 1, 8, 32>}, {transform_indices = @transform_4, window_bounds = array<i64: 1, 8, 32>}, {pipeline_mode = #tpu.pipeline_mode<synchronous>, transform_indices = @transform_5, window_bounds = array<i64: 32, 32>}, {pipeline_mode = #tpu.pipeline_mode<synchronous>, transform_indices = @transform_6, window_bounds = array<i64: 1, 32>}, {transform_indices = @transform_7, window_bounds = array<i64: 1>}, {transform_indices = @transform_8, window_bounds = array<i64: 1>}, {transform_indices = @transform_9, window_bounds = array<i64: 1, 8, 32>}]} {
    %c0_i32 = arith.constant 0 : i32
    %0 = arith.cmpi eq, %arg2, %c0_i32 : i32
    %1 = arith.extui %0 : i1 to i32
    %c0_i32_0 = arith.constant 0 : i32
    %2 = arith.cmpi ne, %1, %c0_i32_0 : i32
    scf.if %2 {
      %cst_98 = arith.constant 0xFF800000 : f32
      %163 = vector.broadcast %cst_98 : f32 to vector<4x8x1xf32>
      %c0_99 = arith.constant 0 : index
      %c0_100 = arith.constant 0 : index
      %c0_101 = arith.constant 0 : index
      %164 = vector.load %arg13[%c0_99, %c0_100, %c0_101] : memref<4x8x1xf32, #tpu.memory_space<vmem>>, vector<4x8x1xf32>
      tpu.vector_store %arg13[%c0_99, %c0_100, %c0_101], %163 {strides = array<i32>} : memref<4x8x1xf32, #tpu.memory_space<vmem>>, vector<4x8x1xf32>,
      %cst_102 = arith.constant 0.000000e+00 : f32
      %165 = vector.broadcast %cst_102 : f32 to vector<4x8x1xf32>
      %c0_103 = arith.constant 0 : index
      %c0_104 = arith.constant 0 : index
      %c0_105 = arith.constant 0 : index
      %166 = vector.load %arg14[%c0_103, %c0_104, %c0_105] : memref<4x8x1xf32, #tpu.memory_space<vmem>>, vector<4x8x1xf32>
      tpu.vector_store %arg14[%c0_103, %c0_104, %c0_105], %165 {strides = array<i32>} : memref<4x8x1xf32, #tpu.memory_space<vmem>>, vector<4x8x1xf32>,
      %cst_106 = arith.constant 0.000000e+00 : f32
      %167 = vector.broadcast %cst_106 : f32 to vector<4x8x8xf32>
      %c0_107 = arith.constant 0 : index
      %c0_108 = arith.constant 0 : index
      %c0_109 = arith.constant 0 : index
      %168 = vector.load %arg15[%c0_107, %c0_108, %c0_109] : memref<4x8x8xf32, #tpu.memory_space<vmem>>, vector<4x8x8xf32>
      tpu.vector_store %arg15[%c0_107, %c0_108, %c0_109], %167 {strides = array<i32>} : memref<4x8x8xf32, #tpu.memory_space<vmem>>, vector<4x8x8xf32>,
      %c0_110 = arith.constant 0 : index
      %c0_111 = arith.constant 0 : index
      %c0_112 = arith.constant 0 : index
      %169 = vector.load %arg3[%c0_110, %c0_111, %c0_112] : memref<1x8x32xbf16, #tpu.memory_space<vmem>>, vector<1x8x32xbf16>
      %170 = vector.shape_cast %169 : vector<1x8x32xbf16> to vector<8x32xbf16>
      %c0_113 = arith.constant 0 : index
      %c0_114 = arith.constant 0 : index
      %171 = vector.load %arg4[%c0_113, %c0_114] : memref<32x32xbf16, #tpu.memory_space<vmem>>, vector<32x32xbf16>
      %cst_115 = arith.constant dense<0.000000e+00> : vector<8x32xf32>
      %172 = tpu.matmul %170, %171, %cst_115 {dimension_numbers = #tpu.dot_dimension_numbers<[1], [0], [0], [1], [0, 0, 1, 1], [], []>} : vector<8x32xbf16>, vector<32x32xbf16>, vector<8x32xf32> -> vector<8x32xf32>
      %c0_116 = arith.constant 0 : index
      %c0_117 = arith.constant 0 : index
      %173 = vector.load %arg5[%c0_116, %c0_117] : memref<1x32xf32, #tpu.memory_space<vmem>>, vector<1x32xf32>
      %174 = vector.broadcast %173 : vector<1x32xf32> to vector<8x32xf32>
      %175 = arith.addf %172, %174 : vector<8x32xf32>
      %176 = arith.truncf %175 : vector<8x32xf32> to vector<8x32xbf16>
      %c0_118 = arith.constant 0 : index
      %c0_119 = arith.constant 0 : index
      %177 = vector.load %arg16[%c0_118, %c0_119] : memref<8x32xbf16, #tpu.memory_space<vmem>>, vector<8x32xbf16>
      tpu.vector_store %arg16[%c0_118, %c0_119], %176 {strides = array<i32>} : memref<8x32xbf16, #tpu.memory_space<vmem>>, vector<8x32xbf16>,
    } else {
    }
    %c0 = arith.constant 0 : index
    %c0_1 = arith.constant 0 : index
    %3 = vector.load %arg16[%c0, %c0_1] : memref<8x32xbf16, #tpu.memory_space<vmem>>, vector<8x32xbf16>
    %c0_2 = arith.constant 0 : index
    %c0_3 = arith.constant 0 : index
    %c0_4 = arith.constant 0 : index
    %4 = vector.load %arg6[%c0_2, %c0_3, %c0_4] : memref<1x8x32xbf16, #tpu.memory_space<vmem>>, vector<1x8x32xbf16>
    %5 = vector.shape_cast %4 : vector<1x8x32xbf16> to vector<8x32xbf16>
    %c0_5 = arith.constant 0 : index
    %c0_6 = arith.constant 0 : index
    %c0_7 = arith.constant 0 : index
    %6 = vector.load %arg7[%c0_5, %c0_6, %c0_7] : memref<1x8x32xbf16, #tpu.memory_space<vmem>>, vector<1x8x32xbf16>
    %7 = vector.shape_cast %6 : vector<1x8x32xbf16> to vector<8x32xbf16>
    %8 = vector.extract_strided_slice %3 {offsets = [0, 0], sizes = [8, 8], strides = [1, 1]} : vector<8x32xbf16> to vector<8x8xbf16>
    %9 = vector.extract_strided_slice %5 {offsets = [0, 0], sizes = [8, 8], strides = [1, 1]} : vector<8x32xbf16> to vector<8x8xbf16>
    %10 = vector.extract_strided_slice %7 {offsets = [0, 0], sizes = [8, 8], strides = [1, 1]} : vector<8x32xbf16> to vector<8x8xbf16>
    %cst = arith.constant dense<0.000000e+00> : vector<8x8xf32>
    %11 = tpu.matmul %8, %9, %cst {dimension_numbers = #tpu.dot_dimension_numbers<[1], [1], [0], [0], [0, 0, 1, 0], [], []>} : vector<8x8xbf16>, vector<8x8xbf16>, vector<8x8xf32> -> vector<8x8xf32>
    %cst_8 = arith.constant 0.353553385 : f32
    %12 = vector.broadcast %cst_8 : f32 to vector<8x8xf32>
    %13 = arith.mulf %11, %12 : vector<8x8xf32>
    %c0_9 = arith.constant 0 : index
    %c0_10 = arith.constant 0 : index
    %c0_11 = arith.constant 0 : index
    %14 = vector.load %arg13[%c0_9, %c0_10, %c0_11] : memref<4x8x1xf32, #tpu.memory_space<vmem>>, vector<1x8x1xf32>
    %15 = vector.shape_cast %14 : vector<1x8x1xf32> to vector<8x1xf32>
    %cst_12 = arith.constant dense<0xFF800000> : vector<8xf32>
    %16 = vector.multi_reduction <maximumf>, %13, %cst_12 [1] : vector<8x8xf32> to vector<8xf32>
    %17 = vector.shape_cast %16 : vector<8xf32> to vector<8x1xf32>
    %18 = arith.maximumf %15, %17 : vector<8x1xf32>
    %19 = arith.subf %15, %18 : vector<8x1xf32>
    %20 = math.exp %19 : vector<8x1xf32>
    %21 = vector.broadcast %18 : vector<8x1xf32> to vector<8x8xf32>
    %22 = arith.subf %13, %21 : vector<8x8xf32>
    %23 = math.exp %22 : vector<8x8xf32>
    %c0_13 = arith.constant 0 : index
    %c0_14 = arith.constant 0 : index
    %c0_15 = arith.constant 0 : index
    %24 = vector.load %arg14[%c0_13, %c0_14, %c0_15] : memref<4x8x1xf32, #tpu.memory_space<vmem>>, vector<1x8x1xf32>
    %25 = vector.shape_cast %24 : vector<1x8x1xf32> to vector<8x1xf32>
    %26 = arith.mulf %20, %25 : vector<8x1xf32>
    %cst_16 = arith.constant dense<0.000000e+00> : vector<8xf32>
    %27 = vector.multi_reduction <add>, %23, %cst_16 [1] : vector<8x8xf32> to vector<8xf32>
    %28 = vector.shape_cast %27 : vector<8xf32> to vector<8x1xf32>
    %29 = arith.addf %26, %28 : vector<8x1xf32>
    %c0_17 = arith.constant 0 : index
    %c0_18 = arith.constant 0 : index
    %c0_19 = arith.constant 0 : index
    %30 = vector.load %arg14[%c0_17, %c0_18, %c0_19] : memref<4x8x1xf32, #tpu.memory_space<vmem>>, vector<1x8x1xf32>
    %31 = vector.shape_cast %30 : vector<1x8x1xf32> to vector<8x1xf32>
    %32 = vector.shape_cast %29 : vector<8x1xf32> to vector<1x8x1xf32>
    tpu.vector_store %arg14[%c0_17, %c0_18, %c0_19], %32 {strides = array<i32>} : memref<4x8x1xf32, #tpu.memory_space<vmem>>, vector<1x8x1xf32>,
    %c0_20 = arith.constant 0 : index
    %c0_21 = arith.constant 0 : index
    %c0_22 = arith.constant 0 : index
    %33 = vector.load %arg15[%c0_20, %c0_21, %c0_22] : memref<4x8x8xf32, #tpu.memory_space<vmem>>, vector<1x8x8xf32>
    %34 = vector.shape_cast %33 : vector<1x8x8xf32> to vector<8x8xf32>
    %35 = vector.broadcast %20 : vector<8x1xf32> to vector<8x8xf32>
    %36 = arith.mulf %35, %34 : vector<8x8xf32>
    %37 = arith.truncf %23 : vector<8x8xf32> to vector<8x8xbf16>
    %cst_23 = arith.constant dense<0.000000e+00> : vector<8x8xf32>
    %38 = tpu.matmul %37, %10, %cst_23 {dimension_numbers = #tpu.dot_dimension_numbers<[1], [0], [0], [1], [0, 0, 1, 1], [], []>} : vector<8x8xbf16>, vector<8x8xbf16>, vector<8x8xf32> -> vector<8x8xf32>
    %39 = arith.addf %36, %38 : vector<8x8xf32>
    %c0_24 = arith.constant 0 : index
    %c0_25 = arith.constant 0 : index
    %c0_26 = arith.constant 0 : index
    %40 = vector.load %arg15[%c0_24, %c0_25, %c0_26] : memref<4x8x8xf32, #tpu.memory_space<vmem>>, vector<1x8x8xf32>
    %41 = vector.shape_cast %40 : vector<1x8x8xf32> to vector<8x8xf32>
    %42 = vector.shape_cast %39 : vector<8x8xf32> to vector<1x8x8xf32>
    tpu.vector_store %arg15[%c0_24, %c0_25, %c0_26], %42 {strides = array<i32>} : memref<4x8x8xf32, #tpu.memory_space<vmem>>, vector<1x8x8xf32>,
    %c0_27 = arith.constant 0 : index
    %c0_28 = arith.constant 0 : index
    %c0_29 = arith.constant 0 : index
    %43 = vector.load %arg13[%c0_27, %c0_28, %c0_29] : memref<4x8x1xf32, #tpu.memory_space<vmem>>, vector<1x8x1xf32>
    %44 = vector.shape_cast %43 : vector<1x8x1xf32> to vector<8x1xf32>
    %45 = vector.shape_cast %18 : vector<8x1xf32> to vector<1x8x1xf32>
    tpu.vector_store %arg13[%c0_27, %c0_28, %c0_29], %45 {strides = array<i32>} : memref<4x8x1xf32, #tpu.memory_space<vmem>>, vector<1x8x1xf32>,
    %46 = vector.extract_strided_slice %3 {offsets = [0, 8], sizes = [8, 8], strides = [1, 1]} : vector<8x32xbf16> to vector<8x8xbf16>
    %47 = vector.extract_strided_slice %5 {offsets = [0, 8], sizes = [8, 8], strides = [1, 1]} : vector<8x32xbf16> to vector<8x8xbf16>
    %48 = vector.extract_strided_slice %7 {offsets = [0, 8], sizes = [8, 8], strides = [1, 1]} : vector<8x32xbf16> to vector<8x8xbf16>
    %cst_30 = arith.constant dense<0.000000e+00> : vector<8x8xf32>
    %49 = tpu.matmul %46, %47, %cst_30 {dimension_numbers = #tpu.dot_dimension_numbers<[1], [1], [0], [0], [0, 0, 1, 0], [], []>} : vector<8x8xbf16>, vector<8x8xbf16>, vector<8x8xf32> -> vector<8x8xf32>
    %cst_31 = arith.constant 0.353553385 : f32
    %50 = vector.broadcast %cst_31 : f32 to vector<8x8xf32>
    %51 = arith.mulf %49, %50 : vector<8x8xf32>
    %c1 = arith.constant 1 : index
    %c0_32 = arith.constant 0 : index
    %c0_33 = arith.constant 0 : index
    %52 = vector.load %arg13[%c1, %c0_32, %c0_33] : memref<4x8x1xf32, #tpu.memory_space<vmem>>, vector<1x8x1xf32>
    %53 = vector.shape_cast %52 : vector<1x8x1xf32> to vector<8x1xf32>
    %cst_34 = arith.constant dense<0xFF800000> : vector<8xf32>
    %54 = vector.multi_reduction <maximumf>, %51, %cst_34 [1] : vector<8x8xf32> to vector<8xf32>
    %55 = vector.shape_cast %54 : vector<8xf32> to vector<8x1xf32>
    %56 = arith.maximumf %53, %55 : vector<8x1xf32>
    %57 = arith.subf %53, %56 : vector<8x1xf32>
    %58 = math.exp %57 : vector<8x1xf32>
    %59 = vector.broadcast %56 : vector<8x1xf32> to vector<8x8xf32>
    %60 = arith.subf %51, %59 : vector<8x8xf32>
    %61 = math.exp %60 : vector<8x8xf32>
    %c1_35 = arith.constant 1 : index
    %c0_36 = arith.constant 0 : index
    %c0_37 = arith.constant 0 : index
    %62 = vector.load %arg14[%c1_35, %c0_36, %c0_37] : memref<4x8x1xf32, #tpu.memory_space<vmem>>, vector<1x8x1xf32>
    %63 = vector.shape_cast %62 : vector<1x8x1xf32> to vector<8x1xf32>
    %64 = arith.mulf %58, %63 : vector<8x1xf32>
    %cst_38 = arith.constant dense<0.000000e+00> : vector<8xf32>
    %65 = vector.multi_reduction <add>, %61, %cst_38 [1] : vector<8x8xf32> to vector<8xf32>
    %66 = vector.shape_cast %65 : vector<8xf32> to vector<8x1xf32>
    %67 = arith.addf %64, %66 : vector<8x1xf32>
    %c1_39 = arith.constant 1 : index
    %c0_40 = arith.constant 0 : index
    %c0_41 = arith.constant 0 : index
    %68 = vector.load %arg14[%c1_39, %c0_40, %c0_41] : memref<4x8x1xf32, #tpu.memory_space<vmem>>, vector<1x8x1xf32>
    %69 = vector.shape_cast %68 : vector<1x8x1xf32> to vector<8x1xf32>
    %70 = vector.shape_cast %67 : vector<8x1xf32> to vector<1x8x1xf32>
    tpu.vector_store %arg14[%c1_39, %c0_40, %c0_41], %70 {strides = array<i32>} : memref<4x8x1xf32, #tpu.memory_space<vmem>>, vector<1x8x1xf32>,
    %c1_42 = arith.constant 1 : index
    %c0_43 = arith.constant 0 : index
    %c0_44 = arith.constant 0 : index
    %71 = vector.load %arg15[%c1_42, %c0_43, %c0_44] : memref<4x8x8xf32, #tpu.memory_space<vmem>>, vector<1x8x8xf32>
    %72 = vector.shape_cast %71 : vector<1x8x8xf32> to vector<8x8xf32>
    %73 = vector.broadcast %58 : vector<8x1xf32> to vector<8x8xf32>
    %74 = arith.mulf %73, %72 : vector<8x8xf32>
    %75 = arith.truncf %61 : vector<8x8xf32> to vector<8x8xbf16>
    %cst_45 = arith.constant dense<0.000000e+00> : vector<8x8xf32>
    %76 = tpu.matmul %75, %48, %cst_45 {dimension_numbers = #tpu.dot_dimension_numbers<[1], [0], [0], [1], [0, 0, 1, 1], [], []>} : vector<8x8xbf16>, vector<8x8xbf16>, vector<8x8xf32> -> vector<8x8xf32>
    %77 = arith.addf %74, %76 : vector<8x8xf32>
    %c1_46 = arith.constant 1 : index
    %c0_47 = arith.constant 0 : index
    %c0_48 = arith.constant 0 : index
    %78 = vector.load %arg15[%c1_46, %c0_47, %c0_48] : memref<4x8x8xf32, #tpu.memory_space<vmem>>, vector<1x8x8xf32>
    %79 = vector.shape_cast %78 : vector<1x8x8xf32> to vector<8x8xf32>
    %80 = vector.shape_cast %77 : vector<8x8xf32> to vector<1x8x8xf32>
    tpu.vector_store %arg15[%c1_46, %c0_47, %c0_48], %80 {strides = array<i32>} : memref<4x8x8xf32, #tpu.memory_space<vmem>>, vector<1x8x8xf32>,
    %c1_49 = arith.constant 1 : index
    %c0_50 = arith.constant 0 : index
    %c0_51 = arith.constant 0 : index
    %81 = vector.load %arg13[%c1_49, %c0_50, %c0_51] : memref<4x8x1xf32, #tpu.memory_space<vmem>>, vector<1x8x1xf32>
    %82 = vector.shape_cast %81 : vector<1x8x1xf32> to vector<8x1xf32>
    %83 = vector.shape_cast %56 : vector<8x1xf32> to vector<1x8x1xf32>
    tpu.vector_store %arg13[%c1_49, %c0_50, %c0_51], %83 {strides = array<i32>} : memref<4x8x1xf32, #tpu.memory_space<vmem>>, vector<1x8x1xf32>,
    %84 = vector.extract_strided_slice %3 {offsets = [0, 16], sizes = [8, 8], strides = [1, 1]} : vector<8x32xbf16> to vector<8x8xbf16>
    %85 = vector.extract_strided_slice %5 {offsets = [0, 16], sizes = [8, 8], strides = [1, 1]} : vector<8x32xbf16> to vector<8x8xbf16>
    %86 = vector.extract_strided_slice %7 {offsets = [0, 16], sizes = [8, 8], strides = [1, 1]} : vector<8x32xbf16> to vector<8x8xbf16>
    %cst_52 = arith.constant dense<0.000000e+00> : vector<8x8xf32>
    %87 = tpu.matmul %84, %85, %cst_52 {dimension_numbers = #tpu.dot_dimension_numbers<[1], [1], [0], [0], [0, 0, 1, 0], [], []>} : vector<8x8xbf16>, vector<8x8xbf16>, vector<8x8xf32> -> vector<8x8xf32>
    %cst_53 = arith.constant 0.353553385 : f32
    %88 = vector.broadcast %cst_53 : f32 to vector<8x8xf32>
    %89 = arith.mulf %87, %88 : vector<8x8xf32>
    %c2 = arith.constant 2 : index
    %c0_54 = arith.constant 0 : index
    %c0_55 = arith.constant 0 : index
    %90 = vector.load %arg13[%c2, %c0_54, %c0_55] : memref<4x8x1xf32, #tpu.memory_space<vmem>>, vector<1x8x1xf32>
    %91 = vector.shape_cast %90 : vector<1x8x1xf32> to vector<8x1xf32>
    %cst_56 = arith.constant dense<0xFF800000> : vector<8xf32>
    %92 = vector.multi_reduction <maximumf>, %89, %cst_56 [1] : vector<8x8xf32> to vector<8xf32>
    %93 = vector.shape_cast %92 : vector<8xf32> to vector<8x1xf32>
    %94 = arith.maximumf %91, %93 : vector<8x1xf32>
    %95 = arith.subf %91, %94 : vector<8x1xf32>
    %96 = math.exp %95 : vector<8x1xf32>
    %97 = vector.broadcast %94 : vector<8x1xf32> to vector<8x8xf32>
    %98 = arith.subf %89, %97 : vector<8x8xf32>
    %99 = math.exp %98 : vector<8x8xf32>
    %c2_57 = arith.constant 2 : index
    %c0_58 = arith.constant 0 : index
    %c0_59 = arith.constant 0 : index
    %100 = vector.load %arg14[%c2_57, %c0_58, %c0_59] : memref<4x8x1xf32, #tpu.memory_space<vmem>>, vector<1x8x1xf32>
    %101 = vector.shape_cast %100 : vector<1x8x1xf32> to vector<8x1xf32>
    %102 = arith.mulf %96, %101 : vector<8x1xf32>
    %cst_60 = arith.constant dense<0.000000e+00> : vector<8xf32>
    %103 = vector.multi_reduction <add>, %99, %cst_60 [1] : vector<8x8xf32> to vector<8xf32>
    %104 = vector.shape_cast %103 : vector<8xf32> to vector<8x1xf32>
    %105 = arith.addf %102, %104 : vector<8x1xf32>
    %c2_61 = arith.constant 2 : index
    %c0_62 = arith.constant 0 : index
    %c0_63 = arith.constant 0 : index
    %106 = vector.load %arg14[%c2_61, %c0_62, %c0_63] : memref<4x8x1xf32, #tpu.memory_space<vmem>>, vector<1x8x1xf32>
    %107 = vector.shape_cast %106 : vector<1x8x1xf32> to vector<8x1xf32>
    %108 = vector.shape_cast %105 : vector<8x1xf32> to vector<1x8x1xf32>
    tpu.vector_store %arg14[%c2_61, %c0_62, %c0_63], %108 {strides = array<i32>} : memref<4x8x1xf32, #tpu.memory_space<vmem>>, vector<1x8x1xf32>,
    %c2_64 = arith.constant 2 : index
    %c0_65 = arith.constant 0 : index
    %c0_66 = arith.constant 0 : index
    %109 = vector.load %arg15[%c2_64, %c0_65, %c0_66] : memref<4x8x8xf32, #tpu.memory_space<vmem>>, vector<1x8x8xf32>
    %110 = vector.shape_cast %109 : vector<1x8x8xf32> to vector<8x8xf32>
    %111 = vector.broadcast %96 : vector<8x1xf32> to vector<8x8xf32>
    %112 = arith.mulf %111, %110 : vector<8x8xf32>
    %113 = arith.truncf %99 : vector<8x8xf32> to vector<8x8xbf16>
    %cst_67 = arith.constant dense<0.000000e+00> : vector<8x8xf32>
    %114 = tpu.matmul %113, %86, %cst_67 {dimension_numbers = #tpu.dot_dimension_numbers<[1], [0], [0], [1], [0, 0, 1, 1], [], []>} : vector<8x8xbf16>, vector<8x8xbf16>, vector<8x8xf32> -> vector<8x8xf32>
    %115 = arith.addf %112, %114 : vector<8x8xf32>
    %c2_68 = arith.constant 2 : index
    %c0_69 = arith.constant 0 : index
    %c0_70 = arith.constant 0 : index
    %116 = vector.load %arg15[%c2_68, %c0_69, %c0_70] : memref<4x8x8xf32, #tpu.memory_space<vmem>>, vector<1x8x8xf32>
    %117 = vector.shape_cast %116 : vector<1x8x8xf32> to vector<8x8xf32>
    %118 = vector.shape_cast %115 : vector<8x8xf32> to vector<1x8x8xf32>
    tpu.vector_store %arg15[%c2_68, %c0_69, %c0_70], %118 {strides = array<i32>} : memref<4x8x8xf32, #tpu.memory_space<vmem>>, vector<1x8x8xf32>,
    %c2_71 = arith.constant 2 : index
    %c0_72 = arith.constant 0 : index
    %c0_73 = arith.constant 0 : index
    %119 = vector.load %arg13[%c2_71, %c0_72, %c0_73] : memref<4x8x1xf32, #tpu.memory_space<vmem>>, vector<1x8x1xf32>
    %120 = vector.shape_cast %119 : vector<1x8x1xf32> to vector<8x1xf32>
    %121 = vector.shape_cast %94 : vector<8x1xf32> to vector<1x8x1xf32>
    tpu.vector_store %arg13[%c2_71, %c0_72, %c0_73], %121 {strides = array<i32>} : memref<4x8x1xf32, #tpu.memory_space<vmem>>, vector<1x8x1xf32>,
    %122 = vector.extract_strided_slice %3 {offsets = [0, 24], sizes = [8, 8], strides = [1, 1]} : vector<8x32xbf16> to vector<8x8xbf16>
    %123 = vector.extract_strided_slice %5 {offsets = [0, 24], sizes = [8, 8], strides = [1, 1]} : vector<8x32xbf16> to vector<8x8xbf16>
    %124 = vector.extract_strided_slice %7 {offsets = [0, 24], sizes = [8, 8], strides = [1, 1]} : vector<8x32xbf16> to vector<8x8xbf16>
    %cst_74 = arith.constant dense<0.000000e+00> : vector<8x8xf32>
    %125 = tpu.matmul %122, %123, %cst_74 {dimension_numbers = #tpu.dot_dimension_numbers<[1], [1], [0], [0], [0, 0, 1, 0], [], []>} : vector<8x8xbf16>, vector<8x8xbf16>, vector<8x8xf32> -> vector<8x8xf32>
    %cst_75 = arith.constant 0.353553385 : f32
    %126 = vector.broadcast %cst_75 : f32 to vector<8x8xf32>
    %127 = arith.mulf %125, %126 : vector<8x8xf32>
    %c3 = arith.constant 3 : index
    %c0_76 = arith.constant 0 : index
    %c0_77 = arith.constant 0 : index
    %128 = vector.load %arg13[%c3, %c0_76, %c0_77] : memref<4x8x1xf32, #tpu.memory_space<vmem>>, vector<1x8x1xf32>
    %129 = vector.shape_cast %128 : vector<1x8x1xf32> to vector<8x1xf32>
    %cst_78 = arith.constant dense<0xFF800000> : vector<8xf32>
    %130 = vector.multi_reduction <maximumf>, %127, %cst_78 [1] : vector<8x8xf32> to vector<8xf32>
    %131 = vector.shape_cast %130 : vector<8xf32> to vector<8x1xf32>
    %132 = arith.maximumf %129, %131 : vector<8x1xf32>
    %133 = arith.subf %129, %132 : vector<8x1xf32>
    %134 = math.exp %133 : vector<8x1xf32>
    %135 = vector.broadcast %132 : vector<8x1xf32> to vector<8x8xf32>
    %136 = arith.subf %127, %135 : vector<8x8xf32>
    %137 = math.exp %136 : vector<8x8xf32>
    %c3_79 = arith.constant 3 : index
    %c0_80 = arith.constant 0 : index
    %c0_81 = arith.constant 0 : index
    %138 = vector.load %arg14[%c3_79, %c0_80, %c0_81] : memref<4x8x1xf32, #tpu.memory_space<vmem>>, vector<1x8x1xf32>
    %139 = vector.shape_cast %138 : vector<1x8x1xf32> to vector<8x1xf32>
    %140 = arith.mulf %134, %139 : vector<8x1xf32>
    %cst_82 = arith.constant dense<0.000000e+00> : vector<8xf32>
    %141 = vector.multi_reduction <add>, %137, %cst_82 [1] : vector<8x8xf32> to vector<8xf32>
    %142 = vector.shape_cast %141 : vector<8xf32> to vector<8x1xf32>
    %143 = arith.addf %140, %142 : vector<8x1xf32>
    %c3_83 = arith.constant 3 : index
    %c0_84 = arith.constant 0 : index
    %c0_85 = arith.constant 0 : index
    %144 = vector.load %arg14[%c3_83, %c0_84, %c0_85] : memref<4x8x1xf32, #tpu.memory_space<vmem>>, vector<1x8x1xf32>
    %145 = vector.shape_cast %144 : vector<1x8x1xf32> to vector<8x1xf32>
    %146 = vector.shape_cast %143 : vector<8x1xf32> to vector<1x8x1xf32>
    tpu.vector_store %arg14[%c3_83, %c0_84, %c0_85], %146 {strides = array<i32>} : memref<4x8x1xf32, #tpu.memory_space<vmem>>, vector<1x8x1xf32>,
    %c3_86 = arith.constant 3 : index
    %c0_87 = arith.constant 0 : index
    %c0_88 = arith.constant 0 : index
    %147 = vector.load %arg15[%c3_86, %c0_87, %c0_88] : memref<4x8x8xf32, #tpu.memory_space<vmem>>, vector<1x8x8xf32>
    %148 = vector.shape_cast %147 : vector<1x8x8xf32> to vector<8x8xf32>
    %149 = vector.broadcast %134 : vector<8x1xf32> to vector<8x8xf32>
    %150 = arith.mulf %149, %148 : vector<8x8xf32>
    %151 = arith.truncf %137 : vector<8x8xf32> to vector<8x8xbf16>
    %cst_89 = arith.constant dense<0.000000e+00> : vector<8x8xf32>
    %152 = tpu.matmul %151, %124, %cst_89 {dimension_numbers = #tpu.dot_dimension_numbers<[1], [0], [0], [1], [0, 0, 1, 1], [], []>} : vector<8x8xbf16>, vector<8x8xbf16>, vector<8x8xf32> -> vector<8x8xf32>
    %153 = arith.addf %150, %152 : vector<8x8xf32>
    %c3_90 = arith.constant 3 : index
    %c0_91 = arith.constant 0 : index
    %c0_92 = arith.constant 0 : index
    %154 = vector.load %arg15[%c3_90, %c0_91, %c0_92] : memref<4x8x8xf32, #tpu.memory_space<vmem>>, vector<1x8x8xf32>
    %155 = vector.shape_cast %154 : vector<1x8x8xf32> to vector<8x8xf32>
    %156 = vector.shape_cast %153 : vector<8x8xf32> to vector<1x8x8xf32>
    tpu.vector_store %arg15[%c3_90, %c0_91, %c0_92], %156 {strides = array<i32>} : memref<4x8x8xf32, #tpu.memory_space<vmem>>, vector<1x8x8xf32>,
    %c3_93 = arith.constant 3 : index
    %c0_94 = arith.constant 0 : index
    %c0_95 = arith.constant 0 : index
    %157 = vector.load %arg13[%c3_93, %c0_94, %c0_95] : memref<4x8x1xf32, #tpu.memory_space<vmem>>, vector<1x8x1xf32>
    %158 = vector.shape_cast %157 : vector<1x8x1xf32> to vector<8x1xf32>
    %159 = vector.shape_cast %132 : vector<8x1xf32> to vector<1x8x1xf32>
    tpu.vector_store %arg13[%c3_93, %c0_94, %c0_95], %159 {strides = array<i32>} : memref<4x8x1xf32, #tpu.memory_space<vmem>>, vector<1x8x1xf32>,
    %c0_i32_96 = arith.constant 0 : i32
    %160 = arith.cmpi eq, %arg2, %c0_i32_96 : i32
    %161 = arith.extui %160 : i1 to i32
    %c0_i32_97 = arith.constant 0 : i32
    %162 = arith.cmpi ne, %161, %c0_i32_97 : i32
    scf.if %162 {
      %c0_98 = arith.constant 0 : index
      %c0_99 = arith.constant 0 : index
      %163 = vector.load %arg8[%c0_98, %c0_99] : memref<32x32xbf16, #tpu.memory_space<vmem>>, vector<32x32xbf16>
      %c0_100 = arith.constant 0 : index
      %c0_101 = arith.constant 0 : index
      %c0_102 = arith.constant 0 : index
      %164 = vector.load %arg3[%c0_100, %c0_101, %c0_102] : memref<1x8x32xbf16, #tpu.memory_space<vmem>>, vector<1x8x32xbf16>
      %165 = vector.shape_cast %164 : vector<1x8x32xbf16> to vector<8x32xbf16>
      %166 = arith.extf %165 : vector<8x32xbf16> to vector<8x32xf32>
      %c0_103 = arith.constant 0 : index
      %c0_104 = arith.constant 0 : index
      %167 = vector.load %arg9[%c0_103, %c0_104] : memref<1x32xf32, #tpu.memory_space<vmem>>, vector<1x32xf32>
      %168 = vector.broadcast %167 : vector<1x32xf32> to vector<8x32xf32>
      %169 = arith.addf %166, %168 : vector<8x32xf32>
      %c0_105 = arith.constant 0 : index
      %c0_106 = arith.constant 0 : index
      %c0_107 = arith.constant 0 : index
      %170 = vector.load %arg15[%c0_105, %c0_106, %c0_107] : memref<4x8x8xf32, #tpu.memory_space<vmem>>, vector<1x8x8xf32>
      %171 = vector.shape_cast %170 : vector<1x8x8xf32> to vector<8x8xf32>
      %c0_108 = arith.constant 0 : index
      %c0_109 = arith.constant 0 : index
      %c0_110 = arith.constant 0 : index
      %172 = vector.load %arg14[%c0_108, %c0_109, %c0_110] : memref<4x8x1xf32, #tpu.memory_space<vmem>>, vector<1x8x1xf32>
      %173 = vector.shape_cast %172 : vector<1x8x1xf32> to vector<8x1xf32>
      %174 = vector.broadcast %173 : vector<8x1xf32> to vector<8x8xf32>
      %175 = arith.divf %171, %174 : vector<8x8xf32>
      %176 = vector.extract_strided_slice %163 {offsets = [0, 0], sizes = [8, 32], strides = [1, 1]} : vector<32x32xbf16> to vector<8x32xbf16>
      %177 = arith.truncf %175 : vector<8x8xf32> to vector<8x8xbf16>
      %cst_111 = arith.constant dense<0.000000e+00> : vector<8x32xf32>
      %178 = tpu.matmul %177, %176, %cst_111 {dimension_numbers = #tpu.dot_dimension_numbers<[1], [0], [0], [1], [0, 0, 1, 1], [], []>} : vector<8x8xbf16>, vector<8x32xbf16>, vector<8x32xf32> -> vector<8x32xf32>
      %179 = arith.addf %169, %178 : vector<8x32xf32>
      %c1_112 = arith.constant 1 : index
      %c0_113 = arith.constant 0 : index
      %c0_114 = arith.constant 0 : index
      %180 = vector.load %arg15[%c1_112, %c0_113, %c0_114] : memref<4x8x8xf32, #tpu.memory_space<vmem>>, vector<1x8x8xf32>
      %181 = vector.shape_cast %180 : vector<1x8x8xf32> to vector<8x8xf32>
      %c1_115 = arith.constant 1 : index
      %c0_116 = arith.constant 0 : index
      %c0_117 = arith.constant 0 : index
      %182 = vector.load %arg14[%c1_115, %c0_116, %c0_117] : memref<4x8x1xf32, #tpu.memory_space<vmem>>, vector<1x8x1xf32>
      %183 = vector.shape_cast %182 : vector<1x8x1xf32> to vector<8x1xf32>
      %184 = vector.broadcast %183 : vector<8x1xf32> to vector<8x8xf32>
      %185 = arith.divf %181, %184 : vector<8x8xf32>
      %186 = vector.extract_strided_slice %163 {offsets = [8, 0], sizes = [8, 32], strides = [1, 1]} : vector<32x32xbf16> to vector<8x32xbf16>
      %187 = arith.truncf %185 : vector<8x8xf32> to vector<8x8xbf16>
      %cst_118 = arith.constant dense<0.000000e+00> : vector<8x32xf32>
      %188 = tpu.matmul %187, %186, %cst_118 {dimension_numbers = #tpu.dot_dimension_numbers<[1], [0], [0], [1], [0, 0, 1, 1], [], []>} : vector<8x8xbf16>, vector<8x32xbf16>, vector<8x32xf32> -> vector<8x32xf32>
      %189 = arith.addf %179, %188 : vector<8x32xf32>
      %c2_119 = arith.constant 2 : index
      %c0_120 = arith.constant 0 : index
      %c0_121 = arith.constant 0 : index
      %190 = vector.load %arg15[%c2_119, %c0_120, %c0_121] : memref<4x8x8xf32, #tpu.memory_space<vmem>>, vector<1x8x8xf32>
      %191 = vector.shape_cast %190 : vector<1x8x8xf32> to vector<8x8xf32>
      %c2_122 = arith.constant 2 : index
      %c0_123 = arith.constant 0 : index
      %c0_124 = arith.constant 0 : index
      %192 = vector.load %arg14[%c2_122, %c0_123, %c0_124] : memref<4x8x1xf32, #tpu.memory_space<vmem>>, vector<1x8x1xf32>
      %193 = vector.shape_cast %192 : vector<1x8x1xf32> to vector<8x1xf32>
      %194 = vector.broadcast %193 : vector<8x1xf32> to vector<8x8xf32>
      %195 = arith.divf %191, %194 : vector<8x8xf32>
      %196 = vector.extract_strided_slice %163 {offsets = [16, 0], sizes = [8, 32], strides = [1, 1]} : vector<32x32xbf16> to vector<8x32xbf16>
      %197 = arith.truncf %195 : vector<8x8xf32> to vector<8x8xbf16>
      %cst_125 = arith.constant dense<0.000000e+00> : vector<8x32xf32>
      %198 = tpu.matmul %197, %196, %cst_125 {dimension_numbers = #tpu.dot_dimension_numbers<[1], [0], [0], [1], [0, 0, 1, 1], [], []>} : vector<8x8xbf16>, vector<8x32xbf16>, vector<8x32xf32> -> vector<8x32xf32>
      %199 = arith.addf %189, %198 : vector<8x32xf32>
      %c3_126 = arith.constant 3 : index
      %c0_127 = arith.constant 0 : index
      %c0_128 = arith.constant 0 : index
      %200 = vector.load %arg15[%c3_126, %c0_127, %c0_128] : memref<4x8x8xf32, #tpu.memory_space<vmem>>, vector<1x8x8xf32>
      %201 = vector.shape_cast %200 : vector<1x8x8xf32> to vector<8x8xf32>
      %c3_129 = arith.constant 3 : index
      %c0_130 = arith.constant 0 : index
      %c0_131 = arith.constant 0 : index
      %202 = vector.load %arg14[%c3_129, %c0_130, %c0_131] : memref<4x8x1xf32, #tpu.memory_space<vmem>>, vector<1x8x1xf32>
      %203 = vector.shape_cast %202 : vector<1x8x1xf32> to vector<8x1xf32>
      %204 = vector.broadcast %203 : vector<8x1xf32> to vector<8x8xf32>
      %205 = arith.divf %201, %204 : vector<8x8xf32>
      %206 = vector.extract_strided_slice %163 {offsets = [24, 0], sizes = [8, 32], strides = [1, 1]} : vector<32x32xbf16> to vector<8x32xbf16>
      %207 = arith.truncf %205 : vector<8x8xf32> to vector<8x8xbf16>
      %cst_132 = arith.constant dense<0.000000e+00> : vector<8x32xf32>
      %208 = tpu.matmul %207, %206, %cst_132 {dimension_numbers = #tpu.dot_dimension_numbers<[1], [0], [0], [1], [0, 0, 1, 1], [], []>} : vector<8x8xbf16>, vector<8x32xbf16>, vector<8x32xf32> -> vector<8x32xf32>
      %209 = arith.addf %199, %208 : vector<8x32xf32>
      %cst_133 = arith.constant dense<0.000000e+00> : vector<8xf32>
      %210 = vector.multi_reduction <add>, %209, %cst_133 [1] : vector<8x32xf32> to vector<8xf32>
      %211 = vector.shape_cast %210 : vector<8xf32> to vector<8x1xf32>
      %cst_134 = arith.constant 3.200000e+01 : f32
      %212 = vector.broadcast %cst_134 : f32 to vector<8x1xf32>
      %213 = arith.divf %211, %212 : vector<8x1xf32>
      %214 = vector.broadcast %213 : vector<8x1xf32> to vector<8x32xf32>
      %215 = arith.subf %209, %214 : vector<8x32xf32>
      %216 = arith.mulf %215, %215 : vector<8x32xf32>
      %cst_135 = arith.constant dense<0.000000e+00> : vector<8xf32>
      %217 = vector.multi_reduction <add>, %216, %cst_135 [1] : vector<8x32xf32> to vector<8xf32>
      %218 = vector.shape_cast %217 : vector<8xf32> to vector<8x1xf32>
      %cst_136 = arith.constant 3.200000e+01 : f32
      %219 = vector.broadcast %cst_136 : f32 to vector<8x1xf32>
      %220 = arith.divf %218, %219 : vector<8x1xf32>
      %221 = vector.broadcast %213 : vector<8x1xf32> to vector<8x32xf32>
      %222 = arith.subf %209, %221 : vector<8x32xf32>
      %cst_137 = arith.constant 9.99999997E-7 : f32
      %223 = vector.broadcast %cst_137 : f32 to vector<8x1xf32>
      %224 = arith.addf %220, %223 : vector<8x1xf32>
      %225 = math.rsqrt %224 : vector<8x1xf32>
      %226 = vector.broadcast %225 : vector<8x1xf32> to vector<8x32xf32>
      %227 = arith.mulf %222, %226 : vector<8x32xf32>
      %c0_138 = arith.constant 0 : index
      %228 = memref.load %arg10[%c0_138] : memref<1xf32, #tpu.memory_space<smem>>
      %229 = vector.broadcast %228 : f32 to vector<8x32xf32>
      %230 = arith.mulf %229, %227 : vector<8x32xf32>
      %c0_139 = arith.constant 0 : index
      %231 = memref.load %arg11[%c0_139] : memref<1xf32, #tpu.memory_space<smem>>
      %232 = vector.broadcast %231 : f32 to vector<8x32xf32>
      %233 = arith.addf %230, %232 : vector<8x32xf32>
      %234 = arith.truncf %233 : vector<8x32xf32> to vector<8x32xbf16>
      %c0_140 = arith.constant 0 : index
      %c0_141 = arith.constant 0 : index
      %c0_142 = arith.constant 0 : index
      %235 = vector.load %arg12[%c0_140, %c0_141, %c0_142] : memref<1x8x32xbf16, #tpu.memory_space<vmem>>, vector<1x8x32xbf16>
      %236 = vector.shape_cast %235 : vector<1x8x32xbf16> to vector<8x32xbf16>
      %237 = vector.shape_cast %234 : vector<8x32xbf16> to vector<1x8x32xbf16>
      tpu.vector_store %arg12[%c0_140, %c0_141, %c0_142], %237 {strides = array<i32>} : memref<1x8x32xbf16, #tpu.memory_space<vmem>>, vector<1x8x32xbf16>,
    } else {
    }
    return
  }
  func.func @transform_0(%arg0: i32, %arg1: i32, %arg2: i32) -> (i32, i32, i32) {
    %c0_i32 = arith.constant 0 : i32
    %c0_i32_0 = arith.constant 0 : i32
    return %arg0, %arg1, %c0_i32 : i32, i32, i32
  }
  func.func @transform_1(%arg0: i32, %arg1: i32, %arg2: i32) -> (i32, i32) {
    %c0_i32 = arith.constant 0 : i32
    %c0_i32_0 = arith.constant 0 : i32
    %c0_i32_1 = arith.constant 0 : i32
    return %c0_i32, %c0_i32_0 : i32, i32
  }
  func.func @transform_2(%arg0: i32, %arg1: i32, %arg2: i32) -> (i32, i32) {
    %c0_i32 = arith.constant 0 : i32
    %c0_i32_0 = arith.constant 0 : i32
    %c0_i32_1 = arith.constant 0 : i32
    return %c0_i32, %c0_i32_0 : i32, i32
  }
  func.func @transform_3(%arg0: i32, %arg1: i32, %arg2: i32) -> (i32, i32, i32) {
    %c0_i32 = arith.constant 0 : i32
    %c0_i32_0 = arith.constant 0 : i32
    return %arg0, %arg2, %c0_i32 : i32, i32, i32
  }
  func.func @transform_4(%arg0: i32, %arg1: i32, %arg2: i32) -> (i32, i32, i32) {
    %c0_i32 = arith.constant 0 : i32
    %c0_i32_0 = arith.constant 0 : i32
    return %arg0, %arg2, %c0_i32 : i32, i32, i32
  }
  func.func @transform_5(%arg0: i32, %arg1: i32, %arg2: i32) -> (i32, i32) {
    %c0_i32 = arith.constant 0 : i32
    %c0_i32_0 = arith.constant 0 : i32
    %c0_i32_1 = arith.constant 0 : i32
    return %c0_i32, %c0_i32_0 : i32, i32
  }
  func.func @transform_6(%arg0: i32, %arg1: i32, %arg2: i32) -> (i32, i32) {
    %c0_i32 = arith.constant 0 : i32
    %c0_i32_0 = arith.constant 0 : i32
    %c0_i32_1 = arith.constant 0 : i32
    return %c0_i32, %c0_i32_0 : i32, i32
  }
  func.func @transform_7(%arg0: i32, %arg1: i32, %arg2: i32) -> i32 {
    %c0_i32 = arith.constant 0 : i32
    %c0_i32_0 = arith.constant 0 : i32
    return %c0_i32 : i32
  }
  func.func @transform_8(%arg0: i32, %arg1: i32, %arg2: i32) -> i32 {
    %c0_i32 = arith.constant 0 : i32
    %c0_i32_0 = arith.constant 0 : i32
    return %c0_i32 : i32
  }
  func.func @transform_9(%arg0: i32, %arg1: i32, %arg2: i32) -> (i32, i32, i32) {
    %c0_i32 = arith.constant 0 : i32
    %c0_i32_0 = arith.constant 0 : i32
    return %arg0, %arg1, %c0_i32 : i32, i32, i32
  }
}

module attributes {stable_mosaic.version = 11 : i64} {
  func.func @_fused_mha_ln_kernel(%arg0: i32, %arg1: i32, %arg2: i32, %arg3: memref<1x8x32xbf16, #tpu.memory_space<vmem>>, %arg4: memref<1x8x32xbf16, #tpu.memory_space<vmem>>, %arg5: memref<1x8x32xbf16, #tpu.memory_space<vmem>>, %arg6: memref<1x8x32xbf16, #tpu.memory_space<vmem>>, %arg7: memref<1x8x8xbf16, #tpu.memory_space<vmem>>, %arg8: memref<32x32xbf16, #tpu.memory_space<vmem>>, %arg9: memref<1x32xf32, #tpu.memory_space<vmem>>, %arg10: memref<1xf32, #tpu.memory_space<smem>>, %arg11: memref<1xf32, #tpu.memory_space<smem>>, %arg12: memref<1x8x32xbf16, #tpu.memory_space<vmem>>, %arg13: memref<4x8x1xf32, #tpu.memory_space<vmem>>, %arg14: memref<4x8x1xf32, #tpu.memory_space<vmem>>, %arg15: memref<4x8x8xf32, #tpu.memory_space<vmem>>) attributes {dimension_semantics = [#tpu.dimension_semantics<parallel>, #tpu.dimension_semantics<parallel>, #tpu.dimension_semantics<arbitrary>], iteration_bounds = array<i64: 2, 1, 1>, scalar_prefetch = 0 : i64, scratch_operands = 3 : i64, tpu.core_type = #tpu.core_type<tc>, window_params = [{transform_indices = @transform_0, window_bounds = array<i64: 1, 8, 32>}, {transform_indices = @transform_1, window_bounds = array<i64: 1, 8, 32>}, {transform_indices = @transform_2, window_bounds = array<i64: 1, 8, 32>}, {transform_indices = @transform_3, window_bounds = array<i64: 1, 8, 32>}, {transform_indices = @transform_4, window_bounds = array<i64: 1, 8, 8>}, {pipeline_mode = #tpu.pipeline_mode<synchronous>, transform_indices = @transform_5, window_bounds = array<i64: 32, 32>}, {pipeline_mode = #tpu.pipeline_mode<synchronous>, transform_indices = @transform_6, window_bounds = array<i64: 1, 32>}, {transform_indices = @transform_7, window_bounds = array<i64: 1>}, {transform_indices = @transform_8, window_bounds = array<i64: 1>}, {transform_indices = @transform_9, window_bounds = array<i64: 1, 8, 32>}]} {
    %c0_i32 = arith.constant 0 : i32
    %0 = arith.cmpi eq, %arg2, %c0_i32 : i32
    %1 = arith.extui %0 : i1 to i32
    %c0_i32_0 = arith.constant 0 : i32
    %2 = arith.cmpi ne, %1, %c0_i32_0 : i32
    scf.if %2 {
      %cst_102 = arith.constant 0xFF800000 : f32
      %171 = vector.broadcast %cst_102 : f32 to vector<4x8x1xf32>
      %c0_103 = arith.constant 0 : index
      %c0_104 = arith.constant 0 : index
      %c0_105 = arith.constant 0 : index
      %172 = vector.load %arg13[%c0_103, %c0_104, %c0_105] : memref<4x8x1xf32, #tpu.memory_space<vmem>>, vector<4x8x1xf32>
      tpu.vector_store %arg13[%c0_103, %c0_104, %c0_105], %171 {strides = array<i32>} : memref<4x8x1xf32, #tpu.memory_space<vmem>>, vector<4x8x1xf32>,
      %cst_106 = arith.constant 0.000000e+00 : f32
      %173 = vector.broadcast %cst_106 : f32 to vector<4x8x1xf32>
      %c0_107 = arith.constant 0 : index
      %c0_108 = arith.constant 0 : index
      %c0_109 = arith.constant 0 : index
      %174 = vector.load %arg14[%c0_107, %c0_108, %c0_109] : memref<4x8x1xf32, #tpu.memory_space<vmem>>, vector<4x8x1xf32>
      tpu.vector_store %arg14[%c0_107, %c0_108, %c0_109], %173 {strides = array<i32>} : memref<4x8x1xf32, #tpu.memory_space<vmem>>, vector<4x8x1xf32>,
      %cst_110 = arith.constant 0.000000e+00 : f32
      %175 = vector.broadcast %cst_110 : f32 to vector<4x8x8xf32>
      %c0_111 = arith.constant 0 : index
      %c0_112 = arith.constant 0 : index
      %c0_113 = arith.constant 0 : index
      %176 = vector.load %arg15[%c0_111, %c0_112, %c0_113] : memref<4x8x8xf32, #tpu.memory_space<vmem>>, vector<4x8x8xf32>
      tpu.vector_store %arg15[%c0_111, %c0_112, %c0_113], %175 {strides = array<i32>} : memref<4x8x8xf32, #tpu.memory_space<vmem>>, vector<4x8x8xf32>,
    } else {
    }
    %c0 = arith.constant 0 : index
    %c0_1 = arith.constant 0 : index
    %c0_2 = arith.constant 0 : index
    %3 = vector.load %arg3[%c0, %c0_1, %c0_2] : memref<1x8x32xbf16, #tpu.memory_space<vmem>>, vector<1x8x32xbf16>
    %4 = vector.shape_cast %3 : vector<1x8x32xbf16> to vector<8x32xbf16>
    %c0_3 = arith.constant 0 : index
    %c0_4 = arith.constant 0 : index
    %c0_5 = arith.constant 0 : index
    %5 = vector.load %arg5[%c0_3, %c0_4, %c0_5] : memref<1x8x32xbf16, #tpu.memory_space<vmem>>, vector<1x8x32xbf16>
    %6 = vector.shape_cast %5 : vector<1x8x32xbf16> to vector<8x32xbf16>
    %c0_6 = arith.constant 0 : index
    %c0_7 = arith.constant 0 : index
    %c0_8 = arith.constant 0 : index
    %7 = vector.load %arg6[%c0_6, %c0_7, %c0_8] : memref<1x8x32xbf16, #tpu.memory_space<vmem>>, vector<1x8x32xbf16>
    %8 = vector.shape_cast %7 : vector<1x8x32xbf16> to vector<8x32xbf16>
    %c0_9 = arith.constant 0 : index
    %c0_10 = arith.constant 0 : index
    %c0_11 = arith.constant 0 : index
    %9 = vector.load %arg7[%c0_9, %c0_10, %c0_11] : memref<1x8x8xbf16, #tpu.memory_space<vmem>>, vector<1x8x8xbf16>
    %10 = vector.shape_cast %9 : vector<1x8x8xbf16> to vector<8x8xbf16>
    %11 = arith.extf %10 : vector<8x8xbf16> to vector<8x8xf32>
    %12 = vector.extract_strided_slice %4 {offsets = [0, 0], sizes = [8, 8], strides = [1, 1]} : vector<8x32xbf16> to vector<8x8xbf16>
    %13 = vector.extract_strided_slice %6 {offsets = [0, 0], sizes = [8, 8], strides = [1, 1]} : vector<8x32xbf16> to vector<8x8xbf16>
    %14 = vector.extract_strided_slice %8 {offsets = [0, 0], sizes = [8, 8], strides = [1, 1]} : vector<8x32xbf16> to vector<8x8xbf16>
    %cst = arith.constant dense<0.000000e+00> : vector<8x8xf32>
    %15 = tpu.matmul %12, %13, %cst {dimension_numbers = #tpu.dot_dimension_numbers<[1], [1], [0], [0], [0, 0, 1, 0], [], []>} : vector<8x8xbf16>, vector<8x8xbf16>, vector<8x8xf32> -> vector<8x8xf32>
    %cst_12 = arith.constant 0.353553385 : f32
    %16 = vector.broadcast %cst_12 : f32 to vector<8x8xf32>
    %17 = arith.mulf %15, %16 : vector<8x8xf32>
    %18 = arith.addf %17, %11 : vector<8x8xf32>
    %c0_13 = arith.constant 0 : index
    %c0_14 = arith.constant 0 : index
    %c0_15 = arith.constant 0 : index
    %19 = vector.load %arg13[%c0_13, %c0_14, %c0_15] : memref<4x8x1xf32, #tpu.memory_space<vmem>>, vector<1x8x1xf32>
    %20 = vector.shape_cast %19 : vector<1x8x1xf32> to vector<8x1xf32>
    %cst_16 = arith.constant dense<0xFF800000> : vector<8xf32>
    %21 = vector.multi_reduction <maximumf>, %18, %cst_16 [1] : vector<8x8xf32> to vector<8xf32>
    %22 = vector.shape_cast %21 : vector<8xf32> to vector<8x1xf32>
    %23 = arith.maximumf %20, %22 : vector<8x1xf32>
    %24 = arith.subf %20, %23 : vector<8x1xf32>
    %25 = math.exp %24 : vector<8x1xf32>
    %26 = vector.broadcast %23 : vector<8x1xf32> to vector<8x8xf32>
    %27 = arith.subf %18, %26 : vector<8x8xf32>
    %28 = math.exp %27 : vector<8x8xf32>
    %c0_17 = arith.constant 0 : index
    %c0_18 = arith.constant 0 : index
    %c0_19 = arith.constant 0 : index
    %29 = vector.load %arg14[%c0_17, %c0_18, %c0_19] : memref<4x8x1xf32, #tpu.memory_space<vmem>>, vector<1x8x1xf32>
    %30 = vector.shape_cast %29 : vector<1x8x1xf32> to vector<8x1xf32>
    %31 = arith.mulf %25, %30 : vector<8x1xf32>
    %cst_20 = arith.constant dense<0.000000e+00> : vector<8xf32>
    %32 = vector.multi_reduction <add>, %28, %cst_20 [1] : vector<8x8xf32> to vector<8xf32>
    %33 = vector.shape_cast %32 : vector<8xf32> to vector<8x1xf32>
    %34 = arith.addf %31, %33 : vector<8x1xf32>
    %c0_21 = arith.constant 0 : index
    %c0_22 = arith.constant 0 : index
    %c0_23 = arith.constant 0 : index
    %35 = vector.load %arg14[%c0_21, %c0_22, %c0_23] : memref<4x8x1xf32, #tpu.memory_space<vmem>>, vector<1x8x1xf32>
    %36 = vector.shape_cast %35 : vector<1x8x1xf32> to vector<8x1xf32>
    %37 = vector.shape_cast %34 : vector<8x1xf32> to vector<1x8x1xf32>
    tpu.vector_store %arg14[%c0_21, %c0_22, %c0_23], %37 {strides = array<i32>} : memref<4x8x1xf32, #tpu.memory_space<vmem>>, vector<1x8x1xf32>,
    %c0_24 = arith.constant 0 : index
    %c0_25 = arith.constant 0 : index
    %c0_26 = arith.constant 0 : index
    %38 = vector.load %arg15[%c0_24, %c0_25, %c0_26] : memref<4x8x8xf32, #tpu.memory_space<vmem>>, vector<1x8x8xf32>
    %39 = vector.shape_cast %38 : vector<1x8x8xf32> to vector<8x8xf32>
    %40 = vector.broadcast %25 : vector<8x1xf32> to vector<8x8xf32>
    %41 = arith.mulf %40, %39 : vector<8x8xf32>
    %42 = arith.truncf %28 : vector<8x8xf32> to vector<8x8xbf16>
    %cst_27 = arith.constant dense<0.000000e+00> : vector<8x8xf32>
    %43 = tpu.matmul %42, %14, %cst_27 {dimension_numbers = #tpu.dot_dimension_numbers<[1], [0], [0], [1], [0, 0, 1, 1], [], []>} : vector<8x8xbf16>, vector<8x8xbf16>, vector<8x8xf32> -> vector<8x8xf32>
    %44 = arith.addf %41, %43 : vector<8x8xf32>
    %c0_28 = arith.constant 0 : index
    %c0_29 = arith.constant 0 : index
    %c0_30 = arith.constant 0 : index
    %45 = vector.load %arg15[%c0_28, %c0_29, %c0_30] : memref<4x8x8xf32, #tpu.memory_space<vmem>>, vector<1x8x8xf32>
    %46 = vector.shape_cast %45 : vector<1x8x8xf32> to vector<8x8xf32>
    %47 = vector.shape_cast %44 : vector<8x8xf32> to vector<1x8x8xf32>
    tpu.vector_store %arg15[%c0_28, %c0_29, %c0_30], %47 {strides = array<i32>} : memref<4x8x8xf32, #tpu.memory_space<vmem>>, vector<1x8x8xf32>,
    %c0_31 = arith.constant 0 : index
    %c0_32 = arith.constant 0 : index
    %c0_33 = arith.constant 0 : index
    %48 = vector.load %arg13[%c0_31, %c0_32, %c0_33] : memref<4x8x1xf32, #tpu.memory_space<vmem>>, vector<1x8x1xf32>
    %49 = vector.shape_cast %48 : vector<1x8x1xf32> to vector<8x1xf32>
    %50 = vector.shape_cast %23 : vector<8x1xf32> to vector<1x8x1xf32>
    tpu.vector_store %arg13[%c0_31, %c0_32, %c0_33], %50 {strides = array<i32>} : memref<4x8x1xf32, #tpu.memory_space<vmem>>, vector<1x8x1xf32>,
    %51 = vector.extract_strided_slice %4 {offsets = [0, 8], sizes = [8, 8], strides = [1, 1]} : vector<8x32xbf16> to vector<8x8xbf16>
    %52 = vector.extract_strided_slice %6 {offsets = [0, 8], sizes = [8, 8], strides = [1, 1]} : vector<8x32xbf16> to vector<8x8xbf16>
    %53 = vector.extract_strided_slice %8 {offsets = [0, 8], sizes = [8, 8], strides = [1, 1]} : vector<8x32xbf16> to vector<8x8xbf16>
    %cst_34 = arith.constant dense<0.000000e+00> : vector<8x8xf32>
    %54 = tpu.matmul %51, %52, %cst_34 {dimension_numbers = #tpu.dot_dimension_numbers<[1], [1], [0], [0], [0, 0, 1, 0], [], []>} : vector<8x8xbf16>, vector<8x8xbf16>, vector<8x8xf32> -> vector<8x8xf32>
    %cst_35 = arith.constant 0.353553385 : f32
    %55 = vector.broadcast %cst_35 : f32 to vector<8x8xf32>
    %56 = arith.mulf %54, %55 : vector<8x8xf32>
    %57 = arith.addf %56, %11 : vector<8x8xf32>
    %c1 = arith.constant 1 : index
    %c0_36 = arith.constant 0 : index
    %c0_37 = arith.constant 0 : index
    %58 = vector.load %arg13[%c1, %c0_36, %c0_37] : memref<4x8x1xf32, #tpu.memory_space<vmem>>, vector<1x8x1xf32>
    %59 = vector.shape_cast %58 : vector<1x8x1xf32> to vector<8x1xf32>
    %cst_38 = arith.constant dense<0xFF800000> : vector<8xf32>
    %60 = vector.multi_reduction <maximumf>, %57, %cst_38 [1] : vector<8x8xf32> to vector<8xf32>
    %61 = vector.shape_cast %60 : vector<8xf32> to vector<8x1xf32>
    %62 = arith.maximumf %59, %61 : vector<8x1xf32>
    %63 = arith.subf %59, %62 : vector<8x1xf32>
    %64 = math.exp %63 : vector<8x1xf32>
    %65 = vector.broadcast %62 : vector<8x1xf32> to vector<8x8xf32>
    %66 = arith.subf %57, %65 : vector<8x8xf32>
    %67 = math.exp %66 : vector<8x8xf32>
    %c1_39 = arith.constant 1 : index
    %c0_40 = arith.constant 0 : index
    %c0_41 = arith.constant 0 : index
    %68 = vector.load %arg14[%c1_39, %c0_40, %c0_41] : memref<4x8x1xf32, #tpu.memory_space<vmem>>, vector<1x8x1xf32>
    %69 = vector.shape_cast %68 : vector<1x8x1xf32> to vector<8x1xf32>
    %70 = arith.mulf %64, %69 : vector<8x1xf32>
    %cst_42 = arith.constant dense<0.000000e+00> : vector<8xf32>
    %71 = vector.multi_reduction <add>, %67, %cst_42 [1] : vector<8x8xf32> to vector<8xf32>
    %72 = vector.shape_cast %71 : vector<8xf32> to vector<8x1xf32>
    %73 = arith.addf %70, %72 : vector<8x1xf32>
    %c1_43 = arith.constant 1 : index
    %c0_44 = arith.constant 0 : index
    %c0_45 = arith.constant 0 : index
    %74 = vector.load %arg14[%c1_43, %c0_44, %c0_45] : memref<4x8x1xf32, #tpu.memory_space<vmem>>, vector<1x8x1xf32>
    %75 = vector.shape_cast %74 : vector<1x8x1xf32> to vector<8x1xf32>
    %76 = vector.shape_cast %73 : vector<8x1xf32> to vector<1x8x1xf32>
    tpu.vector_store %arg14[%c1_43, %c0_44, %c0_45], %76 {strides = array<i32>} : memref<4x8x1xf32, #tpu.memory_space<vmem>>, vector<1x8x1xf32>,
    %c1_46 = arith.constant 1 : index
    %c0_47 = arith.constant 0 : index
    %c0_48 = arith.constant 0 : index
    %77 = vector.load %arg15[%c1_46, %c0_47, %c0_48] : memref<4x8x8xf32, #tpu.memory_space<vmem>>, vector<1x8x8xf32>
    %78 = vector.shape_cast %77 : vector<1x8x8xf32> to vector<8x8xf32>
    %79 = vector.broadcast %64 : vector<8x1xf32> to vector<8x8xf32>
    %80 = arith.mulf %79, %78 : vector<8x8xf32>
    %81 = arith.truncf %67 : vector<8x8xf32> to vector<8x8xbf16>
    %cst_49 = arith.constant dense<0.000000e+00> : vector<8x8xf32>
    %82 = tpu.matmul %81, %53, %cst_49 {dimension_numbers = #tpu.dot_dimension_numbers<[1], [0], [0], [1], [0, 0, 1, 1], [], []>} : vector<8x8xbf16>, vector<8x8xbf16>, vector<8x8xf32> -> vector<8x8xf32>
    %83 = arith.addf %80, %82 : vector<8x8xf32>
    %c1_50 = arith.constant 1 : index
    %c0_51 = arith.constant 0 : index
    %c0_52 = arith.constant 0 : index
    %84 = vector.load %arg15[%c1_50, %c0_51, %c0_52] : memref<4x8x8xf32, #tpu.memory_space<vmem>>, vector<1x8x8xf32>
    %85 = vector.shape_cast %84 : vector<1x8x8xf32> to vector<8x8xf32>
    %86 = vector.shape_cast %83 : vector<8x8xf32> to vector<1x8x8xf32>
    tpu.vector_store %arg15[%c1_50, %c0_51, %c0_52], %86 {strides = array<i32>} : memref<4x8x8xf32, #tpu.memory_space<vmem>>, vector<1x8x8xf32>,
    %c1_53 = arith.constant 1 : index
    %c0_54 = arith.constant 0 : index
    %c0_55 = arith.constant 0 : index
    %87 = vector.load %arg13[%c1_53, %c0_54, %c0_55] : memref<4x8x1xf32, #tpu.memory_space<vmem>>, vector<1x8x1xf32>
    %88 = vector.shape_cast %87 : vector<1x8x1xf32> to vector<8x1xf32>
    %89 = vector.shape_cast %62 : vector<8x1xf32> to vector<1x8x1xf32>
    tpu.vector_store %arg13[%c1_53, %c0_54, %c0_55], %89 {strides = array<i32>} : memref<4x8x1xf32, #tpu.memory_space<vmem>>, vector<1x8x1xf32>,
    %90 = vector.extract_strided_slice %4 {offsets = [0, 16], sizes = [8, 8], strides = [1, 1]} : vector<8x32xbf16> to vector<8x8xbf16>
    %91 = vector.extract_strided_slice %6 {offsets = [0, 16], sizes = [8, 8], strides = [1, 1]} : vector<8x32xbf16> to vector<8x8xbf16>
    %92 = vector.extract_strided_slice %8 {offsets = [0, 16], sizes = [8, 8], strides = [1, 1]} : vector<8x32xbf16> to vector<8x8xbf16>
    %cst_56 = arith.constant dense<0.000000e+00> : vector<8x8xf32>
    %93 = tpu.matmul %90, %91, %cst_56 {dimension_numbers = #tpu.dot_dimension_numbers<[1], [1], [0], [0], [0, 0, 1, 0], [], []>} : vector<8x8xbf16>, vector<8x8xbf16>, vector<8x8xf32> -> vector<8x8xf32>
    %cst_57 = arith.constant 0.353553385 : f32
    %94 = vector.broadcast %cst_57 : f32 to vector<8x8xf32>
    %95 = arith.mulf %93, %94 : vector<8x8xf32>
    %96 = arith.addf %95, %11 : vector<8x8xf32>
    %c2 = arith.constant 2 : index
    %c0_58 = arith.constant 0 : index
    %c0_59 = arith.constant 0 : index
    %97 = vector.load %arg13[%c2, %c0_58, %c0_59] : memref<4x8x1xf32, #tpu.memory_space<vmem>>, vector<1x8x1xf32>
    %98 = vector.shape_cast %97 : vector<1x8x1xf32> to vector<8x1xf32>
    %cst_60 = arith.constant dense<0xFF800000> : vector<8xf32>
    %99 = vector.multi_reduction <maximumf>, %96, %cst_60 [1] : vector<8x8xf32> to vector<8xf32>
    %100 = vector.shape_cast %99 : vector<8xf32> to vector<8x1xf32>
    %101 = arith.maximumf %98, %100 : vector<8x1xf32>
    %102 = arith.subf %98, %101 : vector<8x1xf32>
    %103 = math.exp %102 : vector<8x1xf32>
    %104 = vector.broadcast %101 : vector<8x1xf32> to vector<8x8xf32>
    %105 = arith.subf %96, %104 : vector<8x8xf32>
    %106 = math.exp %105 : vector<8x8xf32>
    %c2_61 = arith.constant 2 : index
    %c0_62 = arith.constant 0 : index
    %c0_63 = arith.constant 0 : index
    %107 = vector.load %arg14[%c2_61, %c0_62, %c0_63] : memref<4x8x1xf32, #tpu.memory_space<vmem>>, vector<1x8x1xf32>
    %108 = vector.shape_cast %107 : vector<1x8x1xf32> to vector<8x1xf32>
    %109 = arith.mulf %103, %108 : vector<8x1xf32>
    %cst_64 = arith.constant dense<0.000000e+00> : vector<8xf32>
    %110 = vector.multi_reduction <add>, %106, %cst_64 [1] : vector<8x8xf32> to vector<8xf32>
    %111 = vector.shape_cast %110 : vector<8xf32> to vector<8x1xf32>
    %112 = arith.addf %109, %111 : vector<8x1xf32>
    %c2_65 = arith.constant 2 : index
    %c0_66 = arith.constant 0 : index
    %c0_67 = arith.constant 0 : index
    %113 = vector.load %arg14[%c2_65, %c0_66, %c0_67] : memref<4x8x1xf32, #tpu.memory_space<vmem>>, vector<1x8x1xf32>
    %114 = vector.shape_cast %113 : vector<1x8x1xf32> to vector<8x1xf32>
    %115 = vector.shape_cast %112 : vector<8x1xf32> to vector<1x8x1xf32>
    tpu.vector_store %arg14[%c2_65, %c0_66, %c0_67], %115 {strides = array<i32>} : memref<4x8x1xf32, #tpu.memory_space<vmem>>, vector<1x8x1xf32>,
    %c2_68 = arith.constant 2 : index
    %c0_69 = arith.constant 0 : index
    %c0_70 = arith.constant 0 : index
    %116 = vector.load %arg15[%c2_68, %c0_69, %c0_70] : memref<4x8x8xf32, #tpu.memory_space<vmem>>, vector<1x8x8xf32>
    %117 = vector.shape_cast %116 : vector<1x8x8xf32> to vector<8x8xf32>
    %118 = vector.broadcast %103 : vector<8x1xf32> to vector<8x8xf32>
    %119 = arith.mulf %118, %117 : vector<8x8xf32>
    %120 = arith.truncf %106 : vector<8x8xf32> to vector<8x8xbf16>
    %cst_71 = arith.constant dense<0.000000e+00> : vector<8x8xf32>
    %121 = tpu.matmul %120, %92, %cst_71 {dimension_numbers = #tpu.dot_dimension_numbers<[1], [0], [0], [1], [0, 0, 1, 1], [], []>} : vector<8x8xbf16>, vector<8x8xbf16>, vector<8x8xf32> -> vector<8x8xf32>
    %122 = arith.addf %119, %121 : vector<8x8xf32>
    %c2_72 = arith.constant 2 : index
    %c0_73 = arith.constant 0 : index
    %c0_74 = arith.constant 0 : index
    %123 = vector.load %arg15[%c2_72, %c0_73, %c0_74] : memref<4x8x8xf32, #tpu.memory_space<vmem>>, vector<1x8x8xf32>
    %124 = vector.shape_cast %123 : vector<1x8x8xf32> to vector<8x8xf32>
    %125 = vector.shape_cast %122 : vector<8x8xf32> to vector<1x8x8xf32>
    tpu.vector_store %arg15[%c2_72, %c0_73, %c0_74], %125 {strides = array<i32>} : memref<4x8x8xf32, #tpu.memory_space<vmem>>, vector<1x8x8xf32>,
    %c2_75 = arith.constant 2 : index
    %c0_76 = arith.constant 0 : index
    %c0_77 = arith.constant 0 : index
    %126 = vector.load %arg13[%c2_75, %c0_76, %c0_77] : memref<4x8x1xf32, #tpu.memory_space<vmem>>, vector<1x8x1xf32>
    %127 = vector.shape_cast %126 : vector<1x8x1xf32> to vector<8x1xf32>
    %128 = vector.shape_cast %101 : vector<8x1xf32> to vector<1x8x1xf32>
    tpu.vector_store %arg13[%c2_75, %c0_76, %c0_77], %128 {strides = array<i32>} : memref<4x8x1xf32, #tpu.memory_space<vmem>>, vector<1x8x1xf32>,
    %129 = vector.extract_strided_slice %4 {offsets = [0, 24], sizes = [8, 8], strides = [1, 1]} : vector<8x32xbf16> to vector<8x8xbf16>
    %130 = vector.extract_strided_slice %6 {offsets = [0, 24], sizes = [8, 8], strides = [1, 1]} : vector<8x32xbf16> to vector<8x8xbf16>
    %131 = vector.extract_strided_slice %8 {offsets = [0, 24], sizes = [8, 8], strides = [1, 1]} : vector<8x32xbf16> to vector<8x8xbf16>
    %cst_78 = arith.constant dense<0.000000e+00> : vector<8x8xf32>
    %132 = tpu.matmul %129, %130, %cst_78 {dimension_numbers = #tpu.dot_dimension_numbers<[1], [1], [0], [0], [0, 0, 1, 0], [], []>} : vector<8x8xbf16>, vector<8x8xbf16>, vector<8x8xf32> -> vector<8x8xf32>
    %cst_79 = arith.constant 0.353553385 : f32
    %133 = vector.broadcast %cst_79 : f32 to vector<8x8xf32>
    %134 = arith.mulf %132, %133 : vector<8x8xf32>
    %135 = arith.addf %134, %11 : vector<8x8xf32>
    %c3 = arith.constant 3 : index
    %c0_80 = arith.constant 0 : index
    %c0_81 = arith.constant 0 : index
    %136 = vector.load %arg13[%c3, %c0_80, %c0_81] : memref<4x8x1xf32, #tpu.memory_space<vmem>>, vector<1x8x1xf32>
    %137 = vector.shape_cast %136 : vector<1x8x1xf32> to vector<8x1xf32>
    %cst_82 = arith.constant dense<0xFF800000> : vector<8xf32>
    %138 = vector.multi_reduction <maximumf>, %135, %cst_82 [1] : vector<8x8xf32> to vector<8xf32>
    %139 = vector.shape_cast %138 : vector<8xf32> to vector<8x1xf32>
    %140 = arith.maximumf %137, %139 : vector<8x1xf32>
    %141 = arith.subf %137, %140 : vector<8x1xf32>
    %142 = math.exp %141 : vector<8x1xf32>
    %143 = vector.broadcast %140 : vector<8x1xf32> to vector<8x8xf32>
    %144 = arith.subf %135, %143 : vector<8x8xf32>
    %145 = math.exp %144 : vector<8x8xf32>
    %c3_83 = arith.constant 3 : index
    %c0_84 = arith.constant 0 : index
    %c0_85 = arith.constant 0 : index
    %146 = vector.load %arg14[%c3_83, %c0_84, %c0_85] : memref<4x8x1xf32, #tpu.memory_space<vmem>>, vector<1x8x1xf32>
    %147 = vector.shape_cast %146 : vector<1x8x1xf32> to vector<8x1xf32>
    %148 = arith.mulf %142, %147 : vector<8x1xf32>
    %cst_86 = arith.constant dense<0.000000e+00> : vector<8xf32>
    %149 = vector.multi_reduction <add>, %145, %cst_86 [1] : vector<8x8xf32> to vector<8xf32>
    %150 = vector.shape_cast %149 : vector<8xf32> to vector<8x1xf32>
    %151 = arith.addf %148, %150 : vector<8x1xf32>
    %c3_87 = arith.constant 3 : index
    %c0_88 = arith.constant 0 : index
    %c0_89 = arith.constant 0 : index
    %152 = vector.load %arg14[%c3_87, %c0_88, %c0_89] : memref<4x8x1xf32, #tpu.memory_space<vmem>>, vector<1x8x1xf32>
    %153 = vector.shape_cast %152 : vector<1x8x1xf32> to vector<8x1xf32>
    %154 = vector.shape_cast %151 : vector<8x1xf32> to vector<1x8x1xf32>
    tpu.vector_store %arg14[%c3_87, %c0_88, %c0_89], %154 {strides = array<i32>} : memref<4x8x1xf32, #tpu.memory_space<vmem>>, vector<1x8x1xf32>,
    %c3_90 = arith.constant 3 : index
    %c0_91 = arith.constant 0 : index
    %c0_92 = arith.constant 0 : index
    %155 = vector.load %arg15[%c3_90, %c0_91, %c0_92] : memref<4x8x8xf32, #tpu.memory_space<vmem>>, vector<1x8x8xf32>
    %156 = vector.shape_cast %155 : vector<1x8x8xf32> to vector<8x8xf32>
    %157 = vector.broadcast %142 : vector<8x1xf32> to vector<8x8xf32>
    %158 = arith.mulf %157, %156 : vector<8x8xf32>
    %159 = arith.truncf %145 : vector<8x8xf32> to vector<8x8xbf16>
    %cst_93 = arith.constant dense<0.000000e+00> : vector<8x8xf32>
    %160 = tpu.matmul %159, %131, %cst_93 {dimension_numbers = #tpu.dot_dimension_numbers<[1], [0], [0], [1], [0, 0, 1, 1], [], []>} : vector<8x8xbf16>, vector<8x8xbf16>, vector<8x8xf32> -> vector<8x8xf32>
    %161 = arith.addf %158, %160 : vector<8x8xf32>
    %c3_94 = arith.constant 3 : index
    %c0_95 = arith.constant 0 : index
    %c0_96 = arith.constant 0 : index
    %162 = vector.load %arg15[%c3_94, %c0_95, %c0_96] : memref<4x8x8xf32, #tpu.memory_space<vmem>>, vector<1x8x8xf32>
    %163 = vector.shape_cast %162 : vector<1x8x8xf32> to vector<8x8xf32>
    %164 = vector.shape_cast %161 : vector<8x8xf32> to vector<1x8x8xf32>
    tpu.vector_store %arg15[%c3_94, %c0_95, %c0_96], %164 {strides = array<i32>} : memref<4x8x8xf32, #tpu.memory_space<vmem>>, vector<1x8x8xf32>,
    %c3_97 = arith.constant 3 : index
    %c0_98 = arith.constant 0 : index
    %c0_99 = arith.constant 0 : index
    %165 = vector.load %arg13[%c3_97, %c0_98, %c0_99] : memref<4x8x1xf32, #tpu.memory_space<vmem>>, vector<1x8x1xf32>
    %166 = vector.shape_cast %165 : vector<1x8x1xf32> to vector<8x1xf32>
    %167 = vector.shape_cast %140 : vector<8x1xf32> to vector<1x8x1xf32>
    tpu.vector_store %arg13[%c3_97, %c0_98, %c0_99], %167 {strides = array<i32>} : memref<4x8x1xf32, #tpu.memory_space<vmem>>, vector<1x8x1xf32>,
    %c0_i32_100 = arith.constant 0 : i32
    %168 = arith.cmpi eq, %arg2, %c0_i32_100 : i32
    %169 = arith.extui %168 : i1 to i32
    %c0_i32_101 = arith.constant 0 : i32
    %170 = arith.cmpi ne, %169, %c0_i32_101 : i32
    scf.if %170 {
      %c0_102 = arith.constant 0 : index
      %c0_103 = arith.constant 0 : index
      %171 = vector.load %arg8[%c0_102, %c0_103] : memref<32x32xbf16, #tpu.memory_space<vmem>>, vector<32x32xbf16>
      %c0_104 = arith.constant 0 : index
      %c0_105 = arith.constant 0 : index
      %c0_106 = arith.constant 0 : index
      %172 = vector.load %arg4[%c0_104, %c0_105, %c0_106] : memref<1x8x32xbf16, #tpu.memory_space<vmem>>, vector<1x8x32xbf16>
      %173 = vector.shape_cast %172 : vector<1x8x32xbf16> to vector<8x32xbf16>
      %174 = arith.extf %173 : vector<8x32xbf16> to vector<8x32xf32>
      %c0_107 = arith.constant 0 : index
      %c0_108 = arith.constant 0 : index
      %175 = vector.load %arg9[%c0_107, %c0_108] : memref<1x32xf32, #tpu.memory_space<vmem>>, vector<1x32xf32>
      %176 = vector.broadcast %175 : vector<1x32xf32> to vector<8x32xf32>
      %177 = arith.addf %174, %176 : vector<8x32xf32>
      %c0_109 = arith.constant 0 : index
      %c0_110 = arith.constant 0 : index
      %c0_111 = arith.constant 0 : index
      %178 = vector.load %arg15[%c0_109, %c0_110, %c0_111] : memref<4x8x8xf32, #tpu.memory_space<vmem>>, vector<1x8x8xf32>
      %179 = vector.shape_cast %178 : vector<1x8x8xf32> to vector<8x8xf32>
      %c0_112 = arith.constant 0 : index
      %c0_113 = arith.constant 0 : index
      %c0_114 = arith.constant 0 : index
      %180 = vector.load %arg14[%c0_112, %c0_113, %c0_114] : memref<4x8x1xf32, #tpu.memory_space<vmem>>, vector<1x8x1xf32>
      %181 = vector.shape_cast %180 : vector<1x8x1xf32> to vector<8x1xf32>
      %182 = vector.broadcast %181 : vector<8x1xf32> to vector<8x8xf32>
      %183 = arith.divf %179, %182 : vector<8x8xf32>
      %184 = vector.extract_strided_slice %171 {offsets = [0, 0], sizes = [8, 32], strides = [1, 1]} : vector<32x32xbf16> to vector<8x32xbf16>
      %185 = arith.truncf %183 : vector<8x8xf32> to vector<8x8xbf16>
      %cst_115 = arith.constant dense<0.000000e+00> : vector<8x32xf32>
      %186 = tpu.matmul %185, %184, %cst_115 {dimension_numbers = #tpu.dot_dimension_numbers<[1], [0], [0], [1], [0, 0, 1, 1], [], []>} : vector<8x8xbf16>, vector<8x32xbf16>, vector<8x32xf32> -> vector<8x32xf32>
      %187 = arith.addf %177, %186 : vector<8x32xf32>
      %c1_116 = arith.constant 1 : index
      %c0_117 = arith.constant 0 : index
      %c0_118 = arith.constant 0 : index
      %188 = vector.load %arg15[%c1_116, %c0_117, %c0_118] : memref<4x8x8xf32, #tpu.memory_space<vmem>>, vector<1x8x8xf32>
      %189 = vector.shape_cast %188 : vector<1x8x8xf32> to vector<8x8xf32>
      %c1_119 = arith.constant 1 : index
      %c0_120 = arith.constant 0 : index
      %c0_121 = arith.constant 0 : index
      %190 = vector.load %arg14[%c1_119, %c0_120, %c0_121] : memref<4x8x1xf32, #tpu.memory_space<vmem>>, vector<1x8x1xf32>
      %191 = vector.shape_cast %190 : vector<1x8x1xf32> to vector<8x1xf32>
      %192 = vector.broadcast %191 : vector<8x1xf32> to vector<8x8xf32>
      %193 = arith.divf %189, %192 : vector<8x8xf32>
      %194 = vector.extract_strided_slice %171 {offsets = [8, 0], sizes = [8, 32], strides = [1, 1]} : vector<32x32xbf16> to vector<8x32xbf16>
      %195 = arith.truncf %193 : vector<8x8xf32> to vector<8x8xbf16>
      %cst_122 = arith.constant dense<0.000000e+00> : vector<8x32xf32>
      %196 = tpu.matmul %195, %194, %cst_122 {dimension_numbers = #tpu.dot_dimension_numbers<[1], [0], [0], [1], [0, 0, 1, 1], [], []>} : vector<8x8xbf16>, vector<8x32xbf16>, vector<8x32xf32> -> vector<8x32xf32>
      %197 = arith.addf %187, %196 : vector<8x32xf32>
      %c2_123 = arith.constant 2 : index
      %c0_124 = arith.constant 0 : index
      %c0_125 = arith.constant 0 : index
      %198 = vector.load %arg15[%c2_123, %c0_124, %c0_125] : memref<4x8x8xf32, #tpu.memory_space<vmem>>, vector<1x8x8xf32>
      %199 = vector.shape_cast %198 : vector<1x8x8xf32> to vector<8x8xf32>
      %c2_126 = arith.constant 2 : index
      %c0_127 = arith.constant 0 : index
      %c0_128 = arith.constant 0 : index
      %200 = vector.load %arg14[%c2_126, %c0_127, %c0_128] : memref<4x8x1xf32, #tpu.memory_space<vmem>>, vector<1x8x1xf32>
      %201 = vector.shape_cast %200 : vector<1x8x1xf32> to vector<8x1xf32>
      %202 = vector.broadcast %201 : vector<8x1xf32> to vector<8x8xf32>
      %203 = arith.divf %199, %202 : vector<8x8xf32>
      %204 = vector.extract_strided_slice %171 {offsets = [16, 0], sizes = [8, 32], strides = [1, 1]} : vector<32x32xbf16> to vector<8x32xbf16>
      %205 = arith.truncf %203 : vector<8x8xf32> to vector<8x8xbf16>
      %cst_129 = arith.constant dense<0.000000e+00> : vector<8x32xf32>
      %206 = tpu.matmul %205, %204, %cst_129 {dimension_numbers = #tpu.dot_dimension_numbers<[1], [0], [0], [1], [0, 0, 1, 1], [], []>} : vector<8x8xbf16>, vector<8x32xbf16>, vector<8x32xf32> -> vector<8x32xf32>
      %207 = arith.addf %197, %206 : vector<8x32xf32>
      %c3_130 = arith.constant 3 : index
      %c0_131 = arith.constant 0 : index
      %c0_132 = arith.constant 0 : index
      %208 = vector.load %arg15[%c3_130, %c0_131, %c0_132] : memref<4x8x8xf32, #tpu.memory_space<vmem>>, vector<1x8x8xf32>
      %209 = vector.shape_cast %208 : vector<1x8x8xf32> to vector<8x8xf32>
      %c3_133 = arith.constant 3 : index
      %c0_134 = arith.constant 0 : index
      %c0_135 = arith.constant 0 : index
      %210 = vector.load %arg14[%c3_133, %c0_134, %c0_135] : memref<4x8x1xf32, #tpu.memory_space<vmem>>, vector<1x8x1xf32>
      %211 = vector.shape_cast %210 : vector<1x8x1xf32> to vector<8x1xf32>
      %212 = vector.broadcast %211 : vector<8x1xf32> to vector<8x8xf32>
      %213 = arith.divf %209, %212 : vector<8x8xf32>
      %214 = vector.extract_strided_slice %171 {offsets = [24, 0], sizes = [8, 32], strides = [1, 1]} : vector<32x32xbf16> to vector<8x32xbf16>
      %215 = arith.truncf %213 : vector<8x8xf32> to vector<8x8xbf16>
      %cst_136 = arith.constant dense<0.000000e+00> : vector<8x32xf32>
      %216 = tpu.matmul %215, %214, %cst_136 {dimension_numbers = #tpu.dot_dimension_numbers<[1], [0], [0], [1], [0, 0, 1, 1], [], []>} : vector<8x8xbf16>, vector<8x32xbf16>, vector<8x32xf32> -> vector<8x32xf32>
      %217 = arith.addf %207, %216 : vector<8x32xf32>
      %cst_137 = arith.constant dense<0.000000e+00> : vector<8xf32>
      %218 = vector.multi_reduction <add>, %217, %cst_137 [1] : vector<8x32xf32> to vector<8xf32>
      %219 = vector.shape_cast %218 : vector<8xf32> to vector<8x1xf32>
      %cst_138 = arith.constant 3.200000e+01 : f32
      %220 = vector.broadcast %cst_138 : f32 to vector<8x1xf32>
      %221 = arith.divf %219, %220 : vector<8x1xf32>
      %222 = vector.broadcast %221 : vector<8x1xf32> to vector<8x32xf32>
      %223 = arith.subf %217, %222 : vector<8x32xf32>
      %224 = arith.mulf %223, %223 : vector<8x32xf32>
      %cst_139 = arith.constant dense<0.000000e+00> : vector<8xf32>
      %225 = vector.multi_reduction <add>, %224, %cst_139 [1] : vector<8x32xf32> to vector<8xf32>
      %226 = vector.shape_cast %225 : vector<8xf32> to vector<8x1xf32>
      %cst_140 = arith.constant 3.200000e+01 : f32
      %227 = vector.broadcast %cst_140 : f32 to vector<8x1xf32>
      %228 = arith.divf %226, %227 : vector<8x1xf32>
      %229 = vector.broadcast %221 : vector<8x1xf32> to vector<8x32xf32>
      %230 = arith.subf %217, %229 : vector<8x32xf32>
      %cst_141 = arith.constant 9.99999997E-7 : f32
      %231 = vector.broadcast %cst_141 : f32 to vector<8x1xf32>
      %232 = arith.addf %228, %231 : vector<8x1xf32>
      %233 = math.rsqrt %232 : vector<8x1xf32>
      %234 = vector.broadcast %233 : vector<8x1xf32> to vector<8x32xf32>
      %235 = arith.mulf %230, %234 : vector<8x32xf32>
      %c0_142 = arith.constant 0 : index
      %236 = memref.load %arg10[%c0_142] : memref<1xf32, #tpu.memory_space<smem>>
      %237 = vector.broadcast %236 : f32 to vector<8x32xf32>
      %238 = arith.mulf %237, %235 : vector<8x32xf32>
      %c0_143 = arith.constant 0 : index
      %239 = memref.load %arg11[%c0_143] : memref<1xf32, #tpu.memory_space<smem>>
      %240 = vector.broadcast %239 : f32 to vector<8x32xf32>
      %241 = arith.addf %238, %240 : vector<8x32xf32>
      %242 = arith.truncf %241 : vector<8x32xf32> to vector<8x32xbf16>
      %c0_144 = arith.constant 0 : index
      %c0_145 = arith.constant 0 : index
      %c0_146 = arith.constant 0 : index
      %243 = vector.load %arg12[%c0_144, %c0_145, %c0_146] : memref<1x8x32xbf16, #tpu.memory_space<vmem>>, vector<1x8x32xbf16>
      %244 = vector.shape_cast %243 : vector<1x8x32xbf16> to vector<8x32xbf16>
      %245 = vector.shape_cast %242 : vector<8x32xbf16> to vector<1x8x32xbf16>
      tpu.vector_store %arg12[%c0_144, %c0_145, %c0_146], %245 {strides = array<i32>} : memref<1x8x32xbf16, #tpu.memory_space<vmem>>, vector<1x8x32xbf16>,
    } else {
    }
    return
  }
  func.func @transform_0(%arg0: i32, %arg1: i32, %arg2: i32) -> (i32, i32, i32) {
    %c0_i32 = arith.constant 0 : i32
    %c0_i32_0 = arith.constant 0 : i32
    return %arg0, %arg1, %c0_i32 : i32, i32, i32
  }
  func.func @transform_1(%arg0: i32, %arg1: i32, %arg2: i32) -> (i32, i32, i32) {
    %c0_i32 = arith.constant 0 : i32
    %c0_i32_0 = arith.constant 0 : i32
    return %arg0, %arg1, %c0_i32 : i32, i32, i32
  }
  func.func @transform_2(%arg0: i32, %arg1: i32, %arg2: i32) -> (i32, i32, i32) {
    %c0_i32 = arith.constant 0 : i32
    %c0_i32_0 = arith.constant 0 : i32
    return %arg0, %arg2, %c0_i32 : i32, i32, i32
  }
  func.func @transform_3(%arg0: i32, %arg1: i32, %arg2: i32) -> (i32, i32, i32) {
    %c0_i32 = arith.constant 0 : i32
    %c0_i32_0 = arith.constant 0 : i32
    return %arg0, %arg2, %c0_i32 : i32, i32, i32
  }
  func.func @transform_4(%arg0: i32, %arg1: i32, %arg2: i32) -> (i32, i32, i32) {
    %c0_i32 = arith.constant 0 : i32
    %c0_i32_0 = arith.constant 0 : i32
    return %c0_i32, %arg1, %arg2 : i32, i32, i32
  }
  func.func @transform_5(%arg0: i32, %arg1: i32, %arg2: i32) -> (i32, i32) {
    %c0_i32 = arith.constant 0 : i32
    %c0_i32_0 = arith.constant 0 : i32
    %c0_i32_1 = arith.constant 0 : i32
    return %c0_i32, %c0_i32_0 : i32, i32
  }
  func.func @transform_6(%arg0: i32, %arg1: i32, %arg2: i32) -> (i32, i32) {
    %c0_i32 = arith.constant 0 : i32
    %c0_i32_0 = arith.constant 0 : i32
    %c0_i32_1 = arith.constant 0 : i32
    return %c0_i32, %c0_i32_0 : i32, i32
  }
  func.func @transform_7(%arg0: i32, %arg1: i32, %arg2: i32) -> i32 {
    %c0_i32 = arith.constant 0 : i32
    %c0_i32_0 = arith.constant 0 : i32
    return %c0_i32 : i32
  }
  func.func @transform_8(%arg0: i32, %arg1: i32, %arg2: i32) -> i32 {
    %c0_i32 = arith.constant 0 : i32
    %c0_i32_0 = arith.constant 0 : i32
    return %c0_i32 : i32
  }
  func.func @transform_9(%arg0: i32, %arg1: i32, %arg2: i32) -> (i32, i32, i32) {
    %c0_i32 = arith.constant 0 : i32
    %c0_i32_0 = arith.constant 0 : i32
    return %arg0, %arg1, %c0_i32 : i32, i32, i32
  }
}

module attributes {stable_mosaic.version = 11 : i64} {
  func.func @_ffn_add_ln_kernel(%arg0: i32, %arg1: memref<8x32xbf16, #tpu.memory_space<vmem>>, %arg2: memref<32x64xbf16, #tpu.memory_space<vmem>>, %arg3: memref<1x64xf32, #tpu.memory_space<vmem>>, %arg4: memref<64x32xbf16, #tpu.memory_space<vmem>>, %arg5: memref<1x32xf32, #tpu.memory_space<vmem>>, %arg6: memref<1xf32, #tpu.memory_space<smem>>, %arg7: memref<1xf32, #tpu.memory_space<smem>>, %arg8: memref<8x32xf32, #tpu.memory_space<vmem>>) attributes {dimension_semantics = [#tpu.dimension_semantics<parallel>], iteration_bounds = array<i64: 2>, scalar_prefetch = 0 : i64, scratch_operands = 0 : i64, tpu.core_type = #tpu.core_type<tc>, window_params = [{transform_indices = @transform_0, window_bounds = array<i64: 8, 32>}, {pipeline_mode = #tpu.pipeline_mode<synchronous>, transform_indices = @transform_1, window_bounds = array<i64: 32, 64>}, {pipeline_mode = #tpu.pipeline_mode<synchronous>, transform_indices = @transform_2, window_bounds = array<i64: 1, 64>}, {pipeline_mode = #tpu.pipeline_mode<synchronous>, transform_indices = @transform_3, window_bounds = array<i64: 64, 32>}, {pipeline_mode = #tpu.pipeline_mode<synchronous>, transform_indices = @transform_4, window_bounds = array<i64: 1, 32>}, {transform_indices = @transform_5, window_bounds = array<i64: 1>}, {transform_indices = @transform_6, window_bounds = array<i64: 1>}, {transform_indices = @transform_7, window_bounds = array<i64: 8, 32>}]} {
    %c0 = arith.constant 0 : index
    %c0_0 = arith.constant 0 : index
    %0 = vector.load %arg1[%c0, %c0_0] : memref<8x32xbf16, #tpu.memory_space<vmem>>, vector<8x32xbf16>
    %c0_1 = arith.constant 0 : index
    %c0_2 = arith.constant 0 : index
    %1 = vector.load %arg2[%c0_1, %c0_2] : memref<32x64xbf16, #tpu.memory_space<vmem>>, vector<32x64xbf16>
    %cst = arith.constant dense<0.000000e+00> : vector<8x64xf32>
    %2 = tpu.matmul %0, %1, %cst {dimension_numbers = #tpu.dot_dimension_numbers<[1], [0], [0], [1], [0, 0, 1, 1], [], []>} : vector<8x32xbf16>, vector<32x64xbf16>, vector<8x64xf32> -> vector<8x64xf32>
    %c0_3 = arith.constant 0 : index
    %c0_4 = arith.constant 0 : index
    %3 = vector.load %arg3[%c0_3, %c0_4] : memref<1x64xf32, #tpu.memory_space<vmem>>, vector<1x64xf32>
    %4 = vector.broadcast %3 : vector<1x64xf32> to vector<8x64xf32>
    %5 = arith.addf %2, %4 : vector<8x64xf32>
    %cst_5 = arith.constant 0.000000e+00 : f32
    %6 = vector.broadcast %cst_5 : f32 to vector<8x64xf32>
    %7 = arith.maximumf %5, %6 : vector<8x64xf32>
    %8 = arith.truncf %7 : vector<8x64xf32> to vector<8x64xbf16>
    %c0_6 = arith.constant 0 : index
    %c0_7 = arith.constant 0 : index
    %9 = vector.load %arg4[%c0_6, %c0_7] : memref<64x32xbf16, #tpu.memory_space<vmem>>, vector<64x32xbf16>
    %cst_8 = arith.constant dense<0.000000e+00> : vector<8x32xf32>
    %10 = tpu.matmul %8, %9, %cst_8 {dimension_numbers = #tpu.dot_dimension_numbers<[1], [0], [0], [1], [0, 0, 1, 1], [], []>} : vector<8x64xbf16>, vector<64x32xbf16>, vector<8x32xf32> -> vector<8x32xf32>
    %c0_9 = arith.constant 0 : index
    %c0_10 = arith.constant 0 : index
    %11 = vector.load %arg5[%c0_9, %c0_10] : memref<1x32xf32, #tpu.memory_space<vmem>>, vector<1x32xf32>
    %12 = vector.broadcast %11 : vector<1x32xf32> to vector<8x32xf32>
    %13 = arith.addf %10, %12 : vector<8x32xf32>
    %14 = arith.extf %0 : vector<8x32xbf16> to vector<8x32xf32>
    %15 = arith.addf %14, %13 : vector<8x32xf32>
    %cst_11 = arith.constant dense<0.000000e+00> : vector<8xf32>
    %16 = vector.multi_reduction <add>, %15, %cst_11 [1] : vector<8x32xf32> to vector<8xf32>
    %17 = vector.shape_cast %16 : vector<8xf32> to vector<8x1xf32>
    %cst_12 = arith.constant 3.200000e+01 : f32
    %18 = vector.broadcast %cst_12 : f32 to vector<8x1xf32>
    %19 = arith.divf %17, %18 : vector<8x1xf32>
    %20 = vector.broadcast %19 : vector<8x1xf32> to vector<8x32xf32>
    %21 = arith.subf %15, %20 : vector<8x32xf32>
    %22 = arith.mulf %21, %21 : vector<8x32xf32>
    %cst_13 = arith.constant dense<0.000000e+00> : vector<8xf32>
    %23 = vector.multi_reduction <add>, %22, %cst_13 [1] : vector<8x32xf32> to vector<8xf32>
    %24 = vector.shape_cast %23 : vector<8xf32> to vector<8x1xf32>
    %cst_14 = arith.constant 3.200000e+01 : f32
    %25 = vector.broadcast %cst_14 : f32 to vector<8x1xf32>
    %26 = arith.divf %24, %25 : vector<8x1xf32>
    %27 = vector.broadcast %19 : vector<8x1xf32> to vector<8x32xf32>
    %28 = arith.subf %15, %27 : vector<8x32xf32>
    %cst_15 = arith.constant 9.99999997E-7 : f32
    %29 = vector.broadcast %cst_15 : f32 to vector<8x1xf32>
    %30 = arith.addf %26, %29 : vector<8x1xf32>
    %31 = math.rsqrt %30 : vector<8x1xf32>
    %32 = vector.broadcast %31 : vector<8x1xf32> to vector<8x32xf32>
    %33 = arith.mulf %28, %32 : vector<8x32xf32>
    %c0_16 = arith.constant 0 : index
    %34 = memref.load %arg6[%c0_16] : memref<1xf32, #tpu.memory_space<smem>>
    %35 = vector.broadcast %34 : f32 to vector<8x32xf32>
    %36 = arith.mulf %35, %33 : vector<8x32xf32>
    %c0_17 = arith.constant 0 : index
    %37 = memref.load %arg7[%c0_17] : memref<1xf32, #tpu.memory_space<smem>>
    %38 = vector.broadcast %37 : f32 to vector<8x32xf32>
    %39 = arith.addf %36, %38 : vector<8x32xf32>
    %c0_18 = arith.constant 0 : index
    %c0_19 = arith.constant 0 : index
    %40 = vector.load %arg8[%c0_18, %c0_19] : memref<8x32xf32, #tpu.memory_space<vmem>>, vector<8x32xf32>
    tpu.vector_store %arg8[%c0_18, %c0_19], %39 {strides = array<i32>} : memref<8x32xf32, #tpu.memory_space<vmem>>, vector<8x32xf32>,
    return
  }
  func.func @transform_0(%arg0: i32) -> (i32, i32) {
    %c0_i32 = arith.constant 0 : i32
    %c0_i32_0 = arith.constant 0 : i32
    return %arg0, %c0_i32 : i32, i32
  }
  func.func @transform_1(%arg0: i32) -> (i32, i32) {
    %c0_i32 = arith.constant 0 : i32
    %c0_i32_0 = arith.constant 0 : i32
    %c0_i32_1 = arith.constant 0 : i32
    return %c0_i32, %c0_i32_0 : i32, i32
  }
  func.func @transform_2(%arg0: i32) -> (i32, i32) {
    %c0_i32 = arith.constant 0 : i32
    %c0_i32_0 = arith.constant 0 : i32
    %c0_i32_1 = arith.constant 0 : i32
    return %c0_i32, %c0_i32_0 : i32, i32
  }
  func.func @transform_3(%arg0: i32) -> (i32, i32) {
    %c0_i32 = arith.constant 0 : i32
    %c0_i32_0 = arith.constant 0 : i32
    %c0_i32_1 = arith.constant 0 : i32
    return %c0_i32, %c0_i32_0 : i32, i32
  }
  func.func @transform_4(%arg0: i32) -> (i32, i32) {
    %c0_i32 = arith.constant 0 : i32
    %c0_i32_0 = arith.constant 0 : i32
    %c0_i32_1 = arith.constant 0 : i32
    return %c0_i32, %c0_i32_0 : i32, i32
  }
  func.func @transform_5(%arg0: i32) -> i32 {
    %c0_i32 = arith.constant 0 : i32
    %c0_i32_0 = arith.constant 0 : i32
    return %c0_i32 : i32
  }
  func.func @transform_6(%arg0: i32) -> i32 {
    %c0_i32 = arith.constant 0 : i32
    %c0_i32_0 = arith.constant 0 : i32
    return %c0_i32 : i32
  }
  func.func @transform_7(%arg0: i32) -> (i32, i32) {
    %c0_i32 = arith.constant 0 : i32
    %c0_i32_0 = arith.constant 0 : i32
    return %arg0, %c0_i32 : i32, i32
  }
}

</mosaic_0001>

<bundles_post_ra>
// kernel: transformer_decoder_block.7
= control target key start
LH: loop header
LB: loop body
LE: loop exit
PB: predicated region body
PF: predicated region fallthrough
CT: control target
= control target key end

     0   :  { %s400_s15 = smov 0   ;;  %s429_s0 = inlined_call_operand.vmem [shape: bf16[16,32], index: 0, kind: input, shape index: {}]   ;;  %s430_s1 = inlined_call_operand.vmem [shape: bf16[32,64], index: 1, kind: input, shape index: {}]   ;;  %s431_s2 = inlined_call_operand.vmem [shape: f32[1,64], index: 2, kind: input, shape index: {}]   ;;  %s432_s3 = inlined_call_operand.vmem [shape: bf16[16,32], index: 3, kind: output, shape index: {0}]   ;;  %s433_s4 = inlined_call_operand.vmem [shape: bf16[16,32], index: 4, kind: output, shape index: {1}]  }
   0x1 LB: > { %s335_s16 = sadd.s32 4294967295, %s372_s15   ;;  %p339_p0 = scmp.ge.s32.totalorder %s372_s15, 1  ;;  %s372_s15 = sphi %s400_s15, %s15_s15  }
   0x2   : > { %p164_p1 = scmp.lt.s32.totalorder %s372_s15, 3 }
   0x4   : > { %p165_p2 = pnand %p339_p0, %p164_p1 }
   0x5   : > { %p192_p3 = scmp.lt.s32.totalorder (!%p165_p2), %s335_s16, 1  ;;  %s374_s30 = smov (!%p165_p2), 96  }
   0x6   : > { %168 = sbr.rel (%p165_p2) target bundleno = 265 (0x109), region = 32 }
   0xb   : > { %v355_v0 = vld [vmem:[%s430_s1 + $0x8] sm:$0xff]  ;;  %v354_v1 = vld [vmem:[%s430_s1] sm:$0xff]  ;;  %s435_s16 = smov (!%p192_p3, %s335_s16), 1  ;;  %vm226_vm0 = vcmask 261120   ;;  %vm244_vm1 = vcmask 257024  }
   0xc   : > { %236 = vmatpush.bf16.msra.mxu0 %v355_v0  ;;  %s340_s21 = sshll.u32 %s435_s16, 2  ;;  %v365_v3 = vld [vmem:[%s431_s2] ss:$0 sm:$0xff] }
   0xd   : > { %s195_s24 = scalar_lea.vmem %s429_s0, %s340_s21  ;;  %s199_s29 = scalar_lea.vmem %s432_s3, %s340_s21 }
   0xe   : > { %v205_v2 = vld [vmem:[%s195_s24] sm:$0xf]  ;;  %s203_s7 = scalar_lea.vmem %s433_s4, %s340_s21 }
  0x10   : > { %237 = vmatpush.bf16.msra.mxu0 %v354_v1 }
  0x13   : > { %351 = vmatmul.msk.bf16.vlgmr.msra.gmra.mxu0 %vm226_vm0, %v205_v2 }
  0x90   : > { %v239_v4 = vpop.f32.mrf.mxu0 }
  0x91   : > { %v240_v5 = vadd.f32 %v365_v3, %v239_v4 }
  0x93   : > { %v243_v6 = vpack.c.bf16 %v240_v5, %v240_v5 }
  0x95   : > { %247 = vrot.lane.b32.xlu0 %v243_v6, %s374_s30  ;;  %245 = vst.msk [vmem:[%s199_s29] sm:$0xf] %vm244_vm1, %v243_v6 }
  0x98   : > { %v241_v7 = vpop.f32.mrf.mxu0 }
 0x107   : > { %v248_v8 = vpop.permute.xlu0 %247 }
 0x108   : > { %250 = vst.msk [vmem:[%s203_s7] sm:$0xf] %vm244_vm1, %v248_v8 }
 0x109 PF: > { %s15_s15 = sadd.s32 1, %s372_s15  }
 0x10a   : > { %p12_p4 = scmp.ge.s32.totalorder %s15_s15, 4  }
 0x10c   :  { %14 = sbr.rel (!%p12_p4) target bundleno = 1 (0x1), region = 74 }

// kernel: transformer_decoder_block.5
= control target key start
LH: loop header
LB: loop body
LE: loop exit
PB: predicated region body
PF: predicated region fallthrough
CT: control target
= control target key end

     0   :  { %s480_s18 = smov 0   ;;  %s512_s0 = inlined_call_operand.vmem [shape: bf16[16,32], index: 0, kind: input, shape index: {}]   ;;  %s513_s1 = inlined_call_operand.vmem [shape: bf16[32,96], index: 1, kind: input, shape index: {}]   ;;  %s514_s2 = inlined_call_operand.vmem [shape: f32[1,96], index: 2, kind: input, shape index: {}]   ;;  %s515_s3 = inlined_call_operand.vmem [shape: bf16[16,32], index: 3, kind: output, shape index: {0}]   ;;  %s516_s4 = inlined_call_operand.vmem [shape: bf16[16,32], index: 4, kind: output, shape index: {1}]   ;;  %s517_s5 = inlined_call_operand.vmem [shape: bf16[16,32], index: 5, kind: output, shape index: {2}]  }
   0x1 LB: > { %s407_s19 = sadd.s32 4294967295, %s446_s18   ;;  %p411_p0 = scmp.ge.s32.totalorder %s446_s18, 1  ;;  %s446_s18 = sphi %s480_s18, %s16_s18  }
   0x2   : > { %p191_p1 = scmp.lt.s32.totalorder %s446_s18, 3 }
   0x4   : > { %p192_p2 = pnand %p411_p0, %p191_p1 }
   0x5   : > { %p225_p3 = scmp.lt.s32.totalorder (!%p192_p2), %s407_s19, 1  ;;  %s448_s8 = smov (!%p192_p2), 96  }
   0x6   : > { %195 = sbr.rel (%p192_p2) target bundleno = 273 (0x111), region = 32  ;;  %s449_s9 = smov (!%p192_p2), 64  }
   0xb   : > { %v428_v0 = vld [vmem:[%s513_s1 + $0x8] sm:$0xff]  ;;  %v427_v1 = vld [vmem:[%s513_s1] sm:$0xff]  ;;  %s519_s19 = smov (!%p225_p3, %s407_s19), 1  ;;  %vm263_vm0 = vcmask 261120   ;;  %vm281_vm1 = vcmask 257024  }
   0xc   : > { %273 = vmatpush.bf16.msra.mxu0 %v428_v0  ;;  %s412_s24 = sshll.u32 %s519_s19, 2  ;;  %v439_v3 = vld [vmem:[%s514_s2] ss:$0 sm:$0xff] }
   0xd   : > { %s228_s27 = scalar_lea.vmem %s512_s0, %s412_s24  ;;  %s232_s7 = scalar_lea.vmem %s515_s3, %s412_s24 }
   0xe   : > { %v242_v2 = vld [vmem:[%s228_s27] sm:$0xf]  ;;  %s236_s12 = scalar_lea.vmem %s516_s4, %s412_s24  ;;  %s240_s15 = scalar_lea.vmem %s517_s5, %s412_s24 }
  0x10   : > { %274 = vmatpush.bf16.msra.mxu0 %v427_v1 }
  0x13   : > { %424 = vmatmul.msk.bf16.vlgmr.msra.gmra.mxu0 %vm263_vm0, %v242_v2 }
  0x90   : > { %v276_v4 = vpop.f32.mrf.mxu0 }
  0x91   : > { %v277_v5 = vadd.f32 %v439_v3, %v276_v4 }
  0x93   : > { %v280_v6 = vpack.c.bf16 %v277_v5, %v277_v5 }
  0x95   : > { %284 = vrot.lane.b32.xlu0 %v280_v6, %s448_s8  ;;  %282 = vst.msk [vmem:[%s232_s7] sm:$0xf] %vm281_vm1, %v280_v6 }
  0x98   : > { %v278_v7 = vpop.f32.mrf.mxu0 }
  0x9d   : > { %288 = vrot.lane.b32.xlu0 %v280_v6, %s449_s9 }
 0x107   : > { %v285_v8 = vpop.permute.xlu0 %284 }
 0x108   : > { %287 = vst.msk [vmem:[%s236_s12] sm:$0xf] %vm281_vm1, %v285_v8 }
 0x10f   : > { %v289_v9 = vpop.permute.xlu0 %288 }
 0x110   : > { %291 = vst.msk [vmem:[%s240_s15] sm:$0xf] %vm281_vm1, %v289_v9 }
 0x111 PF: > { %s16_s18 = sadd.s32 1, %s446_s18  }
 0x112   : > { %p13_p4 = scmp.ge.s32.totalorder %s16_s18, 4  }
 0x114   :  { %15 = sbr.rel (!%p13_p4) target bundleno = 1 (0x1), region = 86 }

// kernel: transformer_decoder_block.6
= control target key start
LH: loop header
LB: loop body
LE: loop exit
PB: predicated region body
PF: predicated region fallthrough
CT: control target
= control target key end

     0   :  { %s1380_s13 = smov 0   ;;  %s1382_s14 = smov 0   ;;  %s1563_s0 = inlined_call_operand.vmem [shape: bf16[2,8,32], index: 0, kind: input, shape index: {}]   ;;  %s1564_s1 = inlined_call_operand.vmem [shape: bf16[2,8,32], index: 1, kind: input, shape index: {}]   ;;  %s1565_s2 = inlined_call_operand.vmem [shape: bf16[2,8,32], index: 2, kind: input, shape index: {}]   ;;  %s1566_s3 = inlined_call_operand.vmem [shape: bf16[2,8,32], index: 3, kind: input, shape index: {}]   ;;  %s1567_s4 = inlined_call_operand.vmem [shape: bf16[1,8,8], index: 4, kind: input, shape index: {}]   ;;  %s1568_s5 = inlined_call_operand.vmem [shape: bf16[32,32], index: 5, kind: input, shape index: {}]   ;;  %s1569_s6 = inlined_call_operand.vmem [shape: f32[1,32], index: 6, kind: input, shape index: {}]   ;;  %s1570_s7 = inlined_call_operand.<no memory space> [shape: f32[1], index: 7, kind: input, shape index: {}]   ;;  %s1571_s8 = inlined_call_operand.<no memory space> [shape: f32[1], index: 8, kind: input, shape index: {}]   ;;  %s1572_s9 = inlined_call_operand.vmem [shape: bf16[2,8,32], index: 9, kind: output, shape index: {}]  }
   0x1   :  { %14 = sst [smem:[#allocation5]] %s1570_s7  ;;  %s1384_s15 = smov 0  }
   0x2   :  { %15 = sst [smem:[#allocation6]] %s1571_s8 }
   0x3 LB: > { %s40_s7 = sadd.s32 1, %s1311_s14  ;;  %p1210_p0 = scmp.ge.s32.totalorder %s1315_s15, 1  ;;  %s1315_s15 = sphi %s1384_s15, %s21_s15   ;;  %s1311_s14 = sphi %s1382_s14, %s1574_s14   ;;  %s1307_s13 = sphi %s1380_s13, %s1573_s13  }
   0x4   : > { %p42_p1 = scmp.ge.s32.totalorder %s40_s7, 2  ;;  %p370_p2 = scmp.lt.s32.totalorder %s1315_s15, 3 }
   0x6   : > { %s1576_s7 = smov (%p42_p1, %s40_s7), 0  ;;  %p371_p3 = pnand %p1210_p0, %p370_p2 }
   0x7   : > { %p438_p4 = scmp.lt.s32.totalorder (!%p371_p3), %s1307_s13, 1  ;;  %s1318_s24 = smov (!%p371_p3), 104  }
   0x8   : > { %374 = sbr.rel (%p371_p3) target bundleno = 1455 (0x5af), region = 56  ;;  %s1319_s25 = smov (!%p371_p3), 112  }
   0x9   : > { %s1320_s26 = smov (!%p371_p3), 120  }
   0xd   : > { %s1578_s13 = smov (!%p438_p4, %s1307_s13), 1  ;;  %vm494_vm0 = vcmask 64512   ;;  %vm485_vm1 = vcmask 7168   ;;  %v1317_v3 = vmov -inf   ;;  %v502_v4 = vld [vmem:[%s1567_s4] sm:$0xf] }
   0xe   : > { %s1398_s8 = sshll.u32 %s1578_s13, 2  ;;  %486 = vst.msk [vmem:[#allocation2] sm:$0xff] %vm485_vm1, %v1317_v3  ;;  %v1417_v6 = vunpack.c.l.bf16 %v502_v4  ;;  %v1321_v15 = vmov 0   ;;  %v1322_v16 = vmov 0.0   ;;  %vm561_vm2 = vcmask 1043456  }
   0xf   : > { %s458_s18 = scalar_lea.vmem %s1565_s2, %s1398_s8  ;;  %s444_s21 = scalar_lea.vmem %s1563_s0, %s1398_s8  ;;  %487 = vst.msk [vmem:[#allocation2 + $0x8] sm:$0xff] %vm485_vm1, %v1317_v3  ;;  %1261 = vset.pattern.permute.xlu1 %v1321_v15  ;;  %1262 = vset.pattern.permute.xlu2 %v1321_v15 }
  0x10   : > { %v500_v0 = vld [vmem:[%s458_s18] sm:$0xf]  ;;  %488 = vst.msk [vmem:[#allocation2 + $0x10] sm:$0xff] %vm485_vm1, %v1317_v3  ;;  %1263 = vset.pattern.permute.xlu0 %v1321_v15  ;;  %s465_s29 = scalar_lea.vmem %s1566_s3, %s1398_s8  ;;  %s479_s28 = scalar_lea.vmem %s1572_s9, %s1398_s8 }
  0x11   : > { %v509_v1 = vsel %vm494_vm0, %v500_v0, 0  ;;  %v499_v2 = vld [vmem:[%s444_s21] sm:$0xf]  ;;  %489 = vst.msk [vmem:[#allocation2 + $0x18] sm:$0xff] %vm485_vm1, %v1317_v3  ;;  %v587_v5 = vunpack.c.l.b16 %v500_v0  ;;  %s451_s21 = scalar_lea.vmem %s1564_s1, %s1398_s8 }
  0x12   : > { %518 = vmatpush.bf16.xpose.msra.mxu0 %v509_v1  ;;  %v582_v13 = vunpack.c.l.b16 %v499_v2  ;;  %490 = vst.msk [vmem:[#allocation3] sm:$0xff] %vm485_vm1, %v1322_v16  ;;  %v501_v25 = vld [vmem:[%s465_s29] sm:$0xf] }
  0x13   : > { %v588_v9 = vpack.c.b16 %v587_v5, %v587_v5  ;;  %491 = vst.msk [vmem:[#allocation3 + $0x8] sm:$0xff] %vm485_vm1, %v1322_v16  ;;  %v563_v26 = vsel %vm561_vm2, %v501_v25, 0  ;;  %v647_v53 = vunpack.c.l.b16 %v501_v25 }
  0x14   : > { %v583_v14 = vpack.c.b16 %v582_v13, %v582_v13  ;;  %492 = vst.msk [vmem:[#allocation3 + $0x10] sm:$0xff] %vm485_vm1, %v1322_v16  ;;  %572 = vmatpush.bf16.msra.mxu1 %v563_v26 }
  0x15   : > { %758 = vrot.lane.b32.xlu2 %v588_v9, %s1318_s24  ;;  %493 = vst.msk [vmem:[#allocation3 + $0x18] sm:$0xff] %vm485_vm1, %v1322_v16  ;;  %v1433_v17 = vld [vmem:[#allocation2] sm:$0xff]  ;;  %v648_v55 = vpack.c.b16 %v647_v53, %v647_v53 }
  0x16   : > { %495 = vst.msk [vmem:[#allocation4] sm:$0xff] %vm494_vm0, %v1322_v16  ;;  %v1470_v56 = vld [vmem:[#allocation2 + $0x8] sm:$0xff] }
  0x17   : > { %496 = vst.msk [vmem:[#allocation4 + $0x8] sm:$0xff] %vm494_vm0, %v1322_v16  ;;  %v699_v0 = vld [vmem:[#allocation2 + $0x10] sm:$0xff] }
  0x18   : > { %497 = vst.msk [vmem:[#allocation4 + $0x10] sm:$0xff] %vm494_vm0, %v1322_v16  ;;  %v1472_v58 = vld [vmem:[#allocation2 + $0x18] sm:$0xff] }
  0x19   : > { %1216 = vmatmul.msk.bf16.vlgmr.msra.gmra.mxu0 %vm494_vm0, %v499_v2  ;;  %498 = vst.msk [vmem:[#allocation4 + $0x18] sm:$0xff] %vm494_vm0, %v1322_v16 }
  0x1c   : > { %v799_v53 = vld [vmem:[#allocation3 + $0x18] sm:$0xff] }
  0x1d   : > { %675 = vrot.lane.b32.xlu2 %v588_v9, %s1319_s25 }
  0x25   : > { %673 = vrot.lane.b32.xlu2 %v583_v14, %s1319_s25 }
  0x6f   : > { %v759_v23 = vpop.permute.xlu2 %758 }
  0x70   : > { %v764_v24 = vsel %vm494_vm0, %v759_v23, 0 }
  0x71   : > { %773 = vmatpush.bf16.xpose.msrb.mxu0 %v764_v24 }
  0x77   : > { %v676_v27 = vpop.permute.xlu2 %675 }
  0x78   : > { %v681_v28 = vsel %vm494_vm0, %v676_v27, 0 }
  0x79   : > { %690 = vmatpush.bf16.xpose.msrb.mxu1 %v681_v28 }
  0x7f   : > { %v674_v36 = vpop.permute.xlu2 %673 }
  0x96   : > { %v520_v7 = vpop.f32.mrf.mxu0 }
  0x97   : > { %v524_v8 = vmul.f32 0.35355338, %v520_v7 }
  0x99   : > { %v525_v10 = vadd.f32 %v524_v8, %v1417_v6 }
  0x9b   : > { %v527_v11 = vsel %vm494_vm0, %v525_v10, -inf }
  0x9c   : > { %528 = vmax.xlane.f32.xlu0 %v527_v11 }
  0x9e   : > { %v522_v12 = vpop.f32.mrf.mxu0 }
  0xb0   : > { %589 = vrot.lane.b32.xlu0 %v588_v9, %s1320_s26 }
 0x10f   : > { %v529_v18 = vpop.xlane.xlu0 %528 }
 0x110   : > { %v1436_v19 = vmax.f32 %v1433_v17, %v529_v18 }
 0x112   : > { %v531_v20 = vsub.f32 %v1433_v17, %v1436_v19  ;;  %580 = vst.msk [vmem:[#allocation2] sm:$0xff] %vm485_vm1, %v1436_v19  ;;  %536 = vperm.xlu1 %1261, %v1436_v19  }
 0x11a   : > { %584 = vrot.lane.b32.xlu1 %v583_v14, %s1320_s26 }
 0x122   : > { %756 = vrot.lane.b32.xlu1 %v583_v14, %s1318_s24  ;;  %v590_v21 = vpop.permute.xlu0 %589 }
 0x123   : > { %v595_v22 = vsel %vm494_vm0, %v590_v21, 0 }
 0x124   : > { %604 = vmatpush.bf16.xpose.msra.mxu2 %v595_v22 }
 0x184   : > { %v537_v29 = vpop.permute.xlu1 %536 }
 0x185   : > { %v539_v30 = vsub.f32 %v525_v10, %v537_v29 }
 0x187   : > { %v540_v31 = vmul.f32 1.442695, %v539_v30 }
 0x189   : > { %1265 = vpow2.f32 %v540_v31 }
 0x18c   : > { %v585_v32 = vpop.permute.xlu1 %584 }
 0x18d   : > { %1218 = vmatmul.msk.bf16.vlgmr.msra.gmra.mxu2 %vm494_vm0, %v585_v32  ;;  %v532_v32 = vmul.f32 1.442695, %v531_v20 }
 0x18f   : > { %v1266_v33 = vpop.eup %1265 }
 0x190   : > { %v557_v34 = vpack.c.bf16 %v1266_v33, %v1266_v33  ;;  %v544_v4 = vsel %vm494_vm0, %v1266_v33, 0.0 }
 0x192   : > { %1217 = vmatmul.msk.bf16.vlgmr.msra.gmra.mxu1 %vm494_vm0, %v557_v34  ;;  %v542_v34 = vld [vmem:[#allocation3] sm:$0xff] }
 0x194   : > { %v757_v35 = vpop.permute.xlu1 %756 }
 0x195   : > { %1222 = vmatmul.msk.bf16.vlgmr.msrb.gmra.mxu0 %vm494_vm0, %v757_v35 }
 0x1a2   : > { %1220 = vmatmul.msk.bf16.vlgmr.msrb.gmra.mxu1 %vm494_vm0, %v674_v36 }
 0x20f   : > { %v1457_v37 = vpop.f32.mrf.mxu1 }
 0x210   : > { %v606_v38 = vpop.f32.mrf.mxu2 }
 0x211   : > { %v610_v39 = vmul.f32 0.35355338, %v606_v38 }
 0x212   : > { %v775_v40 = vpop.f32.mrf.mxu0 }
 0x213   : > { %v779_v41 = vmul.f32 0.35355338, %v775_v40  ;;  %v611_v42 = vadd.f32 %v610_v39, %v1417_v6 }
 0x215   : > { %v614_v43 = vsel %vm494_vm0, %v611_v42, -inf  ;;  %v1462_v44 = vadd.f32 %v779_v41, %v1417_v6 }
 0x216   : > { %615 = vmax.xlane.f32.xlu1 %v614_v43 }
 0x217   : > { %v576_v45 = vpop.f32.mrf.mxu1  ;;  %v783_v46 = vsel %vm494_vm0, %v1462_v44, -inf }
 0x218   : > { %v608_v47 = vpop.f32.mrf.mxu2  ;;  %784 = vmax.xlane.f32.xlu2 %v783_v46  ;;  %v716_v46 = vld [vmem:[#allocation3 + $0x10] sm:$0xff] }
 0x21a   : > { %v777_v48 = vpop.f32.mrf.mxu0 }
 0x21f   : > { %v692_v49 = vpop.f32.mrf.mxu1 }
 0x220   : > { %v696_v50 = vmul.f32 0.35355338, %v692_v49 }
 0x222   : > { %v697_v51 = vadd.f32 %v696_v50, %v1417_v6 }
 0x224   : > { %v700_v52 = vsel %vm494_vm0, %v697_v51, -inf }
 0x225   : > { %701 = vmax.xlane.f32.xlu0 %v700_v52 }
 0x227   : > { %v694_v54 = vpop.f32.mrf.mxu1 }
 0x22f   : > { %649 = vrot.lane.b32.xlu1 %v648_v55, %s1320_s26 }
 0x237   : > { %815 = vrot.lane.b32.xlu1 %v648_v55, %s1318_s24  ;;  %s1055_s24 = sld [smem:[#allocation5]] }
 0x289   : > { %v616_v57 = vpop.xlane.xlu1 %615 }
 0x28a   : > { %v1475_v59 = vmax.f32 %v1470_v56, %v616_v57 }
 0x28b   : > { %v785_v60 = vpop.xlane.xlu2 %784 }
 0x28c   : > { %v618_v61 = vsub.f32 %v1470_v56, %v1475_v59  ;;  %672 = vst.msk [vmem:[#allocation2 + $0x8] sm:$0xff] %vm485_vm1, %v1475_v59  ;;  %v1482_v62 = vmax.f32 %v1472_v58, %v785_v60  ;;  %623 = vperm.xlu2 %1262, %v1475_v59  }
 0x28e   : > { %v787_v63 = vsub.f32 %v1472_v58, %v1482_v62  ;;  %838 = vst.msk [vmem:[#allocation2 + $0x18] sm:$0xff] %vm485_vm1, %v1482_v62  ;;  %792 = vperm.xlu0 %1263, %v1482_v62   ;;  %v619_v40 = vmul.f32 1.442695, %v618_v61 }
 0x290   : > { %v788_v47 = vmul.f32 1.442695, %v787_v63 }
 0x298   : > { %v702_v1 = vpop.xlane.xlu0 %701 }
 0x299   : > { %v703_v2 = vmax.f32 %v699_v0, %v702_v1 }
 0x29b   : > { %v704_v3 = vsub.f32 %v699_v0, %v703_v2  ;;  %755 = vst.msk [vmem:[#allocation2 + $0x10] sm:$0xff] %vm485_vm1, %v703_v2  ;;  %709 = vperm.xlu2 %1262, %v703_v2   ;;  %v842_v0 = vld [vmem:[%s1568_s5] sm:$0xf] }
 0x29c   : > { %v880_v1 = vsel %vm561_vm2, %v842_v0, 0 }
 0x29d   : > { %v705_v45 = vmul.f32 1.442695, %v704_v3  ;;  %889 = vmatpush.bf16.msra.mxu1 %v880_v1  ;;  %v843_v3 = vld [vmem:[%s1568_s5 + $0x4] sm:$0xf] }
 0x2a1   : > { %v650_v5 = vpop.permute.xlu1 %649 }
 0x2a2   : > { %v655_v6 = vsel %vm561_vm2, %v650_v5, 0  ;;  %v550_v5 = vld [vmem:[#allocation4] sm:$0xff] }
 0x2a3   : > { %732 = vrot.lane.b32.xlu2 %v648_v55, %s1319_s25  ;;  %664 = vmatpush.bf16.msra.mxu3 %v655_v6  ;;  %s1058_s25 = sld [smem:[#allocation6]] }
 0x2a9   : > { %v816_v7 = vpop.permute.xlu1 %815 }
 0x2aa   : > { %v821_v9 = vsel %vm561_vm2, %v816_v7, 0 }
 0x2ab   : > { %830 = vmatpush.bf16.msrb.mxu2 %v821_v9 }
 0x2cc   : > { %545 = vadd.xlane.f32.xlu2 %v544_v4  ;;  %v923_v4 = vsel %vm561_vm2, %v843_v3, 0 }
 0x2e6   : > { %v624_v8 = vpop.permute.xlu2 %623 }
 0x2e7   : > { %v626_v10 = vsub.f32 %v611_v42, %v624_v8  ;;  %v630_v42 = vld [vmem:[#allocation3 + $0x8] sm:$0xff] }
 0x2e9   : > { %v627_v11 = vmul.f32 1.442695, %v626_v10 }
 0x2eb   : > { %1267 = vpow2.f32 %v627_v11 }
 0x2f1   : > { %v1268_v12 = vpop.eup %1267 }
 0x2f2   : > { %v632_v13 = vsel %vm494_vm0, %v1268_v12, 0.0  ;;  %v645_v14 = vpack.c.bf16 %v1268_v12, %v1268_v12 }
 0x2f3   : > { %633 = vadd.xlane.f32.xlu1 %v632_v13 }
 0x2f4   : > { %1219 = vmatmul.msk.bf16.vlgmr.msra.gmra.mxu3 %vm494_vm0, %v645_v14 }
 0x2f5   : > { %v710_v15 = vpop.permute.xlu2 %709 }
 0x2f6   : > { %v712_v16 = vsub.f32 %v697_v51, %v710_v15 }
 0x2f8   : > { %v713_v18 = vmul.f32 1.442695, %v712_v16 }
 0x2fa   : > { %1269 = vpow2.f32 %v713_v18 }
 0x2fd   : > { %v733_v21 = vpop.permute.xlu2 %732 }
 0x2fe   : > { %v738_v22 = vsel %vm561_vm2, %v733_v21, 0 }
 0x2ff   : > { %747 = vmatpush.bf16.msrb.mxu3 %v738_v22 }
 0x300   : > { %v1270_v23 = vpop.eup %1269  ;;  %v793_v24 = vpop.permute.xlu0 %792 }
 0x301   : > { %v795_v25 = vsub.f32 %v1462_v44, %v793_v24  ;;  %v718_v26 = vsel %vm494_vm0, %v1270_v23, 0.0  ;;  %v731_v27 = vpack.c.bf16 %v1270_v23, %v1270_v23  ;;  %v638_v24 = vld [vmem:[#allocation4 + $0x8] sm:$0xff] }
 0x302   : > { %719 = vadd.xlane.f32.xlu1 %v718_v26 }
 0x303   : > { %v796_v28 = vmul.f32 1.442695, %v795_v25  ;;  %932 = vmatpush.bf16.msra.mxu3 %v923_v4 }
 0x304   : > { %1221 = vmatmul.msk.bf16.vlgmr.msrb.gmra.mxu3 %vm494_vm0, %v731_v27 }
 0x305   : > { %1271 = vpow2.f32 %v796_v28 }
 0x306   : > { %1273 = vpow2.f32 %v532_v32 }
 0x307   : > { %1275 = vpow2.f32 %v619_v40 }
 0x308   : > { %1277 = vpow2.f32 %v705_v45 }
 0x309   : > { %1279 = vpow2.f32 %v788_v47 }
 0x30b   : > { %v1272_v29 = vpop.eup %1271 }
 0x30c   : > { %v801_v30 = vsel %vm494_vm0, %v1272_v29, 0.0  ;;  %v814_v31 = vpack.c.bf16 %v1272_v29, %v1272_v29  ;;  %v1274_v33 = vpop.eup %1273 }
 0x30d   : > { %802 = vadd.xlane.f32.xlu0 %v801_v30  ;;  %v543_v35 = vmul.f32 %v1274_v33, %v542_v34  ;;  %v1276_v41 = vpop.eup %1275 }
 0x30e   : > { %1223 = vmatmul.msk.bf16.vlgmr.msrb.gmra.mxu2 %vm494_vm0, %v814_v31  ;;  %v631_v43 = vmul.f32 %v1276_v41, %v630_v42  ;;  %v1278_v20 = vpop.eup %1277 }
 0x30f   : > { %v717_v48 = vmul.f32 %v1278_v20, %v716_v46  ;;  %v1280_v52 = vpop.eup %1279  ;;  %v844_v46 = vld [vmem:[%s1568_s5 + $0x8] sm:$0xf] }
 0x310   : > { %v800_v55 = vmul.f32 %v1280_v52, %v799_v53  ;;  %v966_v47 = vsel %vm561_vm2, %v844_v46, 0 }
 0x311   : > { %975 = vmatpush.bf16.msra.mxu0 %v966_v47 }
 0x33f   : > { %v546_v36 = vpop.xlane.xlu2 %545 }
 0x340   : > { %v547_v38 = vadd.f32 %v546_v36, %v543_v35  ;;  %v807_v35 = vld [vmem:[#allocation4 + $0x18] sm:$0xff] }
 0x342   : > { %549 = vst.msk [vmem:[#allocation3] sm:$0xff] %vm485_vm1, %v547_v38 }
 0x349   : > { %v854_v39 = vld [vmem:[#allocation3] sm:$0xff] }
 0x34a   : > { %857 = vperm.xlu1 %1261, %v854_v39  }
 0x352   : > { %553 = vperm.xlu1 %1261, %v1274_v33  }
 0x366   : > { %v634_v44 = vpop.xlane.xlu1 %633 }
 0x367   : > { %v635_v17 = vadd.f32 %v634_v44, %v631_v43 }
 0x369   : > { %636 = vst.msk [vmem:[#allocation3 + $0x8] sm:$0xff] %vm485_vm1, %v635_v17 }
 0x370   : > { %v897_v19 = vld [vmem:[#allocation3 + $0x8] sm:$0xff] }
 0x371   : > { %900 = vperm.xlu2 %1262, %v897_v19   ;;  %v845_v19 = vld [vmem:[%s1568_s5 + $0xc] sm:$0xf] }
 0x375   : > { %v720_v49 = vpop.xlane.xlu1 %719 }
 0x376   : > { %v721_v50 = vadd.f32 %v720_v49, %v717_v48 }
 0x377   : > { %v666_v51 = vpop.f32.mrf.mxu3 }
 0x378   : > { %722 = vst.msk [vmem:[#allocation3 + $0x10] sm:$0xff] %vm485_vm1, %v721_v50 }
 0x379   : > { %641 = vperm.xlu2 %1262, %v1276_v41  }
 0x37f   : > { %v668_v54 = vpop.f32.mrf.mxu3  ;;  %v940_v62 = vld [vmem:[#allocation3 + $0x10] sm:$0xff] }
 0x380   : > { %v803_v56 = vpop.xlane.xlu0 %802 }
 0x381   : > { %v804_v57 = vadd.f32 %v803_v56, %v800_v55  ;;  %810 = vperm.xlu2 %1262, %v1280_v52  }
 0x383   : > { %805 = vst.msk [vmem:[#allocation3 + $0x18] sm:$0xff] %vm485_vm1, %v804_v57  ;;  %v724_v57 = vld [vmem:[#allocation4 + $0x10] sm:$0xff] }
 0x387   : > { %v1513_v59 = vpop.f32.mrf.mxu3 }
 0x38a   : > { %v983_v58 = vld [vmem:[#allocation3 + $0x18] sm:$0xff] }
 0x38b   : > { %986 = vperm.xlu0 %1263, %v983_v58  }
 0x38f   : > { %v751_v60 = vpop.f32.mrf.mxu3 }
 0x391   : > { %v832_v61 = vpop.f32.mrf.mxu2 }
 0x393   : > { %943 = vperm.xlu0 %1263, %v940_v62  }
 0x399   : > { %v834_v63 = vpop.f32.mrf.mxu2 }
 0x39b   : > { %727 = vperm.xlu0 %1263, %v1278_v20   ;;  %v1009_v20 = vsel %vm561_vm2, %v845_v19, 0 }
 0x39c   : > { %1018 = vmatpush.bf16.msra.mxu2 %v1009_v20 }
 0x3bc   : > { %v858_v2 = vpop.permute.xlu1 %857 }
 0x3bd   : > { %1281 = vrcp.f32 %v858_v2  ;;  %v871_v14 = vand.u32 2147483648, %v858_v2  ;;  %vm865_vm4 = vweird.f32 %v858_v2  ;;  %v869_v15 = vand.u32 2147483647, %v858_v2 }
 0x3bf   : > { %v872_v21 = vor.u32 1.1754944e-38, %v871_v14  ;;  %vm870_vm6 = vcmp.eq.f32.partialorder %v869_v15, 8.507059e+37 }
 0x3c3   : > { %v1282_v6 = vpop.eup %1281 }
 0x3c4   : > { %v861_v7 = vmul.f32 %v1282_v6, %v858_v2  ;;  %v554_v8 = vpop.permute.xlu1 %553  ;;  %vm866_vm3 = vweird.f32 %v1282_v6 }
 0x3c5   : > { %v556_v9 = vmul.f32 %v554_v8, %v550_v5  ;;  %vm867_vm5 = vmor %vm865_vm4, %vm866_vm3 }
 0x3c6   : > { %v862_v10 = vsub.f32 1.0, %v861_v7 }
 0x3c7   : > { %v578_v11 = vadd.f32 %v1457_v37, %v556_v9 }
 0x3c8   : > { %v863_v12 = vmul.f32 %v1282_v6, %v862_v10 }
 0x3c9   : > { %579 = vst.msk [vmem:[#allocation4] sm:$0xff] %vm494_vm0, %v578_v11 }
 0x3ca   : > { %v864_v13 = vadd.f32 %v1282_v6, %v863_v12 }
 0x3cb   : > { %v901_v16 = vpop.permute.xlu2 %900 }
 0x3cc   : > { %1283 = vrcp.f32 %v901_v16  ;;  %v868_v18 = vsel %vm867_vm5, %v1282_v6, %v864_v13  ;;  %v914_v34 = vand.u32 2147483648, %v901_v16  ;;  %vm908_vm8 = vweird.f32 %v901_v16 }
 0x3cd   : > { %v873_v22 = vsel %vm870_vm6, %v872_v21, %v868_v18  ;;  %v912_v36 = vand.u32 2147483647, %v901_v16 }
 0x3ce   : > { %v915_v41 = vor.u32 1.1754944e-38, %v914_v34 }
 0x3cf   : > { %vm913_vm10 = vcmp.eq.f32.partialorder %v912_v36, 8.507059e+37 }
 0x3d0   : > { %v853_v23 = vld [vmem:[#allocation4] sm:$0xff] }
 0x3d1   : > { %v874_v25 = vmul.f32 %v873_v22, %v853_v23  ;;  %v846_v23 = vld [vmem:[%s451_s21] sm:$0xf] }
 0x3d2   : > { %v1284_v26 = vpop.eup %1283 }
 0x3d3   : > { %v904_v37 = vmul.f32 %v1284_v26, %v901_v16  ;;  %v642_v27 = vpop.permute.xlu2 %641  ;;  %v875_v28 = vpack.c.bf16 %v874_v25, %v874_v25  ;;  %vm909_vm7 = vweird.f32 %v1284_v26  ;;  %v1264_v25 = vld [vmem:[%s1569_s6] ss:$0 sm:$0xff] }
 0x3d4   : > { %v644_v29 = vmul.f32 %v642_v27, %v638_v24  ;;  %vm910_vm9 = vmor %vm908_vm8, %vm909_vm7  ;;  %v847_v24 = vunpack.c.l.bf16 %v846_v23  ;;  %vm1062_vm8 = vcmask 257024  }
 0x3d5   : > { %v905_v30 = vsub.f32 1.0, %v904_v37  ;;  %1224 = vmatmul.msk.bf16.vlgmr.msra.gmra.mxu1 %vm494_vm0, %v875_v28 }
 0x3d6   : > { %v670_v31 = vadd.f32 %v666_v51, %v644_v29 }
 0x3d7   : > { %v906_v32 = vmul.f32 %v1284_v26, %v905_v30 }
 0x3d8   : > { %671 = vst.msk [vmem:[#allocation4 + $0x8] sm:$0xff] %vm494_vm0, %v670_v31 }
 0x3d9   : > { %v907_v33 = vadd.f32 %v1284_v26, %v906_v32 }
 0x3db   : > { %v811_v38 = vpop.permute.xlu2 %810  ;;  %v911_v39 = vsel %vm910_vm9, %v1284_v26, %v907_v33  ;;  %v852_v26 = vadd.f32 %v1264_v25, %v847_v24 }
 0x3dc   : > { %v813_v40 = vmul.f32 %v811_v38, %v807_v35  ;;  %v916_v43 = vsel %vm913_vm10, %v915_v41, %v911_v39  ;;  %v1323_v35 = vmov 32.0  }
 0x3de   : > { %v836_v42 = vadd.f32 %v832_v61, %v813_v40 }
 0x3df   : > { %v896_v44 = vld [vmem:[#allocation4 + $0x8] sm:$0xff] }
 0x3e0   : > { %837 = vst.msk [vmem:[#allocation4 + $0x18] sm:$0xff] %vm494_vm0, %v836_v42  ;;  %v917_v45 = vmul.f32 %v916_v43, %v896_v44 }
 0x3e2   : > { %v918_v17 = vpack.c.bf16 %v917_v45, %v917_v45 }
 0x3e4   : > { %1225 = vmatmul.msk.bf16.vlgmr.msra.gmra.mxu3 %vm494_vm0, %v918_v17 }
 0x3e7   : > { %v982_v0 = vld [vmem:[#allocation4 + $0x18] sm:$0xff] }
 0x3fd   : > { %v987_v48 = vpop.permute.xlu0 %986 }
 0x3fe   : > { %1285 = vrcp.f32 %v987_v48  ;;  %v1000_v53 = vand.u32 2147483648, %v987_v48  ;;  %v998_v55 = vand.u32 2147483647, %v987_v48  ;;  %vm994_vm12 = vweird.f32 %v987_v48 }
 0x400   : > { %v1001_v60 = vor.u32 1.1754944e-38, %v1000_v53  ;;  %vm999_vm14 = vcmp.eq.f32.partialorder %v998_v55, 8.507059e+37 }
 0x404   : > { %v1286_v49 = vpop.eup %1285 }
 0x405   : > { %v990_v50 = vmul.f32 %v1286_v49, %v987_v48  ;;  %v944_v51 = vpop.permute.xlu0 %943  ;;  %vm995_vm11 = vweird.f32 %v1286_v49 }
 0x406   : > { %1287 = vrcp.f32 %v944_v51  ;;  %vm996_vm13 = vmor %vm994_vm12, %vm995_vm11  ;;  %v957_v9 = vand.u32 2147483648, %v944_v51  ;;  %vm951_vm1 = vweird.f32 %v944_v51  ;;  %v955_v10 = vand.u32 2147483647, %v944_v51 }
 0x407   : > { %v991_v52 = vsub.f32 1.0, %v990_v50  ;;  %1289 = vrcp.f32 %v1323_v35 }
 0x408   : > { %v958_v12 = vor.u32 1.1754944e-38, %v957_v9  ;;  %vm956_vm3 = vcmp.eq.f32.partialorder %v955_v10, 8.507059e+37 }
 0x409   : > { %v992_v54 = vmul.f32 %v1286_v49, %v991_v52 }
 0x40b   : > { %v993_v56 = vadd.f32 %v1286_v49, %v992_v54  ;;  %v1056_v54 = vstv %s1055_s24 }
 0x40c   : > { %v1288_v58 = vpop.eup %1287 }
 0x40d   : > { %v997_v61 = vsel %vm996_vm13, %v1286_v49, %v993_v56  ;;  %v947_v62 = vmul.f32 %v1288_v58, %v944_v51  ;;  %v728_v63 = vpop.permute.xlu0 %727  ;;  %vm952_vm15 = vweird.f32 %v1288_v58  ;;  %v1290_v36 = vpop.eup %1289 }
 0x40e   : > { %v1002_v1 = vsel %vm999_vm14, %v1001_v60, %v997_v61  ;;  %v730_v2 = vmul.f32 %v728_v63, %v724_v57  ;;  %vm953_vm2 = vmor %vm951_vm1, %vm952_vm15  ;;  %v1030_v38 = vmul.f32 32.0, %v1290_v36  ;;  %vm1034_vm4 = vweird.f32 %v1290_v36 }
 0x40f   : > { %v1003_v3 = vmul.f32 %v1002_v1, %v982_v0  ;;  %v948_v4 = vsub.f32 1.0, %v947_v62  ;;  %v1059_v57 = vstv %s1058_s25 }
 0x410   : > { %v753_v5 = vadd.f32 %v1513_v59, %v730_v2  ;;  %v1031_v39 = vsub.f32 1.0, %v1030_v38 }
 0x411   : > { %v949_v6 = vmul.f32 %v1288_v58, %v948_v4  ;;  %v1004_v7 = vpack.c.bf16 %v1003_v3, %v1003_v3 }
 0x412   : > { %754 = vst.msk [vmem:[#allocation4 + $0x10] sm:$0xff] %vm494_vm0, %v753_v5  ;;  %v1032_v40 = vmul.f32 %v1290_v36, %v1031_v39 }
 0x413   : > { %v950_v8 = vadd.f32 %v1288_v58, %v949_v6  ;;  %1227 = vmatmul.msk.bf16.vlgmr.msra.gmra.mxu2 %vm494_vm0, %v1004_v7 }
 0x414   : > { %v1033_v41 = vadd.f32 %v1290_v36, %v1032_v40 }
 0x415   : > { %v954_v11 = vsel %vm953_vm2, %v1288_v58, %v950_v8 }
 0x416   : > { %v959_v13 = vsel %vm956_vm3, %v958_v12, %v954_v11  ;;  %v1035_v42 = vsel %vm1034_vm4, %v1290_v36, %v1033_v41 }
 0x419   : > { %v939_v14 = vld [vmem:[#allocation4 + $0x10] sm:$0xff] }
 0x41a   : > { %v960_v15 = vmul.f32 %v959_v13, %v939_v14 }
 0x41c   : > { %v961_v59 = vpack.c.bf16 %v960_v15, %v960_v15 }
 0x41e   : > { %1226 = vmatmul.msk.bf16.vlgmr.msra.gmra.mxu0 %vm494_vm0, %v961_v59  ;;  %vm1025_vm0 = vcmask 261120  }
 0x452   : > { %v891_v16 = vpop.f32.mrf.mxu1 }
 0x453   : > { %v895_v27 = vadd.f32 %v891_v16, %v852_v26 }
 0x45a   : > { %v893_v18 = vpop.f32.mrf.mxu1 }
 0x467   : > { %v934_v21 = vpop.f32.mrf.mxu3 }
 0x468   : > { %v938_v28 = vadd.f32 %v934_v21, %v895_v27 }
 0x46f   : > { %v936_v22 = vpop.f32.mrf.mxu3 }
 0x496   : > { %v1020_v37 = vpop.f32.mrf.mxu2 }
 0x49b   : > { %v977_v29 = vpop.f32.mrf.mxu0 }
 0x49c   : > { %v981_v30 = vadd.f32 %v977_v29, %v938_v28 }
 0x49e   : > { %v1022_v31 = vpop.f32.mrf.mxu2  ;;  %v1024_v32 = vadd.f32 %v1020_v37, %v981_v30 }
 0x4a0   : > { %v1026_v33 = vsel %vm1025_vm0, %v1024_v32, 0.0 }
 0x4a1   : > { %1027 = vadd.xlane.f32.xlu1 %v1026_v33 }
 0x4a3   : > { %v979_v34 = vpop.f32.mrf.mxu0 }
 0x514   : > { %v1028_v43 = vpop.xlane.xlu1 %1027 }
 0x515   : > { %v1036_v44 = vmul.f32 %v1035_v42, %v1028_v43 }
 0x517   : > { %v1037_v45 = vsub.f32 %v1024_v32, %v1036_v44 }
 0x519   : > { %v1038_v17 = vmul.f32 %v1037_v45, %v1037_v45 }
 0x51b   : > { %v1039_v19 = vsel %vm1025_vm0, %v1038_v17, 0.0 }
 0x51c   : > { %1040 = vadd.xlane.f32.xlu2 %v1039_v19 }
 0x58f   : > { %v1041_v20 = vpop.xlane.xlu2 %1040 }
 0x590   : > { %v1042_v46 = vmul.f32 %v1041_v20, %v1035_v42 }
 0x592   : > { %v1043_v47 = vadd.f32 1e-06, %v1042_v46 }
 0x594   : > { %1291 = vrsqrt.f32 %v1043_v47  ;;  %vm1050_vm6 = vweird.f32 %v1043_v47 }
 0x59a   : > { %v1292_v48 = vpop.eup %1291 }
 0x59b   : > { %v1045_v49 = vmul.f32 %v1292_v48, %v1043_v47  ;;  %vm1051_vm5 = vweird.f32 %v1292_v48 }
 0x59c   : > { %vm1052_vm7 = vmor %vm1050_vm6, %vm1051_vm5 }
 0x59d   : > { %v1046_v50 = vmul.f32 %v1292_v48, %v1045_v49 }
 0x59f   : > { %v1047_v51 = vmul.f32 0.5, %v1046_v50 }
 0x5a1   : > { %v1048_v52 = vsub.f32 1.5, %v1047_v51 }
 0x5a3   : > { %v1049_v53 = vmul.f32 %v1292_v48, %v1048_v52 }
 0x5a5   : > { %v1053_v55 = vsel %vm1052_vm7, %v1292_v48, %v1049_v53 }
 0x5a6   : > { %v1054_v56 = vmul.f32 %v1053_v55, %v1037_v45 }
 0x5a8   : > { %v1057_v58 = vmul.f32 %v1056_v54, %v1054_v56 }
 0x5aa   : > { %v1060_v60 = vadd.f32 %v1059_v57, %v1057_v58 }
 0x5ac   : > { %v1061_v61 = vpack.c.bf16 %v1060_v60, %v1060_v60 }
 0x5ae   : > { %1063 = vst.msk [vmem:[%s479_s28] sm:$0xf] %vm1062_vm8, %v1061_v61 }
 0x5af PF: > { %s21_s15 = sadd.s32 1, %s1315_s15   ;;  %s1573_s13 = smov %s1311_s14 }
 0x5b0   : > { %p18_p5 = scmp.ge.s32.totalorder %s21_s15, 4   ;;  %s1574_s14 = smov %s1576_s7 }
 0x5b2   :  { %20 = sbr.rel (!%p18_p5) target bundleno = 3 (0x3), region = 115 }

// kernel: transformer_decoder_block.8
= control target key start
LH: loop header
LB: loop body
LE: loop exit
PB: predicated region body
PF: predicated region fallthrough
CT: control target
= control target key end

     0   :  { %s1610_s0 = inlined_call_operand.vmem [shape: bf16[2,8,32], index: 0, kind: input, shape index: {}]   ;;  %s1611_s1 = inlined_call_operand.vmem [shape: bf16[32,32], index: 1, kind: input, shape index: {}]   ;;  %s1612_s2 = inlined_call_operand.vmem [shape: f32[1,32], index: 2, kind: input, shape index: {}]   ;;  %s1613_s3 = inlined_call_operand.vmem [shape: bf16[2,8,32], index: 3, kind: input, shape index: {}]   ;;  %s1614_s4 = inlined_call_operand.vmem [shape: bf16[2,8,32], index: 4, kind: input, shape index: {}]   ;;  %s1615_s5 = inlined_call_operand.hbm [shape: bf16[32,32], index: 5, kind: input, shape index: {}]   ;;  %s1616_s6 = inlined_call_operand.vmem [shape: f32[1,32], index: 6, kind: input, shape index: {}]   ;;  %s1617_s7 = inlined_call_operand.<no memory space> [shape: f32[1], index: 7, kind: input, shape index: {}]   ;;  %s1618_s8 = inlined_call_operand.<no memory space> [shape: f32[1], index: 8, kind: input, shape index: {}]   ;;  %s1619_s9 = inlined_call_operand.vmem [shape: bf16[2,8,32], index: 9, kind: output, shape index: {}]  }
   0x1   :  { %14 = sst [smem:[#allocation6]] %s1617_s7 }
   0x2   :  { %15 = sst [smem:[#allocation7]] %s1618_s8 }
   0x3   :  { %16 = vsyncpa [#allocation9], 0  ;;  %s1417_s13 = smov 0   ;;  %s1419_s14 = smov 0  }
   0x4   :  { %s1421_s15 = smov 0  }
   0x5 LB: > { %s1180_s7 = sadd.s32 4294967295, %s1349_s15   ;;  %s41_s8 = sadd.s32 1, %s1345_s14  ;;  %s1349_s15 = sphi %s1421_s15, %s22_s15   ;;  %s1345_s14 = sphi %s1419_s14, %s1621_s14   ;;  %s1341_s13 = sphi %s1417_s13, %s1620_s13  }
   0x6   : > { %p43_p0 = scmp.ge.s32.totalorder %s41_s8, 2  ;;  %p1182_p1 = scmp.ge.s32.totalorder %s1349_s15, 1 }
   0x7   : > { %p284_p2 = scmp.lt.s32.totalorder %s1349_s15, 3  ;;  %p1224_p4 = scmp.eq.s32.totalorder %s1180_s7, 0 }
   0x8   : > { %s1623_s8 = smov (%p43_p0, %s41_s8), 0  ;;  %s301_s18 = sshll.u32 %s1615_s5, 4  ;;  %s302_s18 = int_to_ptr.hbm [resolvable:$true] %s301_s18 }
   0x9   : > { %p285_p3 = pnand %p1182_p1, %p284_p2  ;;  %s1351_s19 = smov [#allocation8]  }
   0xa   : > { %s303_s20 = sshll.u32 %s1351_s19, 4  ;;  %s1352_s21 = smov 64   ;;  %s304_s20 = int_to_ptr.vmem [resolvable:$true] %s303_s20 }
   0xb   : > { %p1220_p5 = pneg %p285_p3  ;;  %s1353_s22 = smov 4  }
   0xc   : > { %358 = sbr.rel (%p285_p3) target bundleno = 1348 (0x544), region = 56 }
   0xd   : > { %p1221_p6 = pnand %p1224_p4, %p1220_p5 }
   0xf   : > { %1223 = dma.hbm_to_vmem [thread:$0]  (!%p1221_p6), %s302_s18, 256, %s304_s20, [#allocation9], %s1352_s21, %s1352_s21, %s1353_s22  }
  0x11   : > { %1336 = dma.done.wait (%p1224_p4), [#allocation9], 256  }
  0x12   : > { %1338 = vsyncadd (%p1224_p4), [#allocation9], 4294967040  ;;  %p413_p7 = scmp.lt.s32.totalorder %s1341_s13, 1  ;;  %v1215_v0 = vld [vmem:[%s1611_s1 + $0x8] sm:$0xff]  ;;  %v1214_v1 = vld [vmem:[%s1611_s1] sm:$0xff]  ;;  %vm481_vm0 = vcmask 261120  }
  0x13   : > { %491 = vmatpush.bf16.msra.mxu0 %v1215_v0  ;;  %vm455_vm1 = vcmask 64512   ;;  %s1355_s7 = smov 104   ;;  %s1356_s16 = smov 120   ;;  %v1263_v7 = vld [vmem:[%s1612_s2] ss:$0 sm:$0xff]  ;;  %vm499_vm2 = vcmask 257024  }
  0x14   : > { %s1625_s13 = smov (!%p413_p7, %s1341_s13), 1  ;;  %vm446_vm3 = vcmask 7168   ;;  %v1357_v28 = vmov -inf   ;;  %v1358_v29 = vmov 0   ;;  %v1359_v30 = vmov 0.0   ;;  %s1051_s24 = sld [smem:[#allocation6]] }
  0x15   : > { %s1442_s25 = sshll.u32 %s1625_s13, 2  ;;  %s1354_s13 = smov 112   ;;  %447 = vst.msk [vmem:[#allocation2] sm:$0xff] %vm446_vm3, %v1357_v28  ;;  %1260 = vset.pattern.permute.xlu0 %v1358_v29  ;;  %1262 = vset.pattern.permute.xlu2 %v1358_v29  ;;  %vm560_vm4 = vcmask 1043456  }
  0x16   : > { %s1451_s30 = scalar_lea.vmem %s1610_s0, %s1442_s25  ;;  %s426_s12 = scalar_lea.vmem %s1613_s3, %s1442_s25  ;;  %448 = vst.msk [vmem:[#allocation2 + $0x8] sm:$0xff] %vm446_vm3, %v1357_v28  ;;  %1261 = vset.pattern.permute.xlu1 %v1358_v29 }
  0x17   : > { %492 = vmatpush.bf16.msra.mxu0 %v1214_v1  ;;  %v460_v2 = vld [vmem:[%s1451_s30] sm:$0xf]  ;;  %449 = vst.msk [vmem:[#allocation2 + $0x10] sm:$0xff] %vm446_vm3, %v1357_v28  ;;  %s433_s21 = scalar_lea.vmem %s1614_s4, %s1442_s25  ;;  %s1054_s26 = sld [smem:[#allocation7]] }
  0x18   : > { %v502_v3 = vld [vmem:[%s426_s12] sm:$0xf]  ;;  %450 = vst.msk [vmem:[#allocation2 + $0x18] sm:$0xff] %vm446_vm3, %v1357_v28  ;;  %s440_s29 = scalar_lea.vmem %s1619_s9, %s1442_s25 }
  0x19   : > { %v509_v4 = vsel %vm455_vm1, %v502_v3, 0  ;;  %v586_v5 = vunpack.c.l.b16 %v502_v3  ;;  %451 = vst.msk [vmem:[#allocation3] sm:$0xff] %vm446_vm3, %v1359_v30  ;;  %v503_v47 = vld [vmem:[%s433_s21] sm:$0xf] }
  0x1a   : > { %1199 = vmatmul.msk.bf16.vlgmr.msra.gmra.mxu0 %vm481_vm0, %v460_v2  ;;  %518 = vmatpush.bf16.xpose.msra.mxu1 %v509_v4  ;;  %452 = vst.msk [vmem:[#allocation3 + $0x8] sm:$0xff] %vm446_vm3, %v1359_v30  ;;  %v645_v48 = vunpack.c.l.b16 %v503_v47  ;;  %v562_v53 = vsel %vm560_vm4, %v503_v47, 0 }
  0x1b   : > { %v587_v6 = vpack.c.b16 %v586_v5, %v586_v5  ;;  %453 = vst.msk [vmem:[#allocation3 + $0x10] sm:$0xff] %vm446_vm3, %v1359_v30  ;;  %571 = vmatpush.bf16.msra.mxu2 %v562_v53 }
  0x1c   : > { %454 = vst.msk [vmem:[#allocation3 + $0x18] sm:$0xff] %vm446_vm3, %v1359_v30  ;;  %v1497_v35 = vld [vmem:[#allocation2] sm:$0xff]  ;;  %v646_v49 = vpack.c.b16 %v645_v48, %v645_v48 }
  0x1d   : > { %673 = vrot.lane.b32.xlu2 %v587_v6, %s1354_s13  ;;  %755 = vrot.lane.b32.xlu1 %v587_v6, %s1355_s7  ;;  %456 = vst.msk [vmem:[#allocation4] sm:$0xff] %vm455_vm1, %v1359_v30  ;;  %v1524_v58 = vld [vmem:[#allocation2 + $0x8] sm:$0xff] }
  0x1e   : > { %588 = vrot.lane.b32.xlu0 %v587_v6, %s1356_s16  ;;  %457 = vst.msk [vmem:[#allocation4 + $0x8] sm:$0xff] %vm455_vm1, %v1359_v30  ;;  %v696_v50 = vld [vmem:[#allocation2 + $0x10] sm:$0xff] }
  0x1f   : > { %458 = vst.msk [vmem:[#allocation4 + $0x10] sm:$0xff] %vm455_vm1, %v1359_v30  ;;  %v1535_v0 = vld [vmem:[#allocation2 + $0x18] sm:$0xff] }
  0x20   : > { %459 = vst.msk [vmem:[#allocation4 + $0x18] sm:$0xff] %vm455_vm1, %v1359_v30 }
  0x77   : > { %v674_v15 = vpop.permute.xlu2 %673 }
  0x78   : > { %v679_v16 = vsel %vm455_vm1, %v674_v15, 0 }
  0x79   : > { %688 = vmatpush.bf16.xpose.msrb.mxu0 %v679_v16 }
  0x8f   : > { %v756_v19 = vpop.permute.xlu1 %755 }
  0x90   : > { %v589_v17 = vpop.permute.xlu0 %588  ;;  %v761_v20 = vsel %vm455_vm1, %v756_v19, 0 }
  0x91   : > { %v594_v18 = vsel %vm455_vm1, %v589_v17, 0 }
  0x92   : > { %603 = vmatpush.bf16.xpose.msra.mxu3 %v594_v18 }
  0x97   : > { %v494_v8 = vpop.f32.mrf.mxu0 }
  0x98   : > { %v495_v9 = vadd.f32 %v1263_v7, %v494_v8 }
  0x9a   : > { %v498_v10 = vpack.c.bf16 %v495_v9, %v495_v9  ;;  %770 = vmatpush.bf16.xpose.msrb.mxu3 %v761_v20 }
  0x9c   : > { %500 = vst.msk [vmem:[#allocation5] sm:$0xf] %vm499_vm2, %v498_v10 }
  0x9f   : > { %v496_v11 = vpop.f32.mrf.mxu0 }
  0xa3   : > { %v501_v12 = vld [vmem:[#allocation5] sm:$0xf] }
  0xa4   : > { %1200 = vmatmul.msk.bf16.vlgmr.msra.gmra.mxu1 %vm455_vm1, %v501_v12  ;;  %v581_v13 = vunpack.c.l.b16 %v501_v12 }
  0xa6   : > { %v582_v14 = vpack.c.b16 %v581_v13, %v581_v13 }
  0xa8   : > { %671 = vrot.lane.b32.xlu2 %v582_v14, %s1354_s13  ;;  %753 = vrot.lane.b32.xlu1 %v582_v14, %s1355_s7 }
  0xa9   : > { %583 = vrot.lane.b32.xlu0 %v582_v14, %s1356_s16 }
 0x102   : > { %v672_v21 = vpop.permute.xlu2 %671 }
 0x103   : > { %1204 = vmatmul.msk.bf16.vlgmr.msrb.gmra.mxu0 %vm455_vm1, %v672_v21 }
 0x11a   : > { %v754_v27 = vpop.permute.xlu1 %753 }
 0x11b   : > { %v584_v22 = vpop.permute.xlu0 %583 }
 0x11c   : > { %1202 = vmatmul.msk.bf16.vlgmr.msra.gmra.mxu3 %vm455_vm1, %v584_v22 }
 0x121   : > { %v520_v23 = vpop.f32.mrf.mxu1 }
 0x122   : > { %v1476_v24 = vmul.f32 0.35355338, %v520_v23 }
 0x124   : > { %v526_v25 = vsel %vm455_vm1, %v1476_v24, -inf }
 0x125   : > { %527 = vmax.xlane.f32.xlu0 %v526_v25 }
 0x129   : > { %v522_v26 = vpop.f32.mrf.mxu1 }
 0x12c   : > { %1206 = vmatmul.msk.bf16.vlgmr.msrb.gmra.mxu3 %vm455_vm1, %v754_v27 }
 0x180   : > { %v690_v31 = vpop.f32.mrf.mxu0 }
 0x181   : > { %v1487_v32 = vmul.f32 0.35355338, %v690_v31 }
 0x183   : > { %v697_v33 = vsel %vm455_vm1, %v1487_v32, -inf }
 0x184   : > { %698 = vmax.xlane.f32.xlu2 %v697_v33 }
 0x188   : > { %v692_v34 = vpop.f32.mrf.mxu0 }
 0x198   : > { %v528_v36 = vpop.xlane.xlu0 %527 }
 0x199   : > { %v1500_v37 = vmax.f32 %v1497_v35, %v528_v36  ;;  %v541_v36 = vld [vmem:[#allocation3] sm:$0xff] }
 0x19b   : > { %v530_v38 = vsub.f32 %v1497_v35, %v1500_v37  ;;  %579 = vst.msk [vmem:[#allocation2] sm:$0xff] %vm446_vm3, %v1500_v37  ;;  %535 = vperm.xlu0 %1260, %v1500_v37  }
 0x19d   : > { %v531_v33 = vmul.f32 1.442695, %v530_v38 }
 0x19f   : > { %v605_v39 = vpop.f32.mrf.mxu3 }
 0x1a0   : > { %v1507_v40 = vmul.f32 0.35355338, %v605_v39 }
 0x1a2   : > { %v612_v41 = vsel %vm455_vm1, %v1507_v40, -inf }
 0x1a3   : > { %613 = vmax.xlane.f32.xlu1 %v612_v41 }
 0x1a7   : > { %v607_v42 = vpop.f32.mrf.mxu3 }
 0x1a8   : > { %v713_v42 = vld [vmem:[#allocation3 + $0x10] sm:$0xff] }
 0x1af   : > { %v772_v43 = vpop.f32.mrf.mxu3 }
 0x1b0   : > { %v1511_v44 = vmul.f32 0.35355338, %v772_v43 }
 0x1b2   : > { %v779_v45 = vsel %vm455_vm1, %v1511_v44, -inf }
 0x1b3   : > { %780 = vmax.xlane.f32.xlu2 %v779_v45 }
 0x1b7   : > { %v774_v46 = vpop.f32.mrf.mxu3 }
 0x1cb   : > { %647 = vrot.lane.b32.xlu2 %v646_v49, %s1356_s16 }
 0x1f7   : > { %v699_v51 = vpop.xlane.xlu2 %698 }
 0x1f8   : > { %v700_v52 = vmax.f32 %v696_v50, %v699_v51 }
 0x1fa   : > { %v701_v54 = vsub.f32 %v696_v50, %v700_v52  ;;  %752 = vst.msk [vmem:[#allocation2 + $0x10] sm:$0xff] %vm446_vm3, %v700_v52  ;;  %706 = vperm.xlu2 %1262, %v700_v52  }
 0x1fc   : > { %v702_v25 = vmul.f32 1.442695, %v701_v54 }
 0x202   : > { %729 = vrot.lane.b32.xlu2 %v646_v49, %s1354_s13 }
 0x20d   : > { %v536_v55 = vpop.permute.xlu0 %535 }
 0x20e   : > { %v538_v56 = vsub.f32 %v1476_v24, %v536_v55 }
 0x210   : > { %v539_v57 = vmul.f32 1.442695, %v538_v56  ;;  %v795_v56 = vld [vmem:[#allocation3 + $0x18] sm:$0xff] }
 0x212   : > { %1265 = vpow2.f32 %v539_v57 }
 0x216   : > { %v614_v59 = vpop.xlane.xlu1 %613 }
 0x217   : > { %v1527_v60 = vmax.f32 %v1524_v58, %v614_v59 }
 0x218   : > { %v1266_v61 = vpop.eup %1265 }
 0x219   : > { %v616_v62 = vsub.f32 %v1524_v58, %v1527_v60  ;;  %670 = vst.msk [vmem:[#allocation2 + $0x8] sm:$0xff] %vm446_vm3, %v1527_v60  ;;  %621 = vperm.xlu1 %1261, %v1527_v60   ;;  %v556_v63 = vpack.c.bf16 %v1266_v61, %v1266_v61  ;;  %v543_v9 = vsel %vm455_vm1, %v1266_v61, 0.0  ;;  %v721_v61 = vld [vmem:[#allocation4 + $0x10] sm:$0xff] }
 0x21b   : > { %1201 = vmatmul.msk.bf16.vlgmr.msra.gmra.mxu2 %vm455_vm1, %v556_v63  ;;  %v617_v37 = vmul.f32 1.442695, %v616_v62 }
 0x226   : > { %v781_v1 = vpop.xlane.xlu2 %780 }
 0x227   : > { %v1538_v2 = vmax.f32 %v1535_v0, %v781_v1 }
 0x229   : > { %v783_v3 = vsub.f32 %v1535_v0, %v1538_v2  ;;  %834 = vst.msk [vmem:[#allocation2 + $0x18] sm:$0xff] %vm446_vm3, %v1538_v2  ;;  %788 = vperm.xlu1 %1261, %v1538_v2   ;;  %v838_v2 = vld [vmem:[#allocation8] sm:$0xf] }
 0x22b   : > { %v784_v53 = vmul.f32 1.442695, %v783_v3 }
 0x22e   : > { %v648_v4 = vpop.permute.xlu2 %647 }
 0x22f   : > { %v653_v5 = vsel %vm560_vm4, %v648_v4, 0  ;;  %v876_v4 = vsel %vm560_vm4, %v838_v2, 0 }
 0x230   : > { %662 = vmatpush.bf16.msrb.mxu2 %v653_v5  ;;  %885 = vmatpush.bf16.msra.mxu0 %v876_v4 }
 0x231   : > { %811 = vrot.lane.b32.xlu1 %v646_v49, %s1355_s7  ;;  %v628_v49 = vld [vmem:[#allocation3 + $0x8] sm:$0xff] }
 0x254   : > { %v707_v6 = vpop.permute.xlu2 %706 }
 0x255   : > { %v709_v7 = vsub.f32 %v1487_v32, %v707_v6 }
 0x257   : > { %v710_v8 = vmul.f32 1.442695, %v709_v7 }
 0x259   : > { %1267 = vpow2.f32 %v710_v8  ;;  %v549_v8 = vld [vmem:[#allocation4] sm:$0xff] }
 0x25b   : > { %544 = vadd.xlane.f32.xlu1 %v543_v9 }
 0x25c   : > { %v730_v10 = vpop.permute.xlu2 %729 }
 0x25d   : > { %v735_v11 = vsel %vm560_vm4, %v730_v10, 0 }
 0x25e   : > { %744 = vmatpush.bf16.msrb.mxu1 %v735_v11 }
 0x25f   : > { %v1268_v12 = vpop.eup %1267 }
 0x260   : > { %v715_v13 = vsel %vm455_vm1, %v1268_v12, 0.0  ;;  %v728_v14 = vpack.c.bf16 %v1268_v12, %v1268_v12 }
 0x261   : > { %716 = vadd.xlane.f32.xlu0 %v715_v13 }
 0x262   : > { %1205 = vmatmul.msk.bf16.vlgmr.msrb.gmra.mxu1 %vm455_vm1, %v728_v14 }
 0x28b   : > { %v622_v15 = vpop.permute.xlu1 %621 }
 0x28c   : > { %v624_v16 = vsub.f32 %v1507_v40, %v622_v15 }
 0x28e   : > { %v625_v17 = vmul.f32 1.442695, %v624_v16 }
 0x290   : > { %1269 = vpow2.f32 %v625_v17 }
 0x296   : > { %v1270_v18 = vpop.eup %1269 }
 0x297   : > { %v630_v19 = vsel %vm455_vm1, %v1270_v18, 0.0  ;;  %v643_v20 = vpack.c.bf16 %v1270_v18, %v1270_v18 }
 0x298   : > { %631 = vadd.xlane.f32.xlu0 %v630_v19  ;;  %v840_v19 = vld [vmem:[#allocation8 + $0x8] sm:$0xf] }
 0x299   : > { %1203 = vmatmul.msk.bf16.vlgmr.msrb.gmra.mxu2 %vm455_vm1, %v643_v20 }
 0x29b   : > { %v789_v21 = vpop.permute.xlu1 %788 }
 0x29c   : > { %v791_v22 = vsub.f32 %v1511_v44, %v789_v21  ;;  %v962_v21 = vsel %vm560_vm4, %v840_v19, 0  ;;  %v1264_v19 = vld [vmem:[%s1616_s6] ss:$0 sm:$0xff] }
 0x29d   : > { %971 = vmatpush.bf16.msra.mxu3 %v962_v21 }
 0x29e   : > { %v792_v23 = vmul.f32 1.442695, %v791_v22  ;;  %v1556_v24 = vpop.f32.mrf.mxu2 }
 0x2a0   : > { %1271 = vpow2.f32 %v792_v23 }
 0x2a1   : > { %1273 = vpow2.f32 %v702_v25 }
 0x2a2   : > { %1275 = vpow2.f32 %v531_v33 }
 0x2a3   : > { %v812_v26 = vpop.permute.xlu1 %811  ;;  %1277 = vpow2.f32 %v617_v37 }
 0x2a4   : > { %v817_v27 = vsel %vm560_vm4, %v812_v26, 0  ;;  %1279 = vpow2.f32 %v784_v53 }
 0x2a5   : > { %826 = vmatpush.bf16.msra.mxu2 %v817_v27 }
 0x2a6   : > { %v1272_v28 = vpop.eup %1271  ;;  %v575_v29 = vpop.f32.mrf.mxu2 }
 0x2a7   : > { %v810_v30 = vpack.c.bf16 %v1272_v28, %v1272_v28  ;;  %v797_v31 = vsel %vm455_vm1, %v1272_v28, 0.0  ;;  %v1274_v32 = vpop.eup %1273 }
 0x2a8   : > { %798 = vadd.xlane.f32.xlu2 %v797_v31  ;;  %v1276_v34 = vpop.eup %1275  ;;  %v714_v43 = vmul.f32 %v1274_v32, %v713_v42 }
 0x2a9   : > { %1207 = vmatmul.msk.bf16.vlgmr.msra.gmra.mxu2 %vm455_vm1, %v810_v30  ;;  %v542_v39 = vmul.f32 %v1276_v34, %v541_v36  ;;  %v1278_v38 = vpop.eup %1277 }
 0x2aa   : > { %v629_v50 = vmul.f32 %v1278_v38, %v628_v49  ;;  %v1280_v55 = vpop.eup %1279 }
 0x2ab   : > { %v796_v57 = vmul.f32 %v1280_v55, %v795_v56 }
 0x2ac   : > { %724 = vperm.xlu0 %1260, %v1274_v32  }
 0x2ce   : > { %v545_v40 = vpop.xlane.xlu1 %544 }
 0x2cf   : > { %v546_v41 = vadd.f32 %v545_v40, %v542_v39 }
 0x2d1   : > { %548 = vst.msk [vmem:[#allocation3] sm:$0xff] %vm446_vm3, %v546_v41 }
 0x2d4   : > { %v717_v44 = vpop.xlane.xlu0 %716 }
 0x2d5   : > { %v718_v45 = vadd.f32 %v717_v44, %v714_v43 }
 0x2d7   : > { %719 = vst.msk [vmem:[#allocation3 + $0x10] sm:$0xff] %vm446_vm3, %v718_v45  ;;  %v841_v45 = vld [vmem:[#allocation8 + $0xc] sm:$0xf] }
 0x2d8   : > { %v850_v46 = vld [vmem:[#allocation3] sm:$0xff] }
 0x2d9   : > { %853 = vperm.xlu2 %1262, %v850_v46   ;;  %v839_v46 = vld [vmem:[#allocation8 + $0x4] sm:$0xf] }
 0x2de   : > { %v936_v47 = vld [vmem:[#allocation3 + $0x10] sm:$0xff] }
 0x2df   : > { %v746_v48 = vpop.f32.mrf.mxu1  ;;  %939 = vperm.xlu1 %1261, %v936_v47   ;;  %v1005_v47 = vsel %vm560_vm4, %v841_v45, 0 }
 0x2e0   : > { %1014 = vmatpush.bf16.msrb.mxu2 %v1005_v47 }
 0x2e1   : > { %552 = vperm.xlu2 %1262, %v1276_v34  }
 0x2e7   : > { %v748_v35 = vpop.f32.mrf.mxu1 }
 0x2e8   : > { %v803_v35 = vld [vmem:[#allocation4 + $0x18] sm:$0xff] }
 0x30b   : > { %v632_v51 = vpop.xlane.xlu0 %631 }
 0x30c   : > { %v633_v52 = vadd.f32 %v632_v51, %v629_v50 }
 0x30e   : > { %634 = vst.msk [vmem:[#allocation3 + $0x8] sm:$0xff] %vm446_vm3, %v633_v52 }
 0x315   : > { %v893_v54 = vld [vmem:[#allocation3 + $0x8] sm:$0xff] }
 0x316   : > { %896 = vperm.xlu1 %1261, %v893_v54   ;;  %v636_v54 = vld [vmem:[#allocation4 + $0x8] sm:$0xff] }
 0x31b   : > { %v799_v58 = vpop.xlane.xlu2 %798 }
 0x31c   : > { %v800_v59 = vadd.f32 %v799_v58, %v796_v57  ;;  %v1573_v60 = vpop.f32.mrf.mxu2 }
 0x31e   : > { %801 = vst.msk [vmem:[#allocation3 + $0x18] sm:$0xff] %vm446_vm3, %v800_v59  ;;  %806 = vperm.xlu1 %1261, %v1280_v55   ;;  %v725_v62 = vpop.permute.xlu0 %724 }
 0x31f   : > { %v727_v63 = vmul.f32 %v725_v62, %v721_v61 }
 0x321   : > { %v750_v0 = vadd.f32 %v746_v48, %v727_v63  ;;  %v919_v48 = vsel %vm560_vm4, %v839_v46, 0 }
 0x322   : > { %928 = vmatpush.bf16.msra.mxu1 %v919_v48 }
 0x323   : > { %751 = vst.msk [vmem:[#allocation4 + $0x10] sm:$0xff] %vm455_vm1, %v750_v0 }
 0x324   : > { %v666_v1 = vpop.f32.mrf.mxu2 }
 0x325   : > { %v979_v3 = vld [vmem:[#allocation3 + $0x18] sm:$0xff] }
 0x326   : > { %982 = vperm.xlu0 %1260, %v979_v3  }
 0x32a   : > { %v935_v40 = vld [vmem:[#allocation4 + $0x10] sm:$0xff] }
 0x32c   : > { %v828_v5 = vpop.f32.mrf.mxu2 }
 0x32e   : > { %639 = vperm.xlu0 %1260, %v1278_v38  }
 0x333   : > { %v854_v6 = vpop.permute.xlu2 %853 }
 0x334   : > { %1281 = vrcp.f32 %v854_v6  ;;  %v830_v7 = vpop.f32.mrf.mxu2  ;;  %v867_v17 = vand.u32 2147483648, %v854_v6  ;;  %vm861_vm6 = vweird.f32 %v854_v6  ;;  %v865_v18 = vand.u32 2147483647, %v854_v6 }
 0x336   : > { %v868_v22 = vor.u32 1.1754944e-38, %v867_v17  ;;  %vm866_vm8 = vcmp.eq.f32.partialorder %v865_v18, 8.507059e+37  ;;  %v842_v17 = vld [vmem:[%s1451_s30] sm:$0xf] }
 0x337   : > { %v843_v18 = vunpack.c.l.bf16 %v842_v17 }
 0x33a   : > { %v1282_v9 = vpop.eup %1281 }
 0x33b   : > { %v857_v10 = vmul.f32 %v1282_v9, %v854_v6  ;;  %v553_v11 = vpop.permute.xlu2 %552  ;;  %vm862_vm5 = vweird.f32 %v1282_v9 }
 0x33c   : > { %v555_v12 = vmul.f32 %v553_v11, %v549_v8  ;;  %vm863_vm7 = vmor %vm861_vm6, %vm862_vm5 }
 0x33d   : > { %v858_v13 = vsub.f32 1.0, %v857_v10 }
 0x33e   : > { %v577_v14 = vadd.f32 %v1556_v24, %v555_v12 }
 0x33f   : > { %v859_v15 = vmul.f32 %v1282_v9, %v858_v13 }
 0x340   : > { %578 = vst.msk [vmem:[#allocation4] sm:$0xff] %vm455_vm1, %v577_v14 }
 0x341   : > { %v860_v16 = vadd.f32 %v1282_v9, %v859_v15 }
 0x343   : > { %v864_v20 = vsel %vm863_vm7, %v1282_v9, %v860_v16 }
 0x344   : > { %v869_v23 = vsel %vm866_vm8, %v868_v22, %v864_v20  ;;  %v848_v20 = vadd.f32 %v1264_v19, %v843_v18 }
 0x347   : > { %v849_v25 = vld [vmem:[#allocation4] sm:$0xff] }
 0x348   : > { %v870_v26 = vmul.f32 %v869_v23, %v849_v25 }
 0x34a   : > { %v871_v24 = vpack.c.bf16 %v870_v26, %v870_v26 }
 0x34c   : > { %1208 = vmatmul.msk.bf16.vlgmr.msra.gmra.mxu0 %vm455_vm1, %v871_v24 }
 0x351   : > { %v940_v27 = vpop.permute.xlu1 %939 }
 0x352   : > { %1283 = vrcp.f32 %v940_v27  ;;  %v953_v31 = vand.u32 2147483648, %v940_v27  ;;  %v951_v33 = vand.u32 2147483647, %v940_v27  ;;  %vm947_vm10 = vweird.f32 %v940_v27 }
 0x354   : > { %v954_v36 = vor.u32 1.1754944e-38, %v953_v31  ;;  %vm952_vm12 = vcmp.eq.f32.partialorder %v951_v33, 8.507059e+37 }
 0x358   : > { %v1284_v28 = vpop.eup %1283 }
 0x359   : > { %v943_v29 = vmul.f32 %v1284_v28, %v940_v27  ;;  %vm948_vm9 = vweird.f32 %v1284_v28 }
 0x35a   : > { %vm949_vm11 = vmor %vm947_vm10, %vm948_vm9 }
 0x35b   : > { %v944_v30 = vsub.f32 1.0, %v943_v29 }
 0x35d   : > { %v945_v32 = vmul.f32 %v1284_v28, %v944_v30 }
 0x35f   : > { %v946_v34 = vadd.f32 %v1284_v28, %v945_v32 }
 0x361   : > { %v950_v39 = vsel %vm949_vm11, %v1284_v28, %v946_v34  ;;  %v1360_v34 = vmov 32.0  }
 0x362   : > { %v955_v41 = vsel %vm952_vm12, %v954_v36, %v950_v39 }
 0x363   : > { %v956_v42 = vmul.f32 %v955_v41, %v935_v40 }
 0x365   : > { %v957_v43 = vpack.c.bf16 %v956_v42, %v956_v42 }
 0x367   : > { %1210 = vmatmul.msk.bf16.vlgmr.msra.gmra.mxu3 %vm455_vm1, %v957_v43 }
 0x388   : > { %v897_v44 = vpop.permute.xlu1 %896 }
 0x389   : > { %1285 = vrcp.f32 %v897_v44  ;;  %v910_v3 = vand.u32 2147483648, %v897_v44  ;;  %vm904_vm3 = vweird.f32 %v897_v44 }
 0x38b   : > { %v911_v10 = vor.u32 1.1754944e-38, %v910_v3 }
 0x38f   : > { %v1286_v50 = vpop.eup %1285 }
 0x390   : > { %v807_v37 = vpop.permute.xlu1 %806  ;;  %v900_v52 = vmul.f32 %v1286_v50, %v897_v44  ;;  %vm905_vm14 = vweird.f32 %v1286_v50 }
 0x391   : > { %v809_v38 = vmul.f32 %v807_v37, %v803_v35  ;;  %vm906_vm5 = vmor %vm904_vm3, %vm905_vm14 }
 0x392   : > { %v901_v53 = vsub.f32 1.0, %v900_v52 }
 0x393   : > { %v832_v49 = vadd.f32 %v828_v5, %v809_v38  ;;  %v908_v5 = vand.u32 2147483647, %v897_v44 }
 0x394   : > { %v902_v58 = vmul.f32 %v1286_v50, %v901_v53 }
 0x395   : > { %833 = vst.msk [vmem:[#allocation4 + $0x18] sm:$0xff] %vm455_vm1, %v832_v49  ;;  %vm909_vm7 = vcmp.eq.f32.partialorder %v908_v5, 8.507059e+37 }
 0x396   : > { %v903_v2 = vadd.f32 %v1286_v50, %v902_v58  ;;  %v1055_v58 = vstv %s1054_s26 }
 0x398   : > { %v983_v51 = vpop.permute.xlu0 %982  ;;  %v907_v8 = vsel %vm906_vm5, %v1286_v50, %v903_v2 }
 0x399   : > { %1287 = vrcp.f32 %v983_v51  ;;  %v996_v62 = vand.u32 2147483648, %v983_v51  ;;  %v994_v1 = vand.u32 2147483647, %v983_v51  ;;  %vm990_vm15 = vweird.f32 %v983_v51 }
 0x39a   : > { %v912_v12 = vsel %vm909_vm7, %v911_v10, %v907_v8  ;;  %1289 = vrcp.f32 %v1360_v34 }
 0x39b   : > { %v997_v6 = vor.u32 1.1754944e-38, %v996_v62  ;;  %vm995_vm6 = vcmp.eq.f32.partialorder %v994_v1, 8.507059e+37 }
 0x39f   : > { %v1288_v55 = vpop.eup %1287 }
 0x3a0   : > { %v986_v56 = vmul.f32 %v1288_v55, %v983_v51  ;;  %v640_v57 = vpop.permute.xlu0 %639  ;;  %vm991_vm13 = vweird.f32 %v1288_v55  ;;  %v1290_v36 = vpop.eup %1289 }
 0x3a1   : > { %v642_v59 = vmul.f32 %v640_v57, %v636_v54  ;;  %vm992_vm4 = vmor %vm990_vm15, %vm991_vm13  ;;  %v1026_v39 = vmul.f32 32.0, %v1290_v36 }
 0x3a2   : > { %v987_v61 = vsub.f32 1.0, %v986_v56 }
 0x3a3   : > { %v668_v63 = vadd.f32 %v1573_v60, %v642_v59  ;;  %v978_v60 = vld [vmem:[#allocation4 + $0x18] sm:$0xff]  ;;  %v1027_v40 = vsub.f32 1.0, %v1026_v39 }
 0x3a4   : > { %v988_v0 = vmul.f32 %v1288_v55, %v987_v61 }
 0x3a5   : > { %669 = vst.msk [vmem:[#allocation4 + $0x8] sm:$0xff] %vm455_vm1, %v668_v63  ;;  %v1028_v41 = vmul.f32 %v1290_v36, %v1027_v40 }
 0x3a6   : > { %v989_v4 = vadd.f32 %v1288_v55, %v988_v0 }
 0x3a7   : > { %v1029_v42 = vadd.f32 %v1290_v36, %v1028_v41 }
 0x3a8   : > { %v993_v7 = vsel %vm992_vm4, %v1288_v55, %v989_v4  ;;  %v1052_v55 = vstv %s1051_s24 }
 0x3a9   : > { %v998_v9 = vsel %vm995_vm6, %v997_v6, %v993_v7 }
 0x3aa   : > { %v999_v11 = vmul.f32 %v998_v9, %v978_v60 }
 0x3ac   : > { %v1000_v13 = vpack.c.bf16 %v999_v11, %v999_v11  ;;  %v892_v14 = vld [vmem:[#allocation4 + $0x8] sm:$0xff] }
 0x3ad   : > { %v913_v15 = vmul.f32 %v912_v12, %v892_v14 }
 0x3ae   : > { %1211 = vmatmul.msk.bf16.vlgmr.msrb.gmra.mxu2 %vm455_vm1, %v1000_v13 }
 0x3af   : > { %v914_v16 = vpack.c.bf16 %v913_v15, %v913_v15 }
 0x3b1   : > { %1209 = vmatmul.msk.bf16.vlgmr.msra.gmra.mxu1 %vm455_vm1, %v914_v16  ;;  %vm1030_vm1 = vweird.f32 %v1290_v36 }
 0x3b2   : > { %v1031_v43 = vsel %vm1030_vm1, %v1290_v36, %v1029_v42 }
 0x3c9   : > { %v887_v21 = vpop.f32.mrf.mxu0 }
 0x3ca   : > { %v891_v22 = vadd.f32 %v887_v21, %v848_v20 }
 0x3d1   : > { %v889_v23 = vpop.f32.mrf.mxu0 }
 0x3ea   : > { %v973_v25 = vpop.f32.mrf.mxu3 }
 0x3f2   : > { %v975_v26 = vpop.f32.mrf.mxu3 }
 0x42e   : > { %v930_v24 = vpop.f32.mrf.mxu1 }
 0x42f   : > { %v934_v27 = vadd.f32 %v930_v24, %v891_v22 }
 0x431   : > { %v977_v28 = vadd.f32 %v973_v25, %v934_v27  ;;  %v1016_v29 = vpop.f32.mrf.mxu2 }
 0x433   : > { %v1020_v30 = vadd.f32 %v1016_v29, %v977_v28 }
 0x435   : > { %v1022_v31 = vsel %vm481_vm0, %v1020_v30, 0.0 }
 0x436   : > { %v932_v32 = vpop.f32.mrf.mxu1  ;;  %1023 = vadd.xlane.f32.xlu2 %v1022_v31 }
 0x439   : > { %v1018_v33 = vpop.f32.mrf.mxu2 }
 0x4a9   : > { %v1024_v44 = vpop.xlane.xlu2 %1023 }
 0x4aa   : > { %v1032_v45 = vmul.f32 %v1031_v43, %v1024_v44 }
 0x4ac   : > { %v1033_v46 = vsub.f32 %v1020_v30, %v1032_v45 }
 0x4ae   : > { %v1034_v47 = vmul.f32 %v1033_v46, %v1033_v46 }
 0x4b0   : > { %v1035_v48 = vsel %vm481_vm0, %v1034_v47, 0.0 }
 0x4b1   : > { %1036 = vadd.xlane.f32.xlu1 %v1035_v48 }
 0x524   : > { %v1037_v35 = vpop.xlane.xlu1 %1036 }
 0x525   : > { %v1038_v37 = vmul.f32 %v1037_v35, %v1031_v43 }
 0x527   : > { %v1039_v38 = vadd.f32 1e-06, %v1038_v37 }
 0x529   : > { %1291 = vrsqrt.f32 %v1039_v38  ;;  %vm1046_vm9 = vweird.f32 %v1039_v38 }
 0x52f   : > { %v1292_v49 = vpop.eup %1291 }
 0x530   : > { %v1041_v50 = vmul.f32 %v1292_v49, %v1039_v38  ;;  %vm1047_vm8 = vweird.f32 %v1292_v49 }
 0x531   : > { %vm1048_vm10 = vmor %vm1046_vm9, %vm1047_vm8 }
 0x532   : > { %v1042_v51 = vmul.f32 %v1292_v49, %v1041_v50 }
 0x534   : > { %v1043_v52 = vmul.f32 0.5, %v1042_v51 }
 0x536   : > { %v1044_v53 = vsub.f32 1.5, %v1043_v52 }
 0x538   : > { %v1045_v54 = vmul.f32 %v1292_v49, %v1044_v53 }
 0x53a   : > { %v1049_v56 = vsel %vm1048_vm10, %v1292_v49, %v1045_v54 }
 0x53b   : > { %v1050_v57 = vmul.f32 %v1049_v56, %v1033_v46 }
 0x53d   : > { %v1053_v59 = vmul.f32 %v1052_v55, %v1050_v57 }
 0x53f   : > { %v1056_v61 = vadd.f32 %v1055_v58, %v1053_v59 }
 0x541   : > { %v1057_v62 = vpack.c.bf16 %v1056_v61, %v1056_v61 }
 0x543   : > { %1059 = vst.msk [vmem:[%s440_s29] sm:$0xf] %vm499_vm2, %v1057_v62 }
 0x544 PF: > { %s22_s15 = sadd.s32 1, %s1349_s15   ;;  %s1620_s13 = smov %s1345_s14 }
 0x545   : > { %p19_p8 = scmp.ge.s32.totalorder %s22_s15, 4   ;;  %s1621_s14 = smov %s1623_s8 }
 0x547   :  { %21 = sbr.rel (!%p19_p8) target bundleno = 5 (0x5), region = 114 }
 0x54c   :  { %1085 = vsyncpa [#allocation9], 1 }
 0x54d   :  { %1087 = vsyncpa [#allocation9 + $0x1], 1 }

// kernel: transformer_decoder_block.9
= control target key start
LH: loop header
LB: loop body
LE: loop exit
PB: predicated region body
PF: predicated region fallthrough
CT: control target
= control target key end

     0   :  { %s795_s0 = inlined_call_operand.vmem [shape: bf16[16,32], index: 0, kind: input, shape index: {}]   ;;  %s796_s1 = inlined_call_operand.vmem [shape: bf16[32,64], index: 1, kind: input, shape index: {}]   ;;  %s797_s2 = inlined_call_operand.vmem [shape: f32[1,64], index: 2, kind: input, shape index: {}]   ;;  %s798_s3 = inlined_call_operand.vmem [shape: bf16[64,32], index: 3, kind: input, shape index: {}]   ;;  %s799_s4 = inlined_call_operand.vmem [shape: f32[1,32], index: 4, kind: input, shape index: {}]   ;;  %s800_s5 = inlined_call_operand.<no memory space> [shape: f32[1], index: 5, kind: input, shape index: {}]   ;;  %s801_s6 = inlined_call_operand.<no memory space> [shape: f32[1], index: 6, kind: input, shape index: {}]   ;;  %s802_s7 = inlined_call_operand.hbm [shape: f32[16,32], index: 7, kind: output, shape index: {}]  }
   0x1   :  { %12 = sst [smem:[#allocation2]] %s800_s5 }
   0x2   :  { %13 = sst [smem:[#allocation3]] %s801_s6 }
   0x3   :  { %14 = vsyncpa [#allocation5], 0 }
   0x4   :  { %16 = vsyncpa [#allocation5 + $0x1], 0  ;;  %s682_s28 = smov 0   ;;  %s684_s29 = smov 0  }
   0x5   :  { %s686_s30 = smov 0   ;;  %s688_s8 = smov 0  }
   0x6 LB: > { %s703_s5 = sadd.s32 4294967295, %s633_s8   ;;  %s483_s6 = sadd.s32 4294967294, %s633_s8   ;;  %s633_s8 = sphi %s688_s8, %s808_s8   ;;  %s629_s30 = sphi %s686_s30, %s807_s30   ;;  %s625_s29 = sphi %s684_s29, %s806_s29   ;;  %s621_s28 = sphi %s682_s28, %s805_s28  }
   0x7   : > { %s707_s9 = sadd.s32 1, %s633_s8   ;;  %s181_s10 = sadd.s32 1, %s629_s30 }
   0x8   : > { %s178_s11 = ssub.s32 %s633_s8, %s707_s9  ;;  %p191_p0 = scmp.ne.s32.totalorder %s629_s30, %s625_s29 }
   0x9   : > { %p179_p1 = scmp.eq.s32.totalorder %s178_s11, 0  ;;  %p192_p2 = scmp.eq.s32.totalorder %s703_s5, 1 }
   0xa   : > { %p197_p3 = scmp.ne.s32.totalorder %s625_s29, %s621_s28  ;;  %p198_p4 = scmp.eq.s32.totalorder %s483_s6, 1 }
   0xb   : > { %s718_s12 = scalar_select %p179_p1, %s629_s30, %s181_s10  }
   0xc   : > { %p720_p5 = por %p192_p2, %p191_p0  ;;  %p724_p6 = por %p198_p4, %p197_p3 }
   0xd   : > { %p486_p7 = scmp.ge.s32.totalorder %s633_s8, 1  ;;  %p241_p8 = scmp.lt.s32.totalorder %s633_s8, 3 }
   0xf   : > { %p242_p9 = pnand %p486_p7, %p241_p8 }
  0x10   : > { %p272_p10 = scmp.lt.s32.totalorder (!%p242_p9), %s703_s5, 1  ;;  %s401_s20 = sld [smem:[#allocation2]] (!%p242_p9) }
  0x11   : > { %245 = sbr.rel (%p242_p9) target bundleno = 563 (0x233), region = 48  ;;  %s404_s22 = sld [smem:[#allocation3]] (!%p242_p9) }
  0x12   : > { %s591_s19 = scalar_lea.hbm (!%p242_p9), %s802_s7, 16 }
  0x16   : > { %v520_v0 = vld [vmem:[%s796_s1 + $0x8] sm:$0xff]  ;;  %v524_v1 = vld [vmem:[%s798_s3 + $0x18] sm:$0xff]  ;;  %v519_v2 = vld [vmem:[%s796_s1] sm:$0xff]  ;;  %s273_s21 = scalar_select %p272_p10, %s703_s5, 1  ;;  %vm298_vm0 = vcmask 261120   ;;  %vm353_vm1 = vcmask 523264   ;;  %v402_v42 = vstv %s401_s20 }
  0x17   : > { %308 = vmatpush.bf16.msra.mxu0 %v520_v0  ;;  %361 = vmatpush.bf16.msra.mxu1 %v524_v1  ;;  %v523_v3 = vld [vmem:[%s798_s3 + $0x10] sm:$0xff]  ;;  %v522_v5 = vld [vmem:[%s798_s3 + $0x8] sm:$0xff]  ;;  %v521_v6 = vld [vmem:[%s798_s3] sm:$0xff]  ;;  %v635_v20 = vmov 32.0   ;;  %v405_v44 = vstv %s404_s22 }
  0x18   : > { %s488_s24 = sshll.u32 %s273_s21, 2  ;;  %v565_v7 = vld [vmem:[%s797_s2] ss:$0 sm:$0xff]  ;;  %567 = vrcp.f32 %v635_v20  ;;  %s269_s21 = sand.u32 1, %s625_s29  }
  0x19   : > { %s275_s27 = scalar_lea.vmem %s795_s0, %s488_s24  ;;  %v566_v13 = vld [vmem:[%s799_s4] ss:$0 sm:$0xff]  ;;  %s487_s23 = sshll.u32 %s269_s21, 3 }
  0x1a   : > { %v277_v4 = vld [vmem:[%s275_s27] sm:$0xf]  ;;  %s516_s24 = sshll.u32 %s703_s5, 3  ;;  %s271_s6 = scalar_lea.vmem [#allocation4], %s487_s23 }
  0x1b   : > { %309 = vmatpush.bf16.msra.mxu0 %v519_v2  ;;  %362 = vmatpush.bf16.msra.mxu1 %v523_v3  ;;  %v370_v14 = vunpack.c.l.bf16 %v277_v4  ;;  %s419_s27 = scalar_lea.hbm %s802_s7, %s516_s24  ;;  %s421_s10 = sshll.u32 %s271_s6, 4  ;;  %s422_s10 = int_to_ptr.vmem [resolvable:$true] %s421_s10 }
  0x1c   : > { %s423_s11 = sshll.u32 %s419_s27, 4  ;;  %s409_s5 = scalar_lea.sflag [#allocation5], %s269_s21  ;;  %s424_s11 = int_to_ptr.hbm [resolvable:$true] %s423_s11 }
  0x1d   : > { %s585_s15 = sshra.s32 %s424_s11, 4  ;;  %s586_s15 = int_to_ptr.hbm [resolvable:$true] %s585_s15 }
  0x1e   : > { %497 = vmatmul.msk.bf16.vlgmr.msra.gmra.mxu0 %vm298_vm0, %v277_v4  ;;  %v568_v21 = vpop.eup %567  ;;  %s587_s16 = scalar_lea.hbm %s586_s15, 8  ;;  %p592_p0 = scmp.lt.s32.totalorder %s586_s15, %s802_s7 }
  0x1f   : > { %363 = vmatpush.bf16.msra.mxu1 %v522_v5  ;;  %v376_v22 = vmul.f32 32.0, %v568_v21  ;;  %vm380_vm2 = vweird.f32 %v568_v21  ;;  %p588_p11 = scmp.ne.s32.totalorder %s586_s15, %s587_s16  ;;  %p593_p1 = scmp.lt.s32.totalorder %s591_s19, %s587_s16 }
  0x21   : > { %v377_v23 = vsub.f32 1.0, %v376_v22  ;;  %p589_p12 = pnand %p588_p11, %p720_p5  ;;  %p594_p2 = por %p593_p1, %p592_p0 }
  0x23   : > { %364 = vmatpush.bf16.msra.mxu1 %v521_v6  ;;  %v378_v24 = vmul.f32 %v568_v21, %v377_v23  ;;  %p590_p13 = pneg %p589_p12 }
  0x25   : > { %v379_v25 = vadd.f32 %v568_v21, %v378_v24  ;;  %p595_p3 = pnand %p594_p2, %p590_p13 }
  0x27   : > { %v381_v26 = vsel %vm380_vm2, %v568_v21, %v379_v25 }
  0x9b   : > { %v311_v8 = vpop.f32.mrf.mxu0 }
  0x9c   : > { %v312_v9 = vadd.f32 %v565_v7, %v311_v8 }
  0x9e   : > { %v315_v10 = vmax.f32 %v312_v9, 0.0 }
  0xa0   : > { %v316_v11 = vpack.c.bf16 %v315_v10, %v315_v10 }
  0xa2   : > { %514 = vmatmul.msk.bf16.vlgmr.msra.gmra.mxu1 %vm353_vm1, %v316_v11 }
  0xa3   : > { %v313_v12 = vpop.f32.mrf.mxu0 }
 0x11f   : > { %v366_v15 = vpop.f32.mrf.mxu1 }
 0x120   : > { %v367_v16 = vadd.f32 %v566_v13, %v366_v15 }
 0x122   : > { %v371_v17 = vadd.f32 %v370_v14, %v367_v16 }
 0x124   : > { %v372_v18 = vsel %vm298_vm0, %v371_v17, 0.0 }
 0x125   : > { %373 = vadd.xlane.f32.xlu0 %v372_v18 }
 0x127   : > { %v368_v19 = vpop.f32.mrf.mxu1 }
 0x198   : > { %v374_v27 = vpop.xlane.xlu0 %373 }
 0x199   : > { %v382_v28 = vmul.f32 %v381_v26, %v374_v27 }
 0x19b   : > { %v383_v29 = vsub.f32 %v371_v17, %v382_v28 }
 0x19d   : > { %v384_v30 = vmul.f32 %v383_v29, %v383_v29 }
 0x19f   : > { %v385_v31 = vsel %vm298_vm0, %v384_v30, 0.0 }
 0x1a0   : > { %386 = vadd.xlane.f32.xlu0 %v385_v31 }
 0x213   : > { %v387_v32 = vpop.xlane.xlu0 %386 }
 0x214   : > { %v388_v33 = vmul.f32 %v387_v32, %v381_v26 }
 0x216   : > { %v389_v34 = vadd.f32 1e-06, %v388_v33 }
 0x218   : > { %569 = vrsqrt.f32 %v389_v34  ;;  %vm396_vm4 = vweird.f32 %v389_v34 }
 0x21e   : > { %v570_v35 = vpop.eup %569 }
 0x21f   : > { %v391_v36 = vmul.f32 %v570_v35, %v389_v34  ;;  %vm397_vm3 = vweird.f32 %v570_v35 }
 0x220   : > { %vm398_vm5 = vmor %vm396_vm4, %vm397_vm3 }
 0x221   : > { %v392_v37 = vmul.f32 %v570_v35, %v391_v36 }
 0x223   : > { %v393_v38 = vmul.f32 0.5, %v392_v37 }
 0x225   : > { %v394_v39 = vsub.f32 1.5, %v393_v38 }
 0x227   : > { %v395_v40 = vmul.f32 %v570_v35, %v394_v39 }
 0x229   : > { %v399_v41 = vsel %vm398_vm5, %v570_v35, %v395_v40 }
 0x22a   : > { %v400_v43 = vmul.f32 %v399_v41, %v383_v29 }
 0x22c   : > { %v403_v45 = vmul.f32 %v402_v42, %v400_v43 }
 0x22e   : > { %v406_v46 = vadd.f32 %v405_v44, %v403_v45 }
 0x230   : > { %407 = vst.msk [vmem:[%s271_s6] sm:$0xff] %vm298_vm0, %v406_v46 }
 0x231   : > { %598 = shalt.err (!%p595_p3)
}
 0x232   : > { %525 = dma.vmem_to_hbm [thread:$0]  (%p720_p5), %s422_s10, 128, %s424_s11, %s409_s5  }
 0x233 PF: > { %p531_p4 = scmp.ge.s32.totalorder %s633_s8, 2  ;;  %s435_s21 = sand.u32 1, %s621_s28  }
 0x234   : > { %s436_s23 = scalar_lea.sflag [#allocation5], %s435_s21 }
 0x235   : > { %p528_p7 = pnand %p531_p4, %p724_p6 }
 0x237   : > { %p529_p8 = pneg %p528_p7 }
 0x239   : > { %616 = dma.done.wait (%p529_p8), %s436_s23, 128  }
 0x23a   : > { %618 = vsyncadd (%p529_p8), %s436_s23, 4294967168  ;;  %p19_p9 = scmp.ge.s32.totalorder %s707_s9, 4   ;;  %s805_s28 = smov %s625_s29 }
 0x23b   : > { %s806_s29 = smov %s629_s30  ;;  %s807_s30 = smov %s718_s12 }
 0x23c   : > { %s808_s8 = smov %s707_s9  ;;  %21 = sbr.rel (!%p19_p9) target bundleno = 6 (0x6), region = 83 }
 0x241   :  { %442 = vsyncpa [#allocation5], 1 }
 0x242   :  { %444 = vsyncpa [#allocation5 + $0x1], 1 }

</bundles_post_ra>
